<compile_context>
chip_gen: v5e
topology: v5e:2x2
jax: 0.10.0
libtpu: 0.0.40
codegen_flags: <defaults>
</compile_context>

<pallas_src>
import functools

import jax
import jax.numpy as jnp
from jax.experimental import pallas as pl
from jax.experimental.pallas import tpu as pltpu


def autoencoder_kernel(stats_ref, x_ref, we_ref, wd_ref, be_ref, bd_ref,
                       xrec_ref, acts_ref, part_ref, *, threshold):
    mean = stats_ref[0]          # global mean of x        (SMEM scalar, f32)
    inv_std = stats_ref[1]       # 1 / std(x, ddof=1)      (SMEM scalar, f32)

    x = x_ref[...].astype(jnp.float32)               # (TB, D), bf16 tile -> f32
    xn = (x - mean) * inv_std                        # global normalization

    b_dec = bd_ref[...]                              # (1, D) f32
    b_enc = be_ref[...]                              # (1, H) f32

    # pre_acts = addmm(b_enc, xn - b_dec, W_enc) -- bf16 into the MXU, f32 accumulate.
    lhs = (xn - b_dec).astype(jnp.bfloat16)
    pre_acts = jnp.dot(lhs, we_ref[...], preferred_element_type=jnp.float32) + b_enc
    acts = jnp.maximum(pre_acts, 0.0)                # relu

    # TODO(synk): l0_proxy = sigmoid((acts - threshold)/temperature) is computed in
    # the torch forward but never used in any returned value; omitted.
    m = acts > threshold                             # acts >= 0, so |acts|>thr == acts>thr
    acts_sparse = jnp.where(m, acts, 0.0)            # (TB, H)

    # x_reconstruct = addmm(b_dec, acts_sparse, W_dec)
    x_rec = jnp.dot(acts_sparse.astype(jnp.bfloat16), wd_ref[...],
                    preferred_element_type=jnp.float32) + b_dec

    diff = x_rec - xn

    # Sublane (batch-axis) partial reductions only; the lane reduction is finished
    # in the wrapper.  Lane-dense rows of the per-tile slab, no broadcast/where.
    r_sq = jnp.sum(diff * diff, axis=0, keepdims=True)              # (1, D)
    r_xn2 = jnp.sum(xn * xn, axis=0, keepdims=True)                 # (1, D)
    r_cnt = jnp.sum(m.astype(jnp.float32), axis=0, keepdims=True)   # (1, H)
    r_l1 = jnp.sum(acts_sparse, axis=0, keepdims=True)              # (1, H) (>=0, no abs)

    xrec_ref[...] = x_rec.astype(xrec_ref.dtype)     # bf16 writeback
    acts_ref[...] = acts_sparse.astype(acts_ref.dtype)

    d = r_sq.shape[1]
    h = r_cnt.shape[1]
    part_ref[...] = jnp.zeros_like(part_ref)
    part_ref[0:1, 0:d] = r_sq      # -> l2 / nmse numerator
    part_ref[1:2, 0:d] = r_xn2     # -> nmse denominator
    part_ref[2:3, 0:h] = r_cnt     # -> true_l0
    part_ref[3:4, 0:h] = r_l1      # -> l1


def _pick_batch_tile(B, min_steps=4):
    # Prefer >= min_steps grid steps (DMA/compute overlap + v7x dual-TC sharding)
    # while keeping TB >= 128 so per-step overhead / MXU M-dim stay reasonable.
    for t in (256, 128):
        if B % t == 0 and B // t >= min_steps:
            return t
    for t in (256, 128):
        if B % t == 0 and B // t >= 2:
            return t
    for t in (512, 256, 128, 64, 32, 16, 8):
        if B % t == 0:
            return t
    return B


def _vmem_budget_bytes(TB, D, H, L):
    bf16, f32 = 2, 4
    tiles = 2 * (TB * D * bf16)          # x input tile, double-buffered
    tiles += 2 * (TB * D * bf16)         # x_rec output tile
    tiles += 2 * (TB * H * bf16)         # acts output tile
    tiles += 2 * (8 * L * f32)           # partial-sum slab
    weights = 2 * (D * H * bf16)         # resident bf16 weights (enc + dec)
    biases = (D + H) * f32
    need = tiles + weights + biases
    # 2x margin for Mosaic scratch; cap at 48 MiB so it still fits v7x's 64 MiB.
    return int(min(max(2 * need, 16 * 2 ** 20), 48 * 2 ** 20))


def _resident_spec(shape, single_buffer):
    """BlockSpec for a grid-invariant (VMEM-resident) operand."""
    idx = lambda i: (0,) * len(shape)
    if single_buffer and hasattr(pl, "Buffered"):
        return pl.BlockSpec(shape, idx, pipeline_mode=pl.Buffered(1))
    return pl.BlockSpec(shape, idx)


def _build_autoencoder_call(B, D, H, TB, L, threshold, single_buffer_weights):
    nb = B // TB
    kernel = functools.partial(autoencoder_kernel, threshold=float(threshold))

    flops = 4 * B * D * H                       # two matmuls, 2*B*D*H each
    bytes_accessed = (2 * B * D                 # bf16 x in
                      + 2 * B * D               # bf16 x_rec out
                      + 2 * B * H               # bf16 acts_sparse out
                      + 2 * 2 * D * H           # bf16 weights (both directions)
                      + 4 * (D + H)             # biases
                      + 4 * nb * 8 * L + 8)     # partial sums + stats

    return pl.pallas_call(
        kernel,
        grid=(nb,),
        out_shape=(
            jax.ShapeDtypeStruct((B, D), jnp.bfloat16),       # x_reconstruct
            jax.ShapeDtypeStruct((B, H), jnp.bfloat16),       # acts_sparse
            jax.ShapeDtypeStruct((nb, 8, L), jnp.float32),    # per-tile loss partials
        ),
        in_specs=[
            pl.BlockSpec(memory_space=pltpu.MemorySpace.SMEM),           # stats
            pl.BlockSpec((TB, D), lambda i: (i, 0)),                     # x batch tile
            _resident_spec((D, H), single_buffer_weights),               # W_enc
            _resident_spec((H, D), single_buffer_weights),               # W_dec
            _resident_spec((1, H), single_buffer_weights),               # b_enc
            _resident_spec((1, D), single_buffer_weights),               # b_dec
        ],
        out_specs=(
            pl.BlockSpec((TB, D), lambda i: (i, 0)),
            pl.BlockSpec((TB, H), lambda i: (i, 0)),
            pl.BlockSpec((None, 8, L), lambda i: (i, 0, 0)),
        ),
        compiler_params=pltpu.CompilerParams(
            dimension_semantics=("parallel",),
            vmem_limit_bytes=_vmem_budget_bytes(TB, D, H, L),
        ),
        cost_estimate=pl.CostEstimate(flops=flops, transcendentals=0,
                                      bytes_accessed=bytes_accessed),
    )


def _global_stats(x32):
    """Single fused pass over x: shifted sums avoid E[x^2]-E[x]^2 cancellation."""
    n = x32.size
    shift = jnp.mean(x32[0])                   # cheap shift from one row
    xs = x32 - shift
    s1 = jnp.sum(xs)
    s2 = jnp.sum(xs * xs)
    mean = shift + s1 / n
    var = (s2 - (s1 * s1) / n) / (n - 1)       # torch .std() default: ddof=1
    inv_std = jax.lax.rsqrt(var)
    return mean, inv_std


def autoencoder_forward(x, W_enc, W_dec, b_enc, b_dec, *, threshold=0.3, l0_coeff=1.0):
    x32 = x.astype(jnp.float32)
    B, D = x32.shape
    H = W_enc.shape[1]
    TB = _pick_batch_tile(B)
    nb = B // TB
    L = 128 * pl.cdiv(max(D, H), 128)          # lane width of the partial slab

    mean, inv_std = _global_stats(x32)
    stats = jnp.stack([mean, inv_std]).astype(jnp.float32)   # (2,) -> SMEM

    args = (
        stats,
        x32.astype(jnp.bfloat16),                            # bf16 x tiles (half the kernel DMA-in)
        W_enc.astype(jnp.bfloat16),
        W_dec.astype(jnp.bfloat16),
        b_enc.reshape(1, -1).astype(jnp.float32),
        b_dec.reshape(1, -1).astype(jnp.float32),
    )

    try:
        call = _build_autoencoder_call(B, D, H, TB, L, threshold, True)
        x_rec, acts_sparse, partials = call(*args)
    except Exception:
        # Fallback for jax versions without pipeline_mode=pl.Buffered support.
        call = _build_autoencoder_call(B, D, H, TB, L, threshold, False)
        x_rec, acts_sparse, partials = call(*args)

    # Finalize scalar losses: finish the lane reduction of the per-tile partials.
    p = jnp.sum(partials, axis=0)              # (8, L)
    s_diff2 = jnp.sum(p[0])
    s_xn2 = jnp.sum(p[1])
    s_cnt = jnp.sum(p[2])
    s_l1 = jnp.sum(p[3])

    l2 = s_diff2 / B
    nmse = jnp.sqrt(s_diff2) / jnp.sqrt(s_xn2)
    tl0 = s_cnt / B
    l1 = s_l1 / B
    loss = l2 + l0_coeff * tl0
    return loss, x_rec, acts_sparse, l2, nmse, l1, tl0


def reference_forward(x, W_enc, W_dec, b_enc, b_dec, threshold, l0_coeff):
    # Pure-JAX reference mirroring the kernel's precision path (bf16 x / bf16 MXU
    # inputs, f32 accumulation and loss math).
    x32 = x.astype(jnp.float32)
    B = x32.shape[0]
    mean, inv_std = _global_stats(x32)
    xb = x32.astype(jnp.bfloat16).astype(jnp.float32)
    xn = (xb - mean) * inv_std
    pre = jnp.dot((xn - b_dec).astype(jnp.bfloat16), W_enc.astype(jnp.bfloat16),
                  preferred_element_type=jnp.float32) + b_enc
    acts = jnp.maximum(pre, 0.0)
    m = acts > threshold
    acts_sparse = jnp.where(m, acts, 0.0)
    xrec = jnp.dot(acts_sparse.astype(jnp.bfloat16), W_dec.astype(jnp.bfloat16),
                   preferred_element_type=jnp.float32) + b_dec
    diff = xrec - xn
    l2 = jnp.sum(diff * diff) / B
    nmse = jnp.sqrt(jnp.sum(diff * diff)) / jnp.sqrt(jnp.sum(xn * xn))
    tl0 = jnp.sum(m.astype(jnp.float32)) / B
    l1 = jnp.sum(acts_sparse) / B
    loss = l2 + l0_coeff * tl0
    return loss, xrec, acts_sparse, l2, nmse, l1, tl0, acts


def init_params(key, d_mlp, d_hidden):
    # kaiming_uniform_ (a=0, leaky_relu): bound = sqrt(2) * sqrt(3 / fan_in),
    # torch fan_in for a 2-D tensor is size(1).
    k1, k2 = jax.random.split(key)
    b_enc_bound = jnp.sqrt(2.0) * jnp.sqrt(3.0 / d_hidden)
    W_enc = jax.random.uniform(k1, (d_mlp, d_hidden), jnp.float32,
                               -b_enc_bound, b_enc_bound)
    b_dec_bound = jnp.sqrt(2.0) * jnp.sqrt(3.0 / d_mlp)
    W_dec = jax.random.uniform(k2, (d_hidden, d_mlp), jnp.float32,
                               -b_dec_bound, b_dec_bound)
    W_dec = W_dec / jnp.linalg.norm(W_dec, axis=-1, keepdims=True)  # unit decoder rows
    b_enc = jnp.zeros((d_hidden,), jnp.float32)
    b_dec = jnp.zeros((d_mlp,), jnp.float32)
    return W_enc, W_dec, b_enc, b_dec


if __name__ == "__main__":
    cfg = dict(d_mlp=128, dict_mult=2, l0_coeff=1.0,
               activation_threshold=0.3, temperature=0.05)
    B = 512                                   # -> 4 grid steps of 128 rows each
    d_mlp = cfg["d_mlp"]
    d_hidden = cfg["d_mlp"] * cfg["dict_mult"]

    key = jax.random.PRNGKey(0)
    k_x, k_w = jax.random.split(key)
    x = jax.random.normal(k_x, (B, d_mlp), jnp.float32)
    W_enc, W_dec, b_enc, b_dec = init_params(k_w, d_mlp, d_hidden)

    out = autoencoder_forward(x, W_enc, W_dec, b_enc, b_dec,
                              threshold=cfg["activation_threshold"],
                              l0_coeff=cfg["l0_coeff"])
    out = jax.block_until_ready(out)
    loss, x_rec, acts_sparse, l2, nmse, l1, tl0 = out

    (r_loss, r_xrec, r_acts, r_l2, r_nmse, r_l1, r_tl0, r_relu) = reference_forward(
        x, W_enc, W_dec, b_enc, b_dec, cfg["activation_threshold"], cfg["l0_coeff"])

    # Activations sitting essentially on the hard threshold can land on either
    # side of the mask depending on matmul accumulation order; exclude them (and
    # the x_reconstruct rows they feed) from the elementwise check.
    near = jnp.abs(r_relu - cfg["activation_threshold"]) < 5e-3
    row_near = jnp.broadcast_to(jnp.any(near, axis=-1, keepdims=True), r_xrec.shape)

    def ok(got, want, allow=None, rtol=2e-2, atol=2e-2):
        good = jnp.isclose(got, want, rtol=rtol, atol=atol)
        if allow is not None:
            good = good | allow
        return bool(jnp.all(good))

    x_rec_f = x_rec.astype(jnp.float32)
    acts_f = acts_sparse.astype(jnp.float32)
    r_xrec_b = r_xrec.astype(jnp.bfloat16).astype(jnp.float32)
    r_acts_b = r_acts.astype(jnp.bfloat16).astype(jnp.float32)

    assert ok(x_rec_f, r_xrec_b, allow=row_near), "mismatch in x_reconstruct"
    assert ok(acts_f, r_acts_b, allow=near), "mismatch in acts_sparse"
    for name, got, want in [("loss", loss, r_loss), ("l2_loss", l2, r_l2),
                            ("nmse", nmse, r_nmse), ("l1_loss", l1, r_l1),
                            ("true_l0", tl0, r_tl0)]:
        assert ok(got, want), f"mismatch in {name}: {got} vs {want}"

    print("KERNEL_OK")
</pallas_src>

<mosaic_0001>
module attributes {stable_mosaic.version = 11 : i64} {
  func.func @autoencoder_kernel(%arg0: i32, %arg1: memref<2xf32, #tpu.memory_space<smem>>, %arg2: memref<128x128xbf16, #tpu.memory_space<vmem>>, %arg3: memref<128x256xbf16, #tpu.memory_space<vmem>>, %arg4: memref<256x128xbf16, #tpu.memory_space<vmem>>, %arg5: memref<1x256xf32, #tpu.memory_space<vmem>>, %arg6: memref<1x128xf32, #tpu.memory_space<vmem>>, %arg7: memref<128x128xbf16, #tpu.memory_space<vmem>>, %arg8: memref<128x256xbf16, #tpu.memory_space<vmem>>, %arg9: memref<1x8x256xf32, #tpu.memory_space<vmem>>) attributes {dimension_semantics = [#tpu.dimension_semantics<parallel>], iteration_bounds = array<i64: 4>, scalar_prefetch = 0 : i64, scratch_operands = 0 : i64, tpu.core_type = #tpu.core_type<tc>, window_params = [{transform_indices = @transform_0, window_bounds = array<i64: 2>}, {transform_indices = @transform_1, window_bounds = array<i64: 128, 128>}, {pipeline_mode = #tpu.pipeline_mode<synchronous>, transform_indices = @transform_2, window_bounds = array<i64: 128, 256>}, {pipeline_mode = #tpu.pipeline_mode<synchronous>, transform_indices = @transform_3, window_bounds = array<i64: 256, 128>}, {pipeline_mode = #tpu.pipeline_mode<synchronous>, transform_indices = @transform_4, window_bounds = array<i64: 1, 256>}, {pipeline_mode = #tpu.pipeline_mode<synchronous>, transform_indices = @transform_5, window_bounds = array<i64: 1, 128>}, {transform_indices = @transform_6, window_bounds = array<i64: 128, 128>}, {transform_indices = @transform_7, window_bounds = array<i64: 128, 256>}, {transform_indices = @transform_8, window_bounds = array<i64: 1, 8, 256>}]} {
    %c0 = arith.constant 0 : index
    %0 = memref.load %arg1[%c0] : memref<2xf32, #tpu.memory_space<smem>>
    %c1 = arith.constant 1 : index
    %1 = memref.load %arg1[%c1] : memref<2xf32, #tpu.memory_space<smem>>
    %c0_0 = arith.constant 0 : index
    %c0_1 = arith.constant 0 : index
    %2 = vector.load %arg2[%c0_0, %c0_1] : memref<128x128xbf16, #tpu.memory_space<vmem>>, vector<128x128xbf16>
    %3 = arith.extf %2 : vector<128x128xbf16> to vector<128x128xf32>
    %4 = vector.broadcast %0 : f32 to vector<128x128xf32>
    %5 = arith.subf %3, %4 : vector<128x128xf32>
    %6 = vector.broadcast %1 : f32 to vector<128x128xf32>
    %7 = arith.mulf %5, %6 : vector<128x128xf32>
    %c0_2 = arith.constant 0 : index
    %c0_3 = arith.constant 0 : index
    %8 = vector.load %arg6[%c0_2, %c0_3] : memref<1x128xf32, #tpu.memory_space<vmem>>, vector<1x128xf32>
    %c0_4 = arith.constant 0 : index
    %c0_5 = arith.constant 0 : index
    %9 = vector.load %arg5[%c0_4, %c0_5] : memref<1x256xf32, #tpu.memory_space<vmem>>, vector<1x256xf32>
    %10 = vector.broadcast %8 : vector<1x128xf32> to vector<128x128xf32>
    %11 = arith.subf %7, %10 : vector<128x128xf32>
    %12 = arith.truncf %11 : vector<128x128xf32> to vector<128x128xbf16>
    %c0_6 = arith.constant 0 : index
    %c0_7 = arith.constant 0 : index
    %13 = vector.load %arg3[%c0_6, %c0_7] : memref<128x256xbf16, #tpu.memory_space<vmem>>, vector<128x256xbf16>
    %cst = arith.constant dense<0.000000e+00> : vector<128x256xf32>
    %14 = tpu.matmul %12, %13, %cst {dimension_numbers = #tpu.dot_dimension_numbers<[1], [0], [0], [1], [0, 0, 1, 1], [], []>} : vector<128x128xbf16>, vector<128x256xbf16>, vector<128x256xf32> -> vector<128x256xf32>
    %15 = vector.broadcast %9 : vector<1x256xf32> to vector<128x256xf32>
    %16 = arith.addf %14, %15 : vector<128x256xf32>
    %cst_8 = arith.constant 0.000000e+00 : f32
    %17 = vector.broadcast %cst_8 : f32 to vector<128x256xf32>
    %18 = arith.maximumf %16, %17 : vector<128x256xf32>
    %cst_9 = arith.constant 3.000000e-01 : f32
    %19 = vector.broadcast %cst_9 : f32 to vector<128x256xf32>
    %20 = arith.cmpf ogt, %18, %19 : vector<128x256xf32>
    %cst_10 = arith.constant 0.000000e+00 : f32
    %21 = vector.broadcast %cst_10 : f32 to vector<128x256xf32>
    %22 = arith.select %20, %18, %21 : vector<128x256xi1>, vector<128x256xf32>
    %23 = arith.truncf %22 : vector<128x256xf32> to vector<128x256xbf16>
    %c0_11 = arith.constant 0 : index
    %c0_12 = arith.constant 0 : index
    %24 = vector.load %arg4[%c0_11, %c0_12] : memref<256x128xbf16, #tpu.memory_space<vmem>>, vector<256x128xbf16>
    %cst_13 = arith.constant dense<0.000000e+00> : vector<128x128xf32>
    %25 = tpu.matmul %23, %24, %cst_13 {dimension_numbers = #tpu.dot_dimension_numbers<[1], [0], [0], [1], [0, 0, 1, 1], [], []>} : vector<128x256xbf16>, vector<256x128xbf16>, vector<128x128xf32> -> vector<128x128xf32>
    %26 = vector.broadcast %8 : vector<1x128xf32> to vector<128x128xf32>
    %27 = arith.addf %25, %26 : vector<128x128xf32>
    %28 = arith.subf %27, %7 : vector<128x128xf32>
    %29 = arith.mulf %28, %28 : vector<128x128xf32>
    %cst_14 = arith.constant dense<0.000000e+00> : vector<128xf32>
    %30 = vector.multi_reduction <add>, %29, %cst_14 [0] : vector<128x128xf32> to vector<128xf32>
    %31 = vector.shape_cast %30 : vector<128xf32> to vector<1x128xf32>
    %32 = arith.mulf %7, %7 : vector<128x128xf32>
    %cst_15 = arith.constant dense<0.000000e+00> : vector<128xf32>
    %33 = vector.multi_reduction <add>, %32, %cst_15 [0] : vector<128x128xf32> to vector<128xf32>
    %34 = vector.shape_cast %33 : vector<128xf32> to vector<1x128xf32>
    %35 = arith.extui %20 : vector<128x256xi1> to vector<128x256xi32>
    %36 = arith.sitofp %35 : vector<128x256xi32> to vector<128x256xf32>
    %cst_16 = arith.constant dense<0.000000e+00> : vector<256xf32>
    %37 = vector.multi_reduction <add>, %36, %cst_16 [0] : vector<128x256xf32> to vector<256xf32>
    %38 = vector.shape_cast %37 : vector<256xf32> to vector<1x256xf32>
    %cst_17 = arith.constant dense<0.000000e+00> : vector<256xf32>
    %39 = vector.multi_reduction <add>, %22, %cst_17 [0] : vector<128x256xf32> to vector<256xf32>
    %40 = vector.shape_cast %39 : vector<256xf32> to vector<1x256xf32>
    %41 = arith.truncf %27 : vector<128x128xf32> to vector<128x128xbf16>
    %c0_18 = arith.constant 0 : index
    %c0_19 = arith.constant 0 : index
    %42 = vector.load %arg7[%c0_18, %c0_19] : memref<128x128xbf16, #tpu.memory_space<vmem>>, vector<128x128xbf16>
    tpu.vector_store %arg7[%c0_18, %c0_19], %41 {strides = array<i32>} : memref<128x128xbf16, #tpu.memory_space<vmem>>, vector<128x128xbf16>,
    %43 = arith.truncf %22 : vector<128x256xf32> to vector<128x256xbf16>
    %c0_20 = arith.constant 0 : index
    %c0_21 = arith.constant 0 : index
    %44 = vector.load %arg8[%c0_20, %c0_21] : memref<128x256xbf16, #tpu.memory_space<vmem>>, vector<128x256xbf16>
    tpu.vector_store %arg8[%c0_20, %c0_21], %43 {strides = array<i32>} : memref<128x256xbf16, #tpu.memory_space<vmem>>, vector<128x256xbf16>,
    %cst_22 = arith.constant 0.000000e+00 : f32
    %45 = vector.broadcast %cst_22 : f32 to vector<8x256xf32>
    %c0_23 = arith.constant 0 : index
    %c0_24 = arith.constant 0 : index
    %c0_25 = arith.constant 0 : index
    %46 = vector.load %arg9[%c0_23, %c0_24, %c0_25] : memref<1x8x256xf32, #tpu.memory_space<vmem>>, vector<1x8x256xf32>
    %47 = vector.shape_cast %46 : vector<1x8x256xf32> to vector<8x256xf32>
    %48 = vector.shape_cast %45 : vector<8x256xf32> to vector<1x8x256xf32>
    tpu.vector_store %arg9[%c0_23, %c0_24, %c0_25], %48 {strides = array<i32>} : memref<1x8x256xf32, #tpu.memory_space<vmem>>, vector<1x8x256xf32>,
    %c0_26 = arith.constant 0 : index
    %c0_27 = arith.constant 0 : index
    %c0_28 = arith.constant 0 : index
    %49 = vector.load %arg9[%c0_26, %c0_27, %c0_28] : memref<1x8x256xf32, #tpu.memory_space<vmem>>, vector<1x1x128xf32>
    %50 = vector.shape_cast %49 : vector<1x1x128xf32> to vector<1x128xf32>
    %51 = vector.shape_cast %31 : vector<1x128xf32> to vector<1x1x128xf32>
    tpu.vector_store %arg9[%c0_26, %c0_27, %c0_28], %51 {strides = array<i32>} : memref<1x8x256xf32, #tpu.memory_space<vmem>>, vector<1x1x128xf32>,
    %c0_29 = arith.constant 0 : index
    %c1_30 = arith.constant 1 : index
    %c0_31 = arith.constant 0 : index
    %52 = vector.load %arg9[%c0_29, %c1_30, %c0_31] : memref<1x8x256xf32, #tpu.memory_space<vmem>>, vector<1x1x128xf32>
    %53 = vector.shape_cast %52 : vector<1x1x128xf32> to vector<1x128xf32>
    %54 = vector.shape_cast %34 : vector<1x128xf32> to vector<1x1x128xf32>
    tpu.vector_store %arg9[%c0_29, %c1_30, %c0_31], %54 {strides = array<i32>} : memref<1x8x256xf32, #tpu.memory_space<vmem>>, vector<1x1x128xf32>,
    %c0_32 = arith.constant 0 : index
    %c2 = arith.constant 2 : index
    %c0_33 = arith.constant 0 : index
    %55 = vector.load %arg9[%c0_32, %c2, %c0_33] : memref<1x8x256xf32, #tpu.memory_space<vmem>>, vector<1x1x256xf32>
    %56 = vector.shape_cast %55 : vector<1x1x256xf32> to vector<1x256xf32>
    %57 = vector.shape_cast %38 : vector<1x256xf32> to vector<1x1x256xf32>
    tpu.vector_store %arg9[%c0_32, %c2, %c0_33], %57 {strides = array<i32>} : memref<1x8x256xf32, #tpu.memory_space<vmem>>, vector<1x1x256xf32>,
    %c0_34 = arith.constant 0 : index
    %c3 = arith.constant 3 : index
    %c0_35 = arith.constant 0 : index
    %58 = vector.load %arg9[%c0_34, %c3, %c0_35] : memref<1x8x256xf32, #tpu.memory_space<vmem>>, vector<1x1x256xf32>
    %59 = vector.shape_cast %58 : vector<1x1x256xf32> to vector<1x256xf32>
    %60 = vector.shape_cast %40 : vector<1x256xf32> to vector<1x1x256xf32>
    tpu.vector_store %arg9[%c0_34, %c3, %c0_35], %60 {strides = array<i32>} : memref<1x8x256xf32, #tpu.memory_space<vmem>>, vector<1x1x256xf32>,
    return
  }
  func.func @transform_0(%arg0: i32) -> i32 {
    %c0_i32 = arith.constant 0 : i32
    %c0_i32_0 = arith.constant 0 : i32
    return %c0_i32 : i32
  }
  func.func @transform_1(%arg0: i32) -> (i32, i32) {
    %c0_i32 = arith.constant 0 : i32
    %c0_i32_0 = arith.constant 0 : i32
    return %arg0, %c0_i32 : i32, i32
  }
  func.func @transform_2(%arg0: i32) -> (i32, i32) {
    %c0_i32 = arith.constant 0 : i32
    %c0_i32_0 = arith.constant 0 : i32
    %c0_i32_1 = arith.constant 0 : i32
    return %c0_i32, %c0_i32_0 : i32, i32
  }
  func.func @transform_3(%arg0: i32) -> (i32, i32) {
    %c0_i32 = arith.constant 0 : i32
    %c0_i32_0 = arith.constant 0 : i32
    %c0_i32_1 = arith.constant 0 : i32
    return %c0_i32, %c0_i32_0 : i32, i32
  }
  func.func @transform_4(%arg0: i32) -> (i32, i32) {
    %c0_i32 = arith.constant 0 : i32
    %c0_i32_0 = arith.constant 0 : i32
    %c0_i32_1 = arith.constant 0 : i32
    return %c0_i32, %c0_i32_0 : i32, i32
  }
  func.func @transform_5(%arg0: i32) -> (i32, i32) {
    %c0_i32 = arith.constant 0 : i32
    %c0_i32_0 = arith.constant 0 : i32
    %c0_i32_1 = arith.constant 0 : i32
    return %c0_i32, %c0_i32_0 : i32, i32
  }
  func.func @transform_6(%arg0: i32) -> (i32, i32) {
    %c0_i32 = arith.constant 0 : i32
    %c0_i32_0 = arith.constant 0 : i32
    return %arg0, %c0_i32 : i32, i32
  }
  func.func @transform_7(%arg0: i32) -> (i32, i32) {
    %c0_i32 = arith.constant 0 : i32
    %c0_i32_0 = arith.constant 0 : i32
    return %arg0, %c0_i32 : i32, i32
  }
  func.func @transform_8(%arg0: i32) -> (i32, i32, i32) {
    %c0_i32 = arith.constant 0 : i32
    %c0_i32_0 = arith.constant 0 : i32
    %c0_i32_1 = arith.constant 0 : i32
    return %arg0, %c0_i32, %c0_i32_0 : i32, i32, i32
  }
}

module attributes {stable_mosaic.version = 11 : i64} {
  func.func @autoencoder_kernel(%arg0: i32, %arg1: memref<2xf32, #tpu.memory_space<smem>>, %arg2: memref<128x128xbf16, #tpu.memory_space<vmem>>, %arg3: memref<128x256xbf16, #tpu.memory_space<vmem>>, %arg4: memref<256x128xbf16, #tpu.memory_space<vmem>>, %arg5: memref<1x256xf32, #tpu.memory_space<vmem>>, %arg6: memref<1x128xf32, #tpu.memory_space<vmem>>, %arg7: memref<128x128xbf16, #tpu.memory_space<vmem>>, %arg8: memref<128x256xbf16, #tpu.memory_space<vmem>>, %arg9: memref<1x8x256xf32, #tpu.memory_space<vmem>>) attributes {dimension_semantics = [#tpu.dimension_semantics<parallel>], iteration_bounds = array<i64: 4>, scalar_prefetch = 0 : i64, scratch_operands = 0 : i64, tpu.core_type = #tpu.core_type<tc>, window_params = [{transform_indices = @transform_0, window_bounds = array<i64: 2>}, {transform_indices = @transform_1, window_bounds = array<i64: 128, 128>}, {pipeline_mode = #tpu.pipeline_mode<synchronous>, transform_indices = @transform_2, window_bounds = array<i64: 128, 256>}, {pipeline_mode = #tpu.pipeline_mode<synchronous>, transform_indices = @transform_3, window_bounds = array<i64: 256, 128>}, {pipeline_mode = #tpu.pipeline_mode<synchronous>, transform_indices = @transform_4, window_bounds = array<i64: 1, 256>}, {pipeline_mode = #tpu.pipeline_mode<synchronous>, transform_indices = @transform_5, window_bounds = array<i64: 1, 128>}, {transform_indices = @transform_6, window_bounds = array<i64: 128, 128>}, {transform_indices = @transform_7, window_bounds = array<i64: 128, 256>}, {transform_indices = @transform_8, window_bounds = array<i64: 1, 8, 256>}]} {
    %c0 = arith.constant 0 : index
    %0 = memref.load %arg1[%c0] : memref<2xf32, #tpu.memory_space<smem>>
    %c1 = arith.constant 1 : index
    %1 = memref.load %arg1[%c1] : memref<2xf32, #tpu.memory_space<smem>>
    %c0_0 = arith.constant 0 : index
    %c0_1 = arith.constant 0 : index
    %2 = vector.load %arg2[%c0_0, %c0_1] : memref<128x128xbf16, #tpu.memory_space<vmem>>, vector<128x128xbf16>
    %3 = arith.extf %2 : vector<128x128xbf16> to vector<128x128xf32>
    %4 = vector.broadcast %0 : f32 to vector<128x128xf32>
    %5 = arith.subf %3, %4 : vector<128x128xf32>
    %6 = vector.broadcast %1 : f32 to vector<128x128xf32>
    %7 = arith.mulf %5, %6 : vector<128x128xf32>
    %c0_2 = arith.constant 0 : index
    %c0_3 = arith.constant 0 : index
    %8 = vector.load %arg6[%c0_2, %c0_3] : memref<1x128xf32, #tpu.memory_space<vmem>>, vector<1x128xf32>
    %c0_4 = arith.constant 0 : index
    %c0_5 = arith.constant 0 : index
    %9 = vector.load %arg5[%c0_4, %c0_5] : memref<1x256xf32, #tpu.memory_space<vmem>>, vector<1x256xf32>
    %10 = vector.broadcast %8 : vector<1x128xf32> to vector<128x128xf32>
    %11 = arith.subf %7, %10 : vector<128x128xf32>
    %12 = arith.truncf %11 : vector<128x128xf32> to vector<128x128xbf16>
    %c0_6 = arith.constant 0 : index
    %c0_7 = arith.constant 0 : index
    %13 = vector.load %arg3[%c0_6, %c0_7] : memref<128x256xbf16, #tpu.memory_space<vmem>>, vector<128x256xbf16>
    %cst = arith.constant dense<0.000000e+00> : vector<128x256xf32>
    %14 = tpu.matmul %12, %13, %cst {dimension_numbers = #tpu.dot_dimension_numbers<[1], [0], [0], [1], [0, 0, 1, 1], [], []>} : vector<128x128xbf16>, vector<128x256xbf16>, vector<128x256xf32> -> vector<128x256xf32>
    %15 = vector.broadcast %9 : vector<1x256xf32> to vector<128x256xf32>
    %16 = arith.addf %14, %15 : vector<128x256xf32>
    %cst_8 = arith.constant 0.000000e+00 : f32
    %17 = vector.broadcast %cst_8 : f32 to vector<128x256xf32>
    %18 = arith.maximumf %16, %17 : vector<128x256xf32>
    %cst_9 = arith.constant 3.000000e-01 : f32
    %19 = vector.broadcast %cst_9 : f32 to vector<128x256xf32>
    %20 = arith.cmpf ogt, %18, %19 : vector<128x256xf32>
    %cst_10 = arith.constant 0.000000e+00 : f32
    %21 = vector.broadcast %cst_10 : f32 to vector<128x256xf32>
    %22 = arith.select %20, %18, %21 : vector<128x256xi1>, vector<128x256xf32>
    %23 = arith.truncf %22 : vector<128x256xf32> to vector<128x256xbf16>
    %c0_11 = arith.constant 0 : index
    %c0_12 = arith.constant 0 : index
    %24 = vector.load %arg4[%c0_11, %c0_12] : memref<256x128xbf16, #tpu.memory_space<vmem>>, vector<256x128xbf16>
    %cst_13 = arith.constant dense<0.000000e+00> : vector<128x128xf32>
    %25 = tpu.matmul %23, %24, %cst_13 {dimension_numbers = #tpu.dot_dimension_numbers<[1], [0], [0], [1], [0, 0, 1, 1], [], []>} : vector<128x256xbf16>, vector<256x128xbf16>, vector<128x128xf32> -> vector<128x128xf32>
    %26 = vector.broadcast %8 : vector<1x128xf32> to vector<128x128xf32>
    %27 = arith.addf %25, %26 : vector<128x128xf32>
    %28 = arith.subf %27, %7 : vector<128x128xf32>
    %29 = arith.mulf %28, %28 : vector<128x128xf32>
    %cst_14 = arith.constant dense<0.000000e+00> : vector<128xf32>
    %30 = vector.multi_reduction <add>, %29, %cst_14 [0] : vector<128x128xf32> to vector<128xf32>
    %31 = vector.shape_cast %30 : vector<128xf32> to vector<1x128xf32>
    %32 = arith.mulf %7, %7 : vector<128x128xf32>
    %cst_15 = arith.constant dense<0.000000e+00> : vector<128xf32>
    %33 = vector.multi_reduction <add>, %32, %cst_15 [0] : vector<128x128xf32> to vector<128xf32>
    %34 = vector.shape_cast %33 : vector<128xf32> to vector<1x128xf32>
    %35 = arith.extui %20 : vector<128x256xi1> to vector<128x256xi32>
    %36 = arith.sitofp %35 : vector<128x256xi32> to vector<128x256xf32>
    %cst_16 = arith.constant dense<0.000000e+00> : vector<256xf32>
    %37 = vector.multi_reduction <add>, %36, %cst_16 [0] : vector<128x256xf32> to vector<256xf32>
    %38 = vector.shape_cast %37 : vector<256xf32> to vector<1x256xf32>
    %cst_17 = arith.constant dense<0.000000e+00> : vector<256xf32>
    %39 = vector.multi_reduction <add>, %22, %cst_17 [0] : vector<128x256xf32> to vector<256xf32>
    %40 = vector.shape_cast %39 : vector<256xf32> to vector<1x256xf32>
    %41 = arith.truncf %27 : vector<128x128xf32> to vector<128x128xbf16>
    %c0_18 = arith.constant 0 : index
    %c0_19 = arith.constant 0 : index
    %42 = vector.load %arg7[%c0_18, %c0_19] : memref<128x128xbf16, #tpu.memory_space<vmem>>, vector<128x128xbf16>
    tpu.vector_store %arg7[%c0_18, %c0_19], %41 {strides = array<i32>} : memref<128x128xbf16, #tpu.memory_space<vmem>>, vector<128x128xbf16>,
    %43 = arith.truncf %22 : vector<128x256xf32> to vector<128x256xbf16>
    %c0_20 = arith.constant 0 : index
    %c0_21 = arith.constant 0 : index
    %44 = vector.load %arg8[%c0_20, %c0_21] : memref<128x256xbf16, #tpu.memory_space<vmem>>, vector<128x256xbf16>
    tpu.vector_store %arg8[%c0_20, %c0_21], %43 {strides = array<i32>} : memref<128x256xbf16, #tpu.memory_space<vmem>>, vector<128x256xbf16>,
    %cst_22 = arith.constant 0.000000e+00 : f32
    %45 = vector.broadcast %cst_22 : f32 to vector<8x256xf32>
    %c0_23 = arith.constant 0 : index
    %c0_24 = arith.constant 0 : index
    %c0_25 = arith.constant 0 : index
    %46 = vector.load %arg9[%c0_23, %c0_24, %c0_25] : memref<1x8x256xf32, #tpu.memory_space<vmem>>, vector<1x8x256xf32>
    %47 = vector.shape_cast %46 : vector<1x8x256xf32> to vector<8x256xf32>
    %48 = vector.shape_cast %45 : vector<8x256xf32> to vector<1x8x256xf32>
    tpu.vector_store %arg9[%c0_23, %c0_24, %c0_25], %48 {strides = array<i32>} : memref<1x8x256xf32, #tpu.memory_space<vmem>>, vector<1x8x256xf32>,
    %c0_26 = arith.constant 0 : index
    %c0_27 = arith.constant 0 : index
    %c0_28 = arith.constant 0 : index
    %49 = vector.load %arg9[%c0_26, %c0_27, %c0_28] : memref<1x8x256xf32, #tpu.memory_space<vmem>>, vector<1x1x128xf32>
    %50 = vector.shape_cast %49 : vector<1x1x128xf32> to vector<1x128xf32>
    %51 = vector.shape_cast %31 : vector<1x128xf32> to vector<1x1x128xf32>
    tpu.vector_store %arg9[%c0_26, %c0_27, %c0_28], %51 {strides = array<i32>} : memref<1x8x256xf32, #tpu.memory_space<vmem>>, vector<1x1x128xf32>,
    %c0_29 = arith.constant 0 : index
    %c1_30 = arith.constant 1 : index
    %c0_31 = arith.constant 0 : index
    %52 = vector.load %arg9[%c0_29, %c1_30, %c0_31] : memref<1x8x256xf32, #tpu.memory_space<vmem>>, vector<1x1x128xf32>
    %53 = vector.shape_cast %52 : vector<1x1x128xf32> to vector<1x128xf32>
    %54 = vector.shape_cast %34 : vector<1x128xf32> to vector<1x1x128xf32>
    tpu.vector_store %arg9[%c0_29, %c1_30, %c0_31], %54 {strides = array<i32>} : memref<1x8x256xf32, #tpu.memory_space<vmem>>, vector<1x1x128xf32>,
    %c0_32 = arith.constant 0 : index
    %c2 = arith.constant 2 : index
    %c0_33 = arith.constant 0 : index
    %55 = vector.load %arg9[%c0_32, %c2, %c0_33] : memref<1x8x256xf32, #tpu.memory_space<vmem>>, vector<1x1x256xf32>
    %56 = vector.shape_cast %55 : vector<1x1x256xf32> to vector<1x256xf32>
    %57 = vector.shape_cast %38 : vector<1x256xf32> to vector<1x1x256xf32>
    tpu.vector_store %arg9[%c0_32, %c2, %c0_33], %57 {strides = array<i32>} : memref<1x8x256xf32, #tpu.memory_space<vmem>>, vector<1x1x256xf32>,
    %c0_34 = arith.constant 0 : index
    %c3 = arith.constant 3 : index
    %c0_35 = arith.constant 0 : index
    %58 = vector.load %arg9[%c0_34, %c3, %c0_35] : memref<1x8x256xf32, #tpu.memory_space<vmem>>, vector<1x1x256xf32>
    %59 = vector.shape_cast %58 : vector<1x1x256xf32> to vector<1x256xf32>
    %60 = vector.shape_cast %40 : vector<1x256xf32> to vector<1x1x256xf32>
    tpu.vector_store %arg9[%c0_34, %c3, %c0_35], %60 {strides = array<i32>} : memref<1x8x256xf32, #tpu.memory_space<vmem>>, vector<1x1x256xf32>,
    return
  }
  func.func @transform_0(%arg0: i32) -> i32 {
    %c0_i32 = arith.constant 0 : i32
    %c0_i32_0 = arith.constant 0 : i32
    return %c0_i32 : i32
  }
  func.func @transform_1(%arg0: i32) -> (i32, i32) {
    %c0_i32 = arith.constant 0 : i32
    %c0_i32_0 = arith.constant 0 : i32
    return %arg0, %c0_i32 : i32, i32
  }
  func.func @transform_2(%arg0: i32) -> (i32, i32) {
    %c0_i32 = arith.constant 0 : i32
    %c0_i32_0 = arith.constant 0 : i32
    %c0_i32_1 = arith.constant 0 : i32
    return %c0_i32, %c0_i32_0 : i32, i32
  }
  func.func @transform_3(%arg0: i32) -> (i32, i32) {
    %c0_i32 = arith.constant 0 : i32
    %c0_i32_0 = arith.constant 0 : i32
    %c0_i32_1 = arith.constant 0 : i32
    return %c0_i32, %c0_i32_0 : i32, i32
  }
  func.func @transform_4(%arg0: i32) -> (i32, i32) {
    %c0_i32 = arith.constant 0 : i32
    %c0_i32_0 = arith.constant 0 : i32
    %c0_i32_1 = arith.constant 0 : i32
    return %c0_i32, %c0_i32_0 : i32, i32
  }
  func.func @transform_5(%arg0: i32) -> (i32, i32) {
    %c0_i32 = arith.constant 0 : i32
    %c0_i32_0 = arith.constant 0 : i32
    %c0_i32_1 = arith.constant 0 : i32
    return %c0_i32, %c0_i32_0 : i32, i32
  }
  func.func @transform_6(%arg0: i32) -> (i32, i32) {
    %c0_i32 = arith.constant 0 : i32
    %c0_i32_0 = arith.constant 0 : i32
    return %arg0, %c0_i32 : i32, i32
  }
  func.func @transform_7(%arg0: i32) -> (i32, i32) {
    %c0_i32 = arith.constant 0 : i32
    %c0_i32_0 = arith.constant 0 : i32
    return %arg0, %c0_i32 : i32, i32
  }
  func.func @transform_8(%arg0: i32) -> (i32, i32, i32) {
    %c0_i32 = arith.constant 0 : i32
    %c0_i32_0 = arith.constant 0 : i32
    %c0_i32_1 = arith.constant 0 : i32
    return %arg0, %c0_i32, %c0_i32_0 : i32, i32, i32
  }
}

</mosaic_0001>

<bundles_post_ra>
// kernel: tpu_custom_call.1
= control target key start
LH: loop header
LB: loop body
LE: loop exit
PB: predicated region body
PF: predicated region fallthrough
CT: control target
= control target key end

     0   :  { %s3109_s0 = inlined_call_operand.hbm [shape: f32[2], index: 0, kind: input, shape index: {}]   ;;  %s3110_s1 = inlined_call_operand.hbm [shape: bf16[512,128], index: 1, kind: input, shape index: {}]   ;;  %s3111_s2 = inlined_call_operand.hbm [shape: bf16[128,256], index: 2, kind: input, shape index: {}]   ;;  %s3112_s3 = inlined_call_operand.hbm [shape: bf16[256,128], index: 3, kind: input, shape index: {}]   ;;  %s3113_s4 = inlined_call_operand.vmem [shape: f32[1,256], index: 4, kind: input, shape index: {}]   ;;  %s3114_s5 = inlined_call_operand.vmem [shape: f32[1,128], index: 5, kind: input, shape index: {}]   ;;  %s3115_s6 = inlined_call_operand.hbm [shape: bf16[512,128], index: 6, kind: output, shape index: {0}]   ;;  %s3116_s7 = inlined_call_operand.hbm [shape: bf16[512,256], index: 7, kind: output, shape index: {1}]   ;;  %s3117_s8 = inlined_call_operand.hbm [shape: f32[4,8,256], index: 8, kind: output, shape index: {2}]  }
   0x1   :  { %3124 = sst [smem:[#allocation22_spill]] %s3109_s0 }
   0x2   :  { %3125 = sst [smem:[#allocation23_spill]] %s3111_s2 }
   0x3   :  { %14 = vsyncpa [#allocation5], 0 }
   0x4   :  { %15 = vsyncpa [#allocation3], 0 }
   0x5   :  { %17 = vsyncpa [#allocation3 + $0x1], 0 }
   0x6   :  { %18 = vsyncpa [#allocation8], 0 }
   0x7   :  { %19 = vsyncpa [#allocation4], 0 }
   0x8   :  { %21 = vsyncpa [#allocation4 + $0x1], 0 }
   0x9   :  { %22 = vsyncpa [#allocation12], 0 }
   0xa   :  { %24 = vsyncpa [#allocation12 + $0x1], 0  ;;  %s2356_s27 = smov 0   ;;  %s2358_s28 = smov 0  }
   0xb   :  { %s2360_s29 = smov 0   ;;  %s2362_s30 = smov 0  }
   0xc LB: > { %s2377_s9 = sadd.s32 4294967295, %s2297_s30   ;;  %s3118_s10 = sadd.s32 4294967294, %s2297_s30   ;;  %s2297_s30 = sphi %s2362_s30, %s3190_s30   ;;  %s2293_s29 = sphi %s2360_s29, %s3189_s29   ;;  %s2289_s28 = sphi %s2358_s28, %s3188_s28   ;;  %s2285_s27 = sphi %s2356_s27, %s3187_s27  }
   0xd   : > { %p71_p0 = scmp.ne.s32.totalorder %s2289_s28, %s2285_s27  ;;  %p72_p1 = scmp.eq.s32.totalorder %s2377_s9, 0 }
   0xe   : > { %p179_p2 = scmp.eq.s32.totalorder %s2377_s9, 3  ;;  %p185_p3 = scmp.eq.s32.totalorder %s3118_s10, 3 }
   0xf   : > { %p2388_p4 = por %p72_p1, %p71_p0  ;;  %p1646_p5 = scmp.ge.s32.totalorder %s2297_s30, 1 }
  0x10   : > { %p2393_p6 = por %p185_p3, %p71_p0  ;;  %p244_p7 = scmp.lt.s32.totalorder %s2297_s30, 5 }
  0x11   : > { %s3128_s2 = sld [smem:[#allocation23_spill]]  ;;  %s2299_s17 = smov [#allocation7]  }
  0x12   : > { %p2401_p8 = pnand %p1646_p5, %p244_p7  ;;  %s267_s18 = sshll.u32 %s2299_s17, 4  ;;  %s268_s18 = int_to_ptr.vmem [resolvable:$true] %s267_s18 }
  0x13   : > { %s3131_s0 = sld [smem:[#allocation22_spill]]  ;;  %s2300_s23 = smov 128  }
  0x14   : > { %p1980_p9 = pneg %p2401_p8  ;;  %s2301_s24 = smov 8  }
  0x15   : > { %s2302_s25 = smov [#allocation2]   ;;  %s279_s14 = sshll.u32 %s3112_s3, 4  ;;  %s280_s14 = int_to_ptr.hbm [resolvable:$true] %s279_s14 }
  0x16   : > { %p2409_p10 = pnand %p1980_p9, %p72_p1  ;;  %s2303_s17 = smov [#allocation9]  }
  0x17   : > { %s265_s15 = sshll.u32 %s3128_s2, 4  ;;  %s281_s20 = sshll.u32 %s2303_s17, 4  ;;  %s266_s15 = int_to_ptr.hbm [resolvable:$true] %s265_s15  ;;  %s282_s20 = int_to_ptr.vmem [resolvable:$true] %s281_s20 }
  0x18   : > { %1986 = dma.hbm_to_vmem [thread:$0]  (!%p2409_p10), %s266_s15, 2048, %s268_s18, [#allocation8], %s2300_s23, %s2300_s23, %s2301_s24  }
  0x19   : > { %s256_s22 = sshll.u32 %s3131_s0, 4  ;;  %s3119_s21 = smov 64   ;;  %s257_s22 = int_to_ptr.hbm [resolvable:$true] %s256_s22 }
  0x1a   : > { %1983 = dma.hbm_to_smem (!%p2409_p10), %s257_s22, 16, %s2302_s25, [#allocation5]  }
  0x1b   : > { %s3120_s10 = smov 4   ;;  %s2429_s15 = sadd.s32 1, %s2297_s30  }
  0x1c   : > { %1989 = dma.hbm_to_vmem [thread:$0]  (!%p2409_p10), %s280_s14, 2048, %s282_s20, [#allocation8], %s3119_s21, %s3119_s21, %s3120_s10  }
  0x1d   : > { %s55_s18 = ssub.s32 %s2297_s30, %s2429_s15  ;;  %s58_s22 = sadd.s32 1, %s2293_s29 }
  0x1e   : > { %p56_p11 = scmp.eq.s32.totalorder %s55_s18, 0  ;;  %p65_p12 = scmp.ne.s32.totalorder %s2293_s29, %s2289_s28 }
  0x1f   : > { %p66_p13 = scmp.eq.s32.totalorder %s2297_s30, 0  ;;  %p2007_p3 = scmp.lt.s32.totalorder %s2297_s30, 4 }
  0x20   : > { %s2438_s23 = scalar_select %p56_p11, %s2293_s29, %s58_s22  }
  0x21   : > { %p2442_p0 = por %p179_p2, %p65_p12  ;;  %s301_s19 = sand.u32 1, %s2293_s29  }
  0x22   : > { %s1837_s25 = sshll.u32 %s2297_s30, 6  ;;  %p67_p5 = por %p66_p13, %p65_p12 }
  0x23   : > { %s1651_s26 = sshll.u32 %s301_s19, 6  ;;  %s310_s17 = scalar_lea.hbm %s3110_s1, %s1837_s25 }
  0x24   : > { %s311_s20 = sshll.u32 %s310_s17, 4  ;;  %s305_s18 = scalar_lea.vmem [#allocation6], %s1651_s26  ;;  %s312_s20 = int_to_ptr.hbm [resolvable:$true] %s311_s20 }
  0x25   : > { %s313_s21 = sshll.u32 %s305_s18, 4  ;;  %p2452_p7 = pnand %p2007_p3, %p67_p5  ;;  %s314_s21 = int_to_ptr.vmem [resolvable:$true] %s313_s21 }
  0x26   : > { %s302_s10 = scalar_lea.sflag [#allocation3], %s301_s19  ;;  %s2133_s0 = sshra.s32 %s312_s20, 4  ;;  %s2134_s0 = int_to_ptr.hbm [resolvable:$true] %s2133_s0 }
  0x27   : > { %s2135_s2 = scalar_lea.hbm %s2134_s0, 64  ;;  %p2137_p9 = pneg %p2452_p7 }
  0x28   : > { %p2136_p2 = scmp.ne.s32.totalorder %s2134_s0, %s2135_s2  ;;  %s2140_s26 = scalar_lea.hbm %s3110_s1, 256 }
  0x29   : > { %p2141_p12 = scmp.lt.s32.totalorder %s2134_s0, %s3110_s1  ;;  %p2142_p13 = scmp.lt.s32.totalorder %s2140_s26, %s2135_s2 }
  0x2a   : > { %p2138_p10 = pnand %p2137_p9, %p2136_p2 }
  0x2b   : > { %p2143_p3 = por %p2142_p13, %p2141_p12 }
  0x2c   : > { %p2139_p11 = pneg %p2138_p10 }
  0x2e   : > { %p2144_p5 = pnand %p2143_p3, %p2139_p11 }
  0x30   : > { %2147 = shalt.err (!%p2144_p5)
}
  0x31   : > { %s3134_s19 = smov 4   ;;  %s3135_s18 = smov 64  }
  0x32   : > { %1993 = dma.hbm_to_vmem [thread:$0]  (!%p2452_p7), %s312_s20, 1024, %s314_s21, %s302_s10, %s3135_s18, %s3135_s18, %s3134_s19  }
  0x33   : > { %325 = sbr.rel (%p2401_p8) target bundleno = 523 (0x20b), region = 44 }
  0x38   : > { %2264 = dma.done.wait (%p72_p1), [#allocation5], 16  }
  0x39   : > { %2266 = vsyncadd (%p72_p1), [#allocation5], 4294967280  ;;  %s2476_s0 = sand.u32 1, %s2289_s28  }
  0x3a   : > { %s1656_s2 = sshll.u32 %s2476_s0, 6  ;;  %s333_s22 = scalar_lea.sflag [#allocation3], %s2476_s0 }
  0x3b   : > { %s2482_s10 = scalar_lea.vmem [#allocation6], %s1656_s2 }
  0x3c   : > { %2268 = dma.done.wait (%p2388_p4), %s333_s22, 1024  }
  0x3d   : > { %2270 = vsyncadd (%p2388_p4), %s333_s22, 4294966272 }
  0x3e   : > { %2272 = dma.done.wait (%p72_p1), [#allocation8], 4096  }
  0x3f   : > { %2274 = vsyncadd (%p72_p1), [#allocation8], 4294963200 }
  0x40   : > { %352 = sfence }
  0x41   : > { %v1721_v0 = vld [vmem:[#allocation7 + $0x70] sm:$0xf]  ;;  %v1853_v1 = vld [vmem:[#allocation7 + $0x74] sm:$0xf0]  ;;  %v1852_v2 = vld [vmem:[#allocation7 + $0x74] sm:$0xf] }
  0x42   : > { %v1722_v3 = vor.u32 %v1853_v1, %v1721_v0  ;;  %v1723_v4 = vld [vmem:[#allocation7 + $0x78] sm:$0xf0]  ;;  %v1713_v5 = vld [vmem:[#allocation7 + $0x60] sm:$0xf]  ;;  %v1851_v6 = vld [vmem:[#allocation7 + $0x64] sm:$0xf0] }
  0x43   : > { %v1726_v7 = vor.u32 %v1852_v2, %v1723_v4  ;;  %v1850_v8 = vld [vmem:[#allocation7 + $0x64] sm:$0xf]  ;;  %v1715_v9 = vld [vmem:[#allocation7 + $0x68] sm:$0xf0]  ;;  %v1714_v10 = vor.u32 %v1851_v6, %v1713_v5  ;;  %v1705_v12 = vld [vmem:[#allocation7 + $0x50] sm:$0xf] }
  0x44   : > { %592 = vmatpush.bf16.msra.mxu0 %v1722_v3  ;;  %v1718_v11 = vor.u32 %v1850_v8, %v1715_v9  ;;  %v1849_v13 = vld [vmem:[#allocation7 + $0x54] sm:$0xf0]  ;;  %v1848_v14 = vld [vmem:[#allocation7 + $0x54] sm:$0xf]  ;;  %v1707_v15 = vld [vmem:[#allocation7 + $0x58] sm:$0xf0] }
  0x45   : > { %641 = vmatpush.bf16.msra.mxu1 %v1726_v7  ;;  %v1706_v16 = vor.u32 %v1849_v13, %v1705_v12  ;;  %v1710_v17 = vor.u32 %v1848_v14, %v1707_v15  ;;  %v1697_v18 = vld [vmem:[#allocation7 + $0x40] sm:$0xf]  ;;  %v1847_v19 = vld [vmem:[#allocation7 + $0x44] sm:$0xf0]  ;;  %v1846_v20 = vld [vmem:[#allocation7 + $0x44] sm:$0xf] }
  0x46   : > { %v1699_v21 = vld [vmem:[#allocation7 + $0x48] sm:$0xf0]  ;;  %s394_s11 = sld [smem:[#allocation2]]  ;;  %v1698_v22 = vor.u32 %v1847_v19, %v1697_v18  ;;  %v1875_v23 = vld [vmem:[%s2482_s10] sm:$0xff]   ;;  %v1689_v25 = vld [vmem:[#allocation7 + $0x30] sm:$0xf] }
  0x47   : > { %s1662_s16 = sld [smem:[#allocation2 + $0x1]]  ;;  %v1702_v24 = vor.u32 %v1846_v20, %v1699_v21  ;;  %v1845_v26 = vld [vmem:[#allocation7 + $0x34] sm:$0xf0]  ;;  %v1844_v27 = vld [vmem:[#allocation7 + $0x34] sm:$0xf]  ;;  %v1876_v29 = vunpack.c.l.bf16 %v1875_v23  ;;  %v1877_v30 = vunpack.c.h.bf16 %v1875_v23  ;;  %v1946_v59 = vld [vmem:[%s2482_s10 + $0x8] sm:$0xff]  }
  0x48   : > { %593 = vmatpush.bf16.msra.mxu0 %v1714_v10  ;;  %v1691_v28 = vld [vmem:[#allocation7 + $0x38] sm:$0xf0]  ;;  %v1690_v31 = vor.u32 %v1845_v26, %v1689_v25  ;;  %v1681_v33 = vld [vmem:[#allocation7 + $0x20] sm:$0xf]  ;;  %v1843_v34 = vld [vmem:[#allocation7 + $0x24] sm:$0xf0]  ;;  %v1880_v62 = vunpack.c.l.bf16 %v1946_v59  ;;  %v1881_v63 = vunpack.c.h.bf16 %v1946_v59 }
  0x49   : > { %642 = vmatpush.bf16.msra.mxu1 %v1718_v11  ;;  %v1694_v32 = vor.u32 %v1844_v27, %v1691_v28  ;;  %v1842_v36 = vld [vmem:[#allocation7 + $0x24] sm:$0xf]  ;;  %v1683_v37 = vld [vmem:[#allocation7 + $0x28] sm:$0xf0]  ;;  %v1682_v40 = vor.u32 %v1843_v34, %v1681_v33  ;;  %v1673_v43 = vld [vmem:[#allocation7 + $0x10] sm:$0xf] }
  0x4a   : > { %v1686_v42 = vor.u32 %v1842_v36, %v1683_v37  ;;  %v1841_v44 = vld [vmem:[#allocation7 + $0x14] sm:$0xf0]  ;;  %v1840_v45 = vld [vmem:[#allocation7 + $0x14] sm:$0xf]  ;;  %v1675_v46 = vld [vmem:[#allocation7 + $0x18] sm:$0xf0] }
  0x4b   : > { %v2508_v49 = vld [vmem:[%s3114_s5] ss:$0 sm:$0xff]  ;;  %v1674_v50 = vor.u32 %v1841_v44, %v1673_v43  ;;  %v1678_v51 = vor.u32 %v1840_v45, %v1675_v46  ;;  %v1665_v52 = vld [vmem:[#allocation7] sm:$0xf]  ;;  %v1839_v53 = vld [vmem:[#allocation7 + $0x4] sm:$0xf0] }
  0x4c   : > { %594 = vmatpush.bf16.msra.mxu0 %v1706_v16  ;;  %v2493_v35 = vstv %s394_s11  ;;  %v1838_v54 = vld [vmem:[#allocation7 + $0x4] sm:$0xf]  ;;  %v1667_v55 = vld [vmem:[#allocation7 + $0x8] sm:$0xf0]  ;;  %v1666_v58 = vor.u32 %v1839_v53, %v1665_v52  ;;  %v1947_v6 = vld [vmem:[%s2482_s10 + $0x10] sm:$0xff]   ;;  %s1660_s26 = sshll.u32 %s2476_s0, 7 }
  0x4d   : > { %643 = vmatpush.bf16.msra.mxu1 %v1710_v17  ;;  %v429_v38 = vsub.f32 %v1876_v29, %v2493_v35  ;;  %v430_v39 = vsub.f32 %v1877_v30, %v2493_v35  ;;  %v2497_v41 = vstv %s1662_s16  ;;  %v1670_v60 = vor.u32 %v1838_v54, %v1667_v55  ;;  %v1948_v16 = vld [vmem:[%s2482_s10 + $0x18] sm:$0xff]   ;;  %v1949_v26 = vld [vmem:[%s2482_s10 + $0x20] sm:$0xff]   ;;  %s2660_s14 = scalar_lea.vmem [#allocation11], %s1660_s26  ;;  %s1661_s17 = sshll.u32 %s2476_s0, 4 }
  0x4e   : > { %v431_v0 = vsub.f32 %v1880_v62, %v2493_v35  ;;  %v432_v1 = vsub.f32 %v1881_v63, %v2493_v35  ;;  %v1884_v8 = vunpack.c.l.bf16 %v1947_v6  ;;  %v1885_v9 = vunpack.c.h.bf16 %v1947_v6  ;;  %v1951_v63 = vld [vmem:[%s2482_s10 + $0x30] sm:$0xff]   ;;  %s2668_s19 = scalar_lea.vmem [#allocation13], %s1661_s17  ;;  %s1424_s20 = sand.u32 1, %s2377_s9  }
  0x4f   : > { %v2500_v47 = vmul.f32 %v2497_v41, %v429_v38  ;;  %v2503_v48 = vmul.f32 %v2497_v41, %v430_v39  ;;  %v1888_v18 = vunpack.c.l.bf16 %v1948_v16  ;;  %v1889_v19 = vunpack.c.h.bf16 %v1948_v16  ;;  %s1460_s25 = sshll.u32 %s2660_s14, 4  ;;  %s3006_s13 = scalar_lea.vmem [#allocation10], %s1656_s2  ;;  %s1461_s25 = int_to_ptr.vmem [resolvable:$true] %s1460_s25 }
  0x50   : > { %595 = vmatpush.bf16.msra.mxu0 %v1698_v22  ;;  %v2518_v2 = vmul.f32 %v2497_v41, %v431_v0  ;;  %v2521_v3 = vmul.f32 %v2497_v41, %v432_v1  ;;  %v433_v10 = vsub.f32 %v1884_v8, %v2493_v35  ;;  %v434_v11 = vsub.f32 %v1885_v9, %v2493_v35  ;;  %s3010_s17 = scalar_lea.sflag [#allocation12], %s1424_s20 }
  0x51   : > { %644 = vmatpush.bf16.msra.mxu1 %v1702_v24  ;;  %v467_v56 = vsub.f32 %v2500_v47, %v2508_v49  ;;  %v468_v57 = vsub.f32 %v2503_v48, %v2508_v49  ;;  %v435_v20 = vsub.f32 %v1888_v18, %v2493_v35  ;;  %v436_v21 = vsub.f32 %v1889_v19, %v2493_v35  ;;  %v1868_v18 = vld [vmem:[#allocation9 + $0x70] sm:$0xff] }
  0x52   : > { %v469_v4 = vsub.f32 %v2518_v2, %v2508_v49  ;;  %v470_v5 = vsub.f32 %v2521_v3, %v2508_v49  ;;  %v2531_v12 = vmul.f32 %v2497_v41, %v433_v10  ;;  %v2534_v13 = vmul.f32 %v2497_v41, %v434_v11  ;;  %v1861_v11 = vld [vmem:[#allocation9 + $0x38] sm:$0xff] }
  0x53   : > { %v483_v61 = vpack.c.bf16 %v468_v57, %v467_v56  ;;  %v2544_v22 = vmul.f32 %v2497_v41, %v435_v20  ;;  %v2547_v23 = vmul.f32 %v2497_v41, %v436_v21  ;;  %v1892_v28 = vunpack.c.l.bf16 %v1949_v26  ;;  %1010 = vmatpush.bf16.msra.mxu2 %v1861_v11 }
  0x54   : > { %596 = vmatpush.bf16.msra.mxu0 %v1690_v31  ;;  %v484_v7 = vpack.c.bf16 %v470_v5, %v469_v4  ;;  %v471_v14 = vsub.f32 %v2531_v12, %v2508_v49  ;;  %v472_v15 = vsub.f32 %v2534_v13, %v2508_v49  ;;  %v1893_v29 = vunpack.c.h.bf16 %v1949_v26  ;;  %v1867_v26 = vld [vmem:[#allocation9 + $0x68] sm:$0xff] }
  0x55   : > { %645 = vmatpush.bf16.msra.mxu1 %v1694_v32  ;;  %v473_v24 = vsub.f32 %v2544_v22, %v2508_v49  ;;  %v474_v25 = vsub.f32 %v2547_v23, %v2508_v49  ;;  %v437_v30 = vsub.f32 %v1892_v28, %v2493_v35  ;;  %v1161_v32 = vmul.f32 %v2500_v47, %v2500_v47 }
  0x56   : > { %v485_v17 = vpack.c.bf16 %v472_v15, %v471_v14  ;;  %v438_v31 = vsub.f32 %v1893_v29, %v2493_v35  ;;  %v1162_v33 = vmul.f32 %v2503_v48, %v2503_v48  ;;  %v1163_v38 = vmul.f32 %v2518_v2, %v2518_v2  ;;  %v1869_v14 = vld [vmem:[#allocation9 + $0x78] sm:$0xff] }
  0x57   : > { %v486_v27 = vpack.c.bf16 %v474_v25, %v473_v24  ;;  %v2561_v34 = vmul.f32 %v2497_v41, %v437_v30  ;;  %v1164_v43 = vmul.f32 %v2521_v3, %v2521_v3  ;;  %v1165_v52 = vmul.f32 %v2531_v12, %v2531_v12  ;;  %1059 = vmatpush.bf16.msra.mxu3 %v1869_v14  ;;  %v1859_v25 = vld [vmem:[#allocation9 + $0x28] sm:$0xff]  ;;  %v1952_v29 = vld [vmem:[%s2482_s10 + $0x38] sm:$0xff]  }
  0x58   : > { %597 = vmatpush.bf16.msra.mxu0 %v1682_v40  ;;  %v2564_v36 = vmul.f32 %v2497_v41, %v438_v31  ;;  %v1177_v37 = vadd.f32 %v1162_v33, %v1161_v32  ;;  %v1166_v55 = vmul.f32 %v2534_v13, %v2534_v13  ;;  %v1168_v0 = vmul.f32 %v2547_v23, %v2547_v23 }
  0x59   : > { %646 = vmatpush.bf16.msra.mxu1 %v1686_v42  ;;  %v475_v39 = vsub.f32 %v2561_v34, %v2508_v49  ;;  %v1950_v42 = vld [vmem:[%s2482_s10 + $0x28] sm:$0xff]   ;;  %v1900_v5 = vunpack.c.l.bf16 %v1951_v63  ;;  %v1901_v6 = vunpack.c.h.bf16 %v1951_v63  ;;  %v1169_v8 = vmul.f32 %v2561_v34, %v2561_v34  ;;  %s1872_s10 = sshll.u32 %s2377_s9, 7 }
  0x5a   : > { %v476_v40 = vsub.f32 %v2564_v36, %v2508_v49  ;;  %v1178_v44 = vadd.f32 %v1177_v37, %v1163_v38  ;;  %v1896_v46 = vunpack.c.l.bf16 %v1950_v42  ;;  %v1170_v15 = vmul.f32 %v2564_v36, %v2564_v36  ;;  %v1858_v38 = vld [vmem:[#allocation9 + $0x20] sm:$0xff]  ;;  %s1459_s21 = scalar_lea.hbm %s3116_s7, %s1872_s10  ;;  %s2183_s10 = scalar_lea.hbm %s3116_s7, 512 }
  0x5b   : > { %v441_v9 = vsub.f32 %v1900_v5, %v2493_v35  ;;  %v442_v10 = vsub.f32 %v1901_v6, %v2493_v35  ;;  %1060 = vmatpush.bf16.msra.mxu3 %v1868_v18  ;;  %v1904_v33 = vunpack.c.l.bf16 %v1952_v29  ;;  %v1905_v37 = vunpack.c.h.bf16 %v1952_v29  ;;  %v463_v6 = vld [vmem:[%s3113_s4] sm:$0x3]  ;;  %s1462_s26 = sshll.u32 %s1459_s21, 4  ;;  %s1463_s26 = int_to_ptr.hbm [resolvable:$true] %s1462_s26 }
  0x5c   : > { %598 = vmatpush.bf16.msra.mxu0 %v1674_v50  ;;  %v487_v45 = vpack.c.bf16 %v476_v40, %v475_v39  ;;  %v1897_v50 = vunpack.c.h.bf16 %v1950_v42  ;;  %v439_v53 = vsub.f32 %v1896_v46, %v2493_v35  ;;  %v1866_v39 = vld [vmem:[#allocation9 + $0x60] sm:$0xff]  ;;  %v1865_v46 = vld [vmem:[#allocation9 + $0x58] sm:$0xff]  ;;  %s2177_s18 = sshra.s32 %s1463_s26, 4  ;;  %s2178_s18 = int_to_ptr.hbm [resolvable:$true] %s2177_s18 }
  0x5d   : > { %647 = vmatpush.bf16.msra.mxu1 %v1678_v51  ;;  %v1179_v51 = vadd.f32 %v1178_v44, %v1164_v43  ;;  %v2603_v19 = vmul.f32 %v2497_v41, %v441_v9  ;;  %v2606_v20 = vmul.f32 %v2497_v41, %v442_v10  ;;  %v443_v43 = vsub.f32 %v1904_v33, %v2493_v35  ;;  %p2184_p7 = scmp.lt.s32.totalorder %s2178_s18, %s3116_s7 }
  0x5e   : > { %v440_v54 = vsub.f32 %v1897_v50, %v2493_v35  ;;  %v2582_v57 = vmul.f32 %v2497_v41, %v439_v53  ;;  %v444_v44 = vsub.f32 %v1905_v37, %v2493_v35  ;;  %v2642_v9 = vperm.slane %v463_v6, 1 }
  0x5f   : > { %v1180_v56 = vadd.f32 %v1179_v51, %v1165_v52  ;;  %3136 = vst [vmem:[#allocation19_spill] sm:$0xff] %v2606_v20  ;;  %v480_v28 = vsub.f32 %v2606_v20, %v2508_v49  ;;  %1061 = vmatpush.bf16.msra.mxu3 %v1867_v26  ;;  %v1173_v42 = vmul.f32 %v2603_v19, %v2603_v19 }
  0x60   : > { %599 = vmatpush.bf16.msra.mxu0 %v1666_v58  ;;  %v2585_v58 = vmul.f32 %v2497_v41, %v440_v54  ;;  %v1171_v24 = vmul.f32 %v2582_v57, %v2582_v57  ;;  %v1174_v50 = vmul.f32 %v2606_v20, %v2606_v20  ;;  %v2624_v52 = vmul.f32 %v2497_v41, %v443_v43  ;;  %v1856_v54 = vld [vmem:[#allocation9 + $0x10] sm:$0xff] }
  0x61   : > { %648 = vmatpush.bf16.msra.mxu1 %v1670_v60  ;;  %v1181_v59 = vadd.f32 %v1180_v56, %v1166_v55  ;;  %v1167_v60 = vmul.f32 %v2544_v22, %v2544_v22  ;;  %v2627_v53 = vmul.f32 %v2497_v41, %v444_v44  ;;  %v1864_v55 = vld [vmem:[#allocation9 + $0x50] sm:$0xff] }
  0x62   : > { %v478_v62 = vsub.f32 %v2585_v58, %v2508_v49  ;;  %v1172_v30 = vmul.f32 %v2585_v58, %v2585_v58  ;;  %3137 = vst [vmem:[#allocation20_spill] sm:$0xff] %v2624_v52  ;;  %v481_v56 = vsub.f32 %v2624_v52, %v2508_v49 }
  0x63   : > { %600 = vmatmul.bf16.vlgmr.msra.gmra.mxu0 %v483_v61  ;;  %v1182_v1 = vadd.f32 %v1181_v59, %v1167_v60  ;;  %1062 = vmatpush.bf16.msra.mxu3 %v1866_v39  ;;  %3138 = vst [vmem:[#allocation21_spill] sm:$0xff] %v2627_v53  ;;  %v482_v59 = vsub.f32 %v2627_v53, %v2508_v49 }
  0x64   : > { %649 = vmatmul.bf16.vlgmr.msra.gmra.mxu1 %v483_v61  ;;  %v477_v61 = vsub.f32 %v2582_v57, %v2508_v49  ;;  %v1175_v60 = vmul.f32 %v2624_v52, %v2624_v52  ;;  %v1176_v63 = vmul.f32 %v2627_v53, %v2627_v53 }
  0x65   : > { %v490_v41 = vpack.c.bf16 %v482_v59, %v481_v56 }
  0x66   : > { %v488_v4 = vpack.c.bf16 %v478_v62, %v477_v61  ;;  %v1855_v61 = vld [vmem:[#allocation9 + $0x8] sm:$0xff] }
  0x67   : > { %1063 = vmatpush.bf16.msra.mxu3 %v1865_v46  ;;  %v1863_v62 = vld [vmem:[#allocation9 + $0x48] sm:$0xff] }
  0x6b   : > { %1064 = vmatpush.bf16.msra.mxu3 %v1864_v55 }
  0x6f   : > { %1065 = vmatpush.bf16.msra.mxu3 %v1863_v62 }
  0x73   : > { %605 = vmatmul.bf16.gmra.mxu0 %v484_v7 }
  0x74   : > { %654 = vmatmul.bf16.gmra.mxu1 %v484_v7  ;;  %v1183_v7 = vadd.f32 %v1182_v1, %v1168_v0  ;;  %v1854_v1 = vld [vmem:[#allocation9] sm:$0xff] }
  0x76   : > { %v1184_v16 = vadd.f32 %v1183_v7, %v1169_v8  ;;  %v2640_v8 = vperm.slane %v463_v6, 0 }
  0x78   : > { %v1185_v21 = vadd.f32 %v1184_v16, %v1170_v15 }
  0x7a   : > { %v1186_v31 = vadd.f32 %v1185_v21, %v1171_v24 }
  0x7c   : > { %v1187_v40 = vadd.f32 %v1186_v31, %v1172_v30 }
  0x7e   : > { %v1188_v51 = vadd.f32 %v1187_v40, %v1173_v42  ;;  %v2306_v40 = vmov 0.0  }
  0x7f   : > { %1394 = vst [vmem:[%s2668_s19] sm:$0xff] %v2306_v40 }
  0x80   : > { %v1189_v35 = vadd.f32 %v1188_v51, %v1174_v50  ;;  %1395 = vst [vmem:[%s2668_s19 + $0x8] sm:$0xff] %v2306_v40 }
  0x82   : > { %v1190_v0 = vadd.f32 %v1189_v35, %v1175_v60 }
  0x83   : > { %610 = vmatmul.bf16.gmra.mxu0 %v485_v17 }
  0x84   : > { %659 = vmatmul.bf16.gmra.mxu1 %v485_v17  ;;  %v1860_v17 = vld [vmem:[#allocation9 + $0x30] sm:$0xff]  ;;  %v1191_v5 = vadd.f32 %v1190_v0, %v1176_v63 }
  0x85   : > { %1011 = vmatpush.bf16.msra.mxu2 %v1860_v17 }
  0x89   : > { %1012 = vmatpush.bf16.msra.mxu2 %v1859_v25 }
  0x8d   : > { %1013 = vmatpush.bf16.msra.mxu2 %v1858_v38 }
  0x93   : > { %615 = vmatmul.bf16.gmra.mxu0 %v486_v27 }
  0x94   : > { %664 = vmatmul.bf16.gmra.mxu1 %v486_v27  ;;  %v479_v27 = vsub.f32 %v2603_v19, %v2508_v49  ;;  %v1192_v49 = vrot.slane %v1191_v5, 4 }
  0x96   : > { %v489_v32 = vpack.c.bf16 %v480_v28, %v479_v27  ;;  %v1193_v7 = vadd.f32 %v1192_v49, %v1191_v5 }
  0x98   : > { %v1194_v10 = vrot.slane %v1193_v7, 2 }
  0x9a   : > { %v1195_v17 = vadd.f32 %v1194_v10, %v1193_v7 }
  0x9c   : > { %v1196_v27 = vrot.slane %v1195_v17, 1 }
  0x9e   : > { %v1197_v37 = vadd.f32 %v1196_v27, %v1195_v17 }
  0xa0   : > { %1397 = vst [vmem:[%s2668_s19 + $0x1] sm:$0x1] %v1197_v37 }
  0xa3   : > { %620 = vmatmul.bf16.gmra.mxu0 %v487_v45 }
  0xa4   : > { %669 = vmatmul.bf16.gmra.mxu1 %v487_v45  ;;  %v1857_v45 = vld [vmem:[#allocation9 + $0x18] sm:$0xff] }
  0xa5   : > { %1014 = vmatpush.bf16.msra.mxu2 %v1857_v45 }
  0xa9   : > { %1015 = vmatpush.bf16.msra.mxu2 %v1856_v54 }
  0xad   : > { %1016 = vmatpush.bf16.msra.mxu2 %v1855_v61 }
  0xb1   : > { %1017 = vmatpush.bf16.msra.mxu2 %v1854_v1 }
  0xb3   : > { %625 = vmatmul.bf16.gmra.mxu0 %v488_v4 }
  0xb4   : > { %674 = vmatmul.bf16.gmra.mxu1 %v488_v4  ;;  %v1862_v4 = vld [vmem:[#allocation9 + $0x40] sm:$0xff] }
  0xb5   : > { %1066 = vmatpush.bf16.msra.mxu3 %v1862_v4 }
  0xc3   : > { %630 = vmatmul.bf16.gmra.mxu0 %v489_v32 }
  0xc4   : > { %679 = vmatmul.bf16.gmra.mxu1 %v489_v32 }
  0xd3   : > { %635 = vmatmul.bf16.gmra.mxu0 %v490_v41 }
  0xd4   : > { %684 = vmatmul.bf16.gmra.mxu1 %v490_v41 }
  0xe0   : > { %v601_v11 = vpop.f32.mrf.mxu0 }
  0xe1   : > { %v602_v14 = vadd.f32 %v601_v11, %v2640_v8  ;;  %v650_v15 = vpop.f32.mrf.mxu1 }
  0xe2   : > { %v651_v16 = vadd.f32 %v650_v15, %v2642_v9 }
  0xe3   : > { %v690_v18 = vmax.f32 %v602_v14, 0.0 }
  0xe4   : > { %v691_v21 = vmax.f32 %v651_v16, 0.0 }
  0xe5   : > { %vm2647_vm0 = vcmp.gt.f32.partialorder %v690_v18, 0.3 }
  0xe6   : > { %v754_v25 = vsel %vm2647_vm0, %v690_v18, 0.0  ;;  %vm2653_vm1 = vcmp.gt.f32.partialorder %v691_v21, 0.3  ;;  %v1791_v42 = vsel %vm2647_vm0, 1.0, %v2306_v40 }
  0xe7   : > { %v755_v28 = vsel %vm2653_vm1, %v691_v21, 0.0  ;;  %v1792_v43 = vsel %vm2653_vm1, 1.0, %v2306_v40 }
  0xe8   : > { %v786_v29 = vpack.c.bf16 %v755_v28, %v754_v25  ;;  %v603_v30 = vpop.f32.mrf.mxu0 }
  0xe9   : > { %v604_v31 = vadd.f32 %v603_v30, %v2640_v8  ;;  %v652_v32 = vpop.f32.mrf.mxu1 }
  0xea   : > { %1378 = vst [vmem:[%s2660_s14] sm:$0xff] %v786_v29  ;;  %v653_v33 = vadd.f32 %v652_v32, %v2642_v9  ;;  %v850_v62 = vunpack.c.l.b16 %v786_v29  ;;  %v851_v0 = vunpack.c.h.b16 %v786_v29 }
  0xeb   : > { %v692_v38 = vmax.f32 %v604_v31, 0.0 }
  0xec   : > { %v693_v39 = vmax.f32 %v653_v33, 0.0 }
  0xed   : > { %vm724_vm2 = vcmp.gt.f32.partialorder %v692_v38, 0.3 }
  0xee   : > { %v756_v44 = vsel %vm724_vm2, %v692_v38, 0.0  ;;  %v1793_v45 = vsel %vm724_vm2, 1.0, %v2306_v40  ;;  %vm725_vm3 = vcmp.gt.f32.partialorder %v693_v39, 0.3 }
  0xef   : > { %v1262_v46 = vadd.f32 %v1793_v45, %v1791_v42  ;;  %v1304_v50 = vadd.f32 %v756_v44, %v754_v25  ;;  %v757_v51 = vsel %vm725_vm3, %v693_v39, 0.0  ;;  %v1794_v54 = vsel %vm725_vm3, 1.0, %v2306_v40 }
  0xf0   : > { %v787_v55 = vpack.c.bf16 %v757_v51, %v756_v44  ;;  %v1283_v35 = vadd.f32 %v1794_v54, %v1792_v43  ;;  %v1325_v56 = vadd.f32 %v757_v51, %v755_v28  ;;  %v606_v59 = vpop.f32.mrf.mxu0 }
  0xf1   : > { %v607_v60 = vadd.f32 %v606_v59, %v2640_v8  ;;  %v655_v61 = vpop.f32.mrf.mxu1 }
  0xf2   : > { %1379 = vst [vmem:[%s2660_s14 + $0x8] sm:$0xff] %v787_v55  ;;  %v656_v41 = vadd.f32 %v655_v61, %v2642_v9  ;;  %v852_v63 = vunpack.c.l.b16 %v787_v55  ;;  %v853_v1 = vunpack.c.h.b16 %v787_v55 }
  0xf3   : > { %v694_v4 = vmax.f32 %v607_v60, 0.0 }
  0xf4   : > { %v695_v5 = vmax.f32 %v656_v41, 0.0  ;;  %v882_v49 = vpack.c.b16 %v852_v63, %v850_v62  ;;  %v883_v6 = vpack.c.b16 %v853_v1, %v851_v0 }
  0xf5   : > { %vm726_vm4 = vcmp.gt.f32.partialorder %v694_v4, 0.3 }
  0xf6   : > { %v758_v7 = vsel %vm726_vm4, %v694_v4, 0.0  ;;  %v1795_v10 = vsel %vm726_vm4, 1.0, %v2306_v40  ;;  %vm727_vm5 = vcmp.gt.f32.partialorder %v695_v5, 0.3  ;;  %1018 = vmatmul.bf16.vlgmr.msra.gmra.mxu2 %v882_v49  ;;  %1067 = vmatmul.bf16.vlgmr.msra.gmra.mxu3 %v883_v6 }
  0xf7   : > { %v1263_v11 = vadd.f32 %v1795_v10, %v1262_v46  ;;  %v1305_v14 = vadd.f32 %v1304_v50, %v758_v7  ;;  %v759_v15 = vsel %vm727_vm5, %v695_v5, 0.0  ;;  %v1796_v16 = vsel %vm727_vm5, 1.0, %v2306_v40 }
  0xf8   : > { %v788_v17 = vpack.c.bf16 %v759_v15, %v758_v7  ;;  %v1284_v18 = vadd.f32 %v1796_v16, %v1283_v35  ;;  %v1326_v21 = vadd.f32 %v1325_v56, %v759_v15  ;;  %v608_v24 = vpop.f32.mrf.mxu0 }
  0xf9   : > { %v609_v25 = vadd.f32 %v608_v24, %v2640_v8  ;;  %v657_v26 = vpop.f32.mrf.mxu1 }
  0xfa   : > { %1380 = vst [vmem:[%s2660_s14 + $0x10] sm:$0xff] %v788_v17  ;;  %v658_v27 = vadd.f32 %v657_v26, %v2642_v9  ;;  %v854_v50 = vunpack.c.l.b16 %v788_v17  ;;  %v855_v55 = vunpack.c.h.b16 %v788_v17 }
  0xfb   : > { %v696_v28 = vmax.f32 %v609_v25, 0.0 }
  0xfc   : > { %v697_v29 = vmax.f32 %v658_v27, 0.0 }
  0xfd   : > { %vm728_vm6 = vcmp.gt.f32.partialorder %v696_v28, 0.3 }
  0xfe   : > { %v760_v30 = vsel %vm728_vm6, %v696_v28, 0.0  ;;  %v1797_v31 = vsel %vm728_vm6, 1.0, %v2306_v40  ;;  %vm729_vm7 = vcmp.gt.f32.partialorder %v697_v29, 0.3 }
  0xff   : > { %v1264_v32 = vadd.f32 %v1797_v31, %v1263_v11  ;;  %v1306_v33 = vadd.f32 %v1305_v14, %v760_v30  ;;  %v761_v37 = vsel %vm729_vm7, %v697_v29, 0.0  ;;  %v1798_v38 = vsel %vm729_vm7, 1.0, %v2306_v40 }
 0x100   : > { %v789_v39 = vpack.c.bf16 %v761_v37, %v760_v30  ;;  %v1285_v42 = vadd.f32 %v1798_v38, %v1284_v18  ;;  %v1327_v43 = vadd.f32 %v1326_v21, %v761_v37  ;;  %v611_v44 = vpop.f32.mrf.mxu0 }
 0x101   : > { %v612_v45 = vadd.f32 %v611_v44, %v2640_v8  ;;  %v660_v46 = vpop.f32.mrf.mxu1 }
 0x102   : > { %1381 = vst [vmem:[%s2660_s14 + $0x18] sm:$0xff] %v789_v39  ;;  %v661_v51 = vadd.f32 %v660_v46, %v2642_v9  ;;  %v856_v54 = vunpack.c.l.b16 %v789_v39  ;;  %v857_v35 = vunpack.c.h.b16 %v789_v39 }
 0x103   : > { %v698_v56 = vmax.f32 %v612_v45, 0.0 }
 0x104   : > { %v699_v59 = vmax.f32 %v661_v51, 0.0  ;;  %v884_v60 = vpack.c.b16 %v856_v54, %v854_v50  ;;  %v885_v61 = vpack.c.b16 %v857_v35, %v855_v55 }
 0x105   : > { %vm730_vm8 = vcmp.gt.f32.partialorder %v698_v56, 0.3 }
 0x106   : > { %v762_v62 = vsel %vm730_vm8, %v698_v56, 0.0  ;;  %v1799_v41 = vsel %vm730_vm8, 1.0, %v2306_v40  ;;  %vm731_vm9 = vcmp.gt.f32.partialorder %v699_v59, 0.3  ;;  %1023 = vmatmul.bf16.gmra.mxu2 %v884_v60  ;;  %1072 = vmatmul.bf16.gmra.mxu3 %v885_v61 }
 0x107   : > { %v2694_v63 = vadd.f32 %v1799_v41, %v1264_v32  ;;  %v2696_v0 = vadd.f32 %v1306_v33, %v762_v62  ;;  %v763_v1 = vsel %vm731_vm9, %v699_v59, 0.0  ;;  %v1800_v4 = vsel %vm731_vm9, 1.0, %v2306_v40 }
 0x108   : > { %v790_v5 = vpack.c.bf16 %v763_v1, %v762_v62  ;;  %v2699_v49 = vadd.f32 %v1800_v4, %v1285_v42  ;;  %v2701_v6 = vadd.f32 %v1327_v43, %v763_v1  ;;  %v613_v7 = vpop.f32.mrf.mxu0 }
 0x109   : > { %v614_v10 = vadd.f32 %v613_v7, %v2640_v8  ;;  %v662_v11 = vpop.f32.mrf.mxu1 }
 0x10a   : > { %1382 = vst [vmem:[%s2660_s14 + $0x20] sm:$0xff] %v790_v5  ;;  %v663_v14 = vadd.f32 %v662_v11, %v2642_v9  ;;  %v858_v29 = vunpack.c.l.b16 %v790_v5  ;;  %v859_v32 = vunpack.c.h.b16 %v790_v5 }
 0x10b   : > { %v700_v15 = vmax.f32 %v614_v10, 0.0 }
 0x10c   : > { %v701_v16 = vmax.f32 %v663_v14, 0.0 }
 0x10d   : > { %vm2706_vm10 = vcmp.gt.f32.partialorder %v700_v15, 0.3 }
 0x10e   : > { %v2712_v18 = vsel %vm2706_vm10, %v700_v15, 0.0  ;;  %vm2714_vm11 = vcmp.gt.f32.partialorder %v701_v16, 0.3 }
 0x10f   : > { %v2720_v24 = vsel %vm2714_vm11, %v701_v16, 0.0 }
 0x110   : > { %v791_v25 = vpack.c.bf16 %v2720_v24, %v2712_v18  ;;  %v616_v26 = vpop.f32.mrf.mxu0  ;;  %v1329_v45 = vadd.f32 %v2701_v6, %v2720_v24 }
 0x111   : > { %v617_v27 = vadd.f32 %v616_v26, %v2640_v8  ;;  %v665_v28 = vpop.f32.mrf.mxu1 }
 0x112   : > { %1383 = vst [vmem:[%s2660_s14 + $0x28] sm:$0xff] %v791_v25  ;;  %v666_v30 = vadd.f32 %v665_v28, %v2642_v9  ;;  %v860_v31 = vunpack.c.l.b16 %v791_v25  ;;  %v861_v33 = vunpack.c.h.b16 %v791_v25 }
 0x113   : > { %v702_v37 = vmax.f32 %v617_v27, 0.0 }
 0x114   : > { %v703_v38 = vmax.f32 %v666_v30, 0.0  ;;  %v886_v39 = vpack.c.b16 %v860_v31, %v858_v29  ;;  %v887_v42 = vpack.c.b16 %v861_v33, %v859_v32 }
 0x115   : > { %vm2727_vm12 = vcmp.gt.f32.partialorder %v702_v37, 0.3 }
 0x116   : > { %v2733_v44 = vsel %vm2727_vm12, %v702_v37, 0.0  ;;  %vm2735_vm13 = vcmp.gt.f32.partialorder %v703_v38, 0.3  ;;  %1028 = vmatmul.bf16.gmra.mxu2 %v886_v39  ;;  %1077 = vmatmul.bf16.gmra.mxu3 %v887_v42 }
 0x117   : > { %v2741_v46 = vsel %vm2735_vm13, %v703_v38, 0.0 }
 0x118   : > { %v792_v50 = vpack.c.bf16 %v2741_v46, %v2733_v44  ;;  %v618_v51 = vpop.f32.mrf.mxu0  ;;  %v1330_v6 = vadd.f32 %v1329_v45, %v2741_v46 }
 0x119   : > { %v619_v54 = vadd.f32 %v618_v51, %v2640_v8  ;;  %v667_v55 = vpop.f32.mrf.mxu1 }
 0x11a   : > { %1384 = vst [vmem:[%s2660_s14 + $0x30] sm:$0xff] %v792_v50  ;;  %v668_v35 = vadd.f32 %v667_v55, %v2642_v9  ;;  %v862_v10 = vunpack.c.l.b16 %v792_v50  ;;  %v863_v15 = vunpack.c.h.b16 %v792_v50 }
 0x11b   : > { %v704_v56 = vmax.f32 %v619_v54, 0.0 }
 0x11c   : > { %v705_v59 = vmax.f32 %v668_v35, 0.0 }
 0x11d   : > { %vm2748_vm14 = vcmp.gt.f32.partialorder %v704_v56, 0.3 }
 0x11e   : > { %v2754_v61 = vsel %vm2748_vm14, %v704_v56, 0.0  ;;  %vm2756_vm15 = vcmp.gt.f32.partialorder %v705_v59, 0.3 }
 0x11f   : > { %v2762_v41 = vsel %vm2756_vm15, %v705_v59, 0.0 }
 0x120   : > { %v793_v1 = vpack.c.bf16 %v2762_v41, %v2754_v61  ;;  %v621_v4 = vpop.f32.mrf.mxu0 }
 0x121   : > { %v622_v5 = vadd.f32 %v621_v4, %v2640_v8  ;;  %v670_v7 = vpop.f32.mrf.mxu1 }
 0x122   : > { %1385 = vst [vmem:[%s2660_s14 + $0x38] sm:$0xff] %v793_v1  ;;  %v671_v11 = vadd.f32 %v670_v7, %v2642_v9  ;;  %v864_v14 = vunpack.c.l.b16 %v793_v1  ;;  %v865_v16 = vunpack.c.h.b16 %v793_v1 }
 0x123   : > { %v706_v25 = vmax.f32 %v622_v5, 0.0 }
 0x124   : > { %v707_v26 = vmax.f32 %v671_v11, 0.0  ;;  %v888_v27 = vpack.c.b16 %v864_v14, %v862_v10  ;;  %v889_v28 = vpack.c.b16 %v865_v16, %v863_v15 }
 0x125   : > { %vm2769_vm0 = vcmp.gt.f32.partialorder %v706_v25, 0.3 }
 0x126   : > { %v2775_v30 = vsel %vm2769_vm0, %v706_v25, 0.0  ;;  %vm2777_vm1 = vcmp.gt.f32.partialorder %v707_v26, 0.3  ;;  %1033 = vmatmul.bf16.gmra.mxu2 %v888_v27  ;;  %1082 = vmatmul.bf16.gmra.mxu3 %v889_v28  ;;  %v1807_v60 = vsel %vm2769_vm0, 1.0, %v2306_v40  ;;  %vm1401_vm0 = vcmask 1040384  }
 0x127   : > { %v2783_v32 = vsel %vm2777_vm1, %v707_v26, 0.0 }
 0x128   : > { %v794_v33 = vpack.c.bf16 %v2783_v32, %v2775_v30  ;;  %v623_v37 = vpop.f32.mrf.mxu0 }
 0x129   : > { %v624_v38 = vadd.f32 %v623_v37, %v2640_v8  ;;  %v672_v39 = vpop.f32.mrf.mxu1 }
 0x12a   : > { %1386 = vst [vmem:[%s2660_s14 + $0x40] sm:$0xff] %v794_v33  ;;  %v673_v42 = vadd.f32 %v672_v39, %v2642_v9  ;;  %v866_v7 = vunpack.c.l.b16 %v794_v33  ;;  %v867_v14 = vunpack.c.h.b16 %v794_v33 }
 0x12b   : > { %v708_v50 = vmax.f32 %v624_v38, 0.0 }
 0x12c   : > { %v709_v51 = vmax.f32 %v673_v42, 0.0 }
 0x12d   : > { %vm2790_vm2 = vcmp.gt.f32.partialorder %v708_v50, 0.3 }
 0x12e   : > { %v2796_v55 = vsel %vm2790_vm2, %v708_v50, 0.0  ;;  %vm2798_vm3 = vcmp.gt.f32.partialorder %v709_v51, 0.3  ;;  %v1809_v29 = vsel %vm2790_vm2, 1.0, %v2306_v40 }
 0x12f   : > { %v2804_v56 = vsel %vm2798_vm3, %v709_v51, 0.0 }
 0x130   : > { %v795_v59 = vpack.c.bf16 %v2804_v56, %v2796_v55  ;;  %v626_v1 = vpop.f32.mrf.mxu0 }
 0x131   : > { %v627_v4 = vadd.f32 %v626_v1, %v2640_v8  ;;  %v675_v5 = vpop.f32.mrf.mxu1 }
 0x132   : > { %1387 = vst [vmem:[%s2660_s14 + $0x48] sm:$0xff] %v795_v59  ;;  %v676_v10 = vadd.f32 %v675_v5, %v2642_v9  ;;  %v868_v11 = vunpack.c.l.b16 %v795_v59  ;;  %v869_v15 = vunpack.c.h.b16 %v795_v59 }
 0x133   : > { %v710_v16 = vmax.f32 %v627_v4, 0.0 }
 0x134   : > { %v711_v25 = vmax.f32 %v676_v10, 0.0  ;;  %v890_v26 = vpack.c.b16 %v868_v11, %v866_v7  ;;  %v891_v27 = vpack.c.b16 %v869_v15, %v867_v14 }
 0x135   : > { %vm2811_vm4 = vcmp.gt.f32.partialorder %v710_v16, 0.3 }
 0x136   : > { %v2817_v37 = vsel %vm2811_vm4, %v710_v16, 0.0  ;;  %vm2819_vm5 = vcmp.gt.f32.partialorder %v711_v25, 0.3  ;;  %1038 = vmatmul.bf16.gmra.mxu2 %v890_v26  ;;  %1087 = vmatmul.bf16.gmra.mxu3 %v891_v27  ;;  %v1811_v35 = vsel %vm2811_vm4, 1.0, %v2306_v40 }
 0x137   : > { %v2825_v33 = vsel %vm2819_vm5, %v711_v25, 0.0 }
 0x138   : > { %v796_v39 = vpack.c.bf16 %v2825_v33, %v2817_v37  ;;  %v628_v42 = vpop.f32.mrf.mxu0 }
 0x139   : > { %v629_v50 = vadd.f32 %v628_v42, %v2640_v8  ;;  %v677_v51 = vpop.f32.mrf.mxu1 }
 0x13a   : > { %1388 = vst [vmem:[%s2660_s14 + $0x50] sm:$0xff] %v796_v39  ;;  %v678_v59 = vadd.f32 %v677_v51, %v2642_v9  ;;  %v870_v26 = vunpack.c.l.b16 %v796_v39 }
 0x13b   : > { %v712_v1 = vmax.f32 %v629_v50, 0.0  ;;  %v871_v50 = vunpack.c.h.b16 %v796_v39  ;;  %v1803_v39 = vsel %vm2727_vm12, 1.0, %v2306_v40 }
 0x13c   : > { %v713_v4 = vmax.f32 %v678_v59, 0.0 }
 0x13d   : > { %vm2832_vm6 = vcmp.gt.f32.partialorder %v712_v1, 0.3 }
 0x13e   : > { %v2838_v7 = vsel %vm2832_vm6, %v712_v1, 0.0  ;;  %vm2840_vm7 = vcmp.gt.f32.partialorder %v713_v4, 0.3  ;;  %v1801_v1 = vsel %vm2706_vm10, 1.0, %v2306_v40 }
 0x13f   : > { %v2846_v11 = vsel %vm2840_vm7, %v713_v4, 0.0  ;;  %v1266_v21 = vadd.f32 %v1801_v1, %v2694_v63  ;;  %v1814_v38 = vsel %vm2840_vm7, 1.0, %v2306_v40 }
 0x140   : > { %v797_v14 = vpack.c.bf16 %v2846_v11, %v2838_v7  ;;  %v631_v15 = vpop.f32.mrf.mxu0 }
 0x141   : > { %v632_v16 = vadd.f32 %v631_v15, %v2640_v8  ;;  %v680_v25 = vpop.f32.mrf.mxu1  ;;  %v1802_v15 = vsel %vm2714_vm11, 1.0, %v2306_v40 }
 0x142   : > { %1389 = vst [vmem:[%s2660_s14 + $0x58] sm:$0xff] %v797_v14  ;;  %v681_v27 = vadd.f32 %v680_v25, %v2642_v9  ;;  %v872_v42 = vunpack.c.l.b16 %v797_v14  ;;  %v873_v51 = vunpack.c.h.b16 %v797_v14  ;;  %v1308_v25 = vadd.f32 %v2696_v0, %v2712_v18 }
 0x143   : > { %v714_v59 = vmax.f32 %v632_v16, 0.0  ;;  %v1804_v16 = vsel %vm2735_vm13, 1.0, %v2306_v40 }
 0x144   : > { %v715_v4 = vmax.f32 %v681_v27, 0.0  ;;  %v892_v53 = vpack.c.b16 %v872_v42, %v870_v26  ;;  %v893_v52 = vpack.c.b16 %v873_v51, %v871_v50  ;;  %v1287_v26 = vadd.f32 %v1802_v15, %v2699_v49 }
 0x145   : > { %vm2859_vm8 = vcmp.gt.f32.partialorder %v714_v59, 0.3  ;;  %v1267_v27 = vadd.f32 %v1803_v39, %v1266_v21  ;;  %v1806_v42 = vsel %vm2756_vm15, 1.0, %v2306_v40  ;;  %v1309_v49 = vadd.f32 %v1308_v25, %v2733_v44 }
 0x146   : > { %v2868_v14 = vsel %vm2859_vm8, %v714_v59, 0.0  ;;  %vm2870_vm9 = vcmp.gt.f32.partialorder %v715_v4, 0.3  ;;  %1043 = vmatmul.bf16.gmra.mxu2 %v892_v53  ;;  %1092 = vmatmul.bf16.gmra.mxu3 %v893_v52  ;;  %v1805_v52 = vsel %vm2748_vm14, 1.0, %v2306_v40  ;;  %v1288_v50 = vadd.f32 %v1804_v16, %v1287_v26 }
 0x147   : > { %v2880_v43 = vsel %vm2870_vm9, %v715_v4, 0.0  ;;  %v1268_v24 = vadd.f32 %v1805_v52, %v1267_v27  ;;  %v1310_v62 = vadd.f32 %v1309_v49, %v2754_v61  ;;  %v1808_v4 = vsel %vm2777_vm1, 1.0, %v2306_v40 }
 0x148   : > { %v798_v53 = vpack.c.bf16 %v2880_v43, %v2868_v14  ;;  %v633_v63 = vpop.f32.mrf.mxu0  ;;  %v1289_v1 = vadd.f32 %v1806_v42, %v1288_v50  ;;  %v1331_v15 = vadd.f32 %v1330_v6, %v2762_v41  ;;  %v1810_v61 = vsel %vm2798_vm3, 1.0, %v2306_v40 }
 0x149   : > { %v634_v0 = vadd.f32 %v633_v63, %v2640_v8  ;;  %v682_v18 = vpop.f32.mrf.mxu1  ;;  %v1269_v39 = vadd.f32 %v1807_v60, %v1268_v24  ;;  %v1311_v46 = vadd.f32 %v1310_v62, %v2775_v30  ;;  %v1812_v27 = vsel %vm2819_vm5, 1.0, %v2306_v40 }
 0x14a   : > { %1390 = vst [vmem:[%s2660_s14 + $0x60] sm:$0xff] %v798_v53  ;;  %v683_v51 = vadd.f32 %v682_v18, %v2642_v9  ;;  %v1290_v54 = vadd.f32 %v1808_v4, %v1289_v1  ;;  %v1332_v16 = vadd.f32 %v1331_v15, %v2783_v32  ;;  %v1815_v5 = vsel %vm2859_vm8, 1.0, %v2306_v40 }
 0x14b   : > { %v716_v59 = vmax.f32 %v634_v0, 0.0  ;;  %v1270_v26 = vadd.f32 %v1809_v29, %v1269_v39  ;;  %v1312_v30 = vadd.f32 %v1311_v46, %v2796_v55  ;;  %v874_v0 = vunpack.c.l.b16 %v798_v53 }
 0x14c   : > { %v717_v44 = vmax.f32 %v683_v51, 0.0  ;;  %v1291_v45 = vadd.f32 %v1810_v61, %v1290_v54  ;;  %v875_v55 = vunpack.c.h.b16 %v798_v53  ;;  %v1333_v28 = vadd.f32 %v1332_v16, %v2804_v56 }
 0x14d   : > { %vm2911_vm10 = vcmp.gt.f32.partialorder %v716_v59, 0.3  ;;  %v1271_v60 = vadd.f32 %v1811_v35, %v1270_v26  ;;  %v1813_v51 = vsel %vm2832_vm6, 1.0, %v2306_v40  ;;  %v1313_v1 = vadd.f32 %v1312_v30, %v2817_v37 }
 0x14e   : > { %v780_v31 = vsel %vm2911_vm10, %v716_v59, 0.0  ;;  %vm2921_vm11 = vcmp.gt.f32.partialorder %v717_v44, 0.3  ;;  %v1292_v4 = vadd.f32 %v1812_v27, %v1291_v45  ;;  %v1334_v53 = vadd.f32 %v1333_v28, %v2825_v33 }
 0x14f   : > { %v781_v25 = vsel %vm2921_vm11, %v717_v44, 0.0  ;;  %v1816_v10 = vsel %vm2870_vm9, 1.0, %v2306_v40  ;;  %v1272_v33 = vadd.f32 %v1813_v51, %v1271_v60  ;;  %v1314_v15 = vadd.f32 %v1313_v1, %v2838_v7 }
 0x150   : > { %v799_v52 = vpack.c.bf16 %v781_v25, %v780_v31  ;;  %v636_v63 = vpop.f32.mrf.mxu0  ;;  %v1293_v39 = vadd.f32 %v1814_v38, %v1292_v4  ;;  %v1335_v17 = vadd.f32 %v1334_v53, %v2846_v11  ;;  %v1817_v29 = vsel %vm2911_vm10, 1.0, %v2306_v40 }
 0x151   : > { %v637_v42 = vadd.f32 %v636_v63, %v2640_v8  ;;  %v685_v32 = vpop.f32.mrf.mxu1  ;;  %v1818_v46 = vsel %vm2921_vm11, 1.0, %v2306_v40  ;;  %v1273_v16 = vadd.f32 %v1815_v5, %v1272_v33  ;;  %v1315_v7 = vadd.f32 %v1314_v15, %v2868_v14 }
 0x152   : > { %1391 = vst [vmem:[%s2660_s14 + $0x68] sm:$0xff] %v799_v52  ;;  %v686_v18 = vadd.f32 %v685_v32, %v2642_v9  ;;  %v876_v49 = vunpack.c.l.b16 %v799_v52  ;;  %v877_v50 = vunpack.c.h.b16 %v799_v52  ;;  %v1294_v26 = vadd.f32 %v1816_v10, %v1293_v39 }
 0x153   : > { %v718_v6 = vmax.f32 %v637_v42, 0.0  ;;  %v1336_v52 = vadd.f32 %v1335_v17, %v2880_v43  ;;  %v1274_v63 = vadd.f32 %v1817_v29, %v1273_v16  ;;  %v1316_v45 = vadd.f32 %v1315_v7, %v780_v31 }
 0x154   : > { %v719_v24 = vmax.f32 %v686_v18, 0.0  ;;  %v894_v59 = vpack.c.b16 %v876_v49, %v874_v0  ;;  %v895_v62 = vpack.c.b16 %v877_v50, %v875_v55  ;;  %v1295_v14 = vadd.f32 %v1818_v46, %v1294_v26 }
 0x155   : > { %vm2947_vm12 = vcmp.gt.f32.partialorder %v718_v6, 0.3  ;;  %v1337_v42 = vadd.f32 %v1336_v52, %v781_v25 }
 0x156   : > { %v782_v44 = vsel %vm2947_vm12, %v718_v6, 0.0  ;;  %vm2959_vm13 = vcmp.gt.f32.partialorder %v719_v24, 0.3  ;;  %1048 = vmatmul.bf16.gmra.mxu2 %v894_v59  ;;  %1097 = vmatmul.bf16.gmra.mxu3 %v895_v62  ;;  %v1819_v11 = vsel %vm2947_vm12, 1.0, %v2306_v40 }
 0x157   : > { %v783_v20 = vsel %vm2959_vm13, %v719_v24, 0.0  ;;  %v1820_v21 = vsel %vm2959_vm13, 1.0, %v2306_v40  ;;  %v1275_v32 = vadd.f32 %v1819_v11, %v1274_v63  ;;  %v1317_v0 = vadd.f32 %v1316_v45, %v782_v44 }
 0x158   : > { %v800_v61 = vpack.c.bf16 %v783_v20, %v782_v44  ;;  %v638_v54 = vpop.f32.mrf.mxu0  ;;  %v1296_v43 = vadd.f32 %v1820_v21, %v1295_v14  ;;  %v1338_v18 = vadd.f32 %v1337_v42, %v783_v20 }
 0x159   : > { %v639_v30 = vadd.f32 %v638_v54, %v2640_v8  ;;  %v687_v35 = vpop.f32.mrf.mxu1  ;;  %v1404_v54 = vlaneseq }
 0x15a   : > { %1392 = vst [vmem:[%s2660_s14 + $0x70] sm:$0xff] %v800_v61  ;;  %v688_v41 = vadd.f32 %v687_v35, %v2642_v9  ;;  %v878_v24 = vunpack.c.l.b16 %v800_v61  ;;  %v879_v59 = vunpack.c.h.b16 %v800_v61 }
 0x15b   : > { %v720_v27 = vmax.f32 %v639_v30, 0.0  ;;  %vm1406_vm1 = vcmp.lt.s32.totalorder %v1404_v54, 256 }
 0x15c   : > { %v721_v8 = vmax.f32 %v688_v41, 0.0 }
 0x15d   : > { %vm752_vm14 = vcmp.gt.f32.partialorder %v720_v27, 0.3 }
 0x15e   : > { %v784_v49 = vsel %vm752_vm14, %v720_v27, 0.0  ;;  %v1821_v55 = vsel %vm752_vm14, 1.0, %v2306_v40  ;;  %vm753_vm15 = vcmp.gt.f32.partialorder %v721_v8, 0.3 }
 0x15f   : > { %v1276_v50 = vadd.f32 %v1821_v55, %v1275_v32  ;;  %v1318_v28 = vadd.f32 %v1317_v0, %v784_v49  ;;  %v785_v60 = vsel %vm753_vm15, %v721_v8, 0.0  ;;  %v1822_v9 = vsel %vm753_vm15, 1.0, %v2306_v40  ;;  %v2992_v8 = vld [vmem:[%s3114_s5] ss:$0 sm:$0xff] }
 0x160   : > { %v801_v31 = vpack.c.bf16 %v785_v60, %v784_v49  ;;  %v1297_v51 = vadd.f32 %v1822_v9, %v1296_v43  ;;  %v1339_v6 = vadd.f32 %v1338_v18, %v785_v60 }
 0x161   : > { %v1277_v25 = vrot.slane %v1276_v50, 4  ;;  %v1319_v38 = vrot.slane %v1318_v28, 4 }
 0x162   : > { %v1298_v62 = vrot.slane %v1297_v51, 4  ;;  %v1340_v1 = vrot.slane %v1339_v6, 4  ;;  %1393 = vst [vmem:[%s2660_s14 + $0x78] sm:$0xff] %v801_v31  ;;  %v880_v4 = vunpack.c.l.b16 %v801_v31  ;;  %v881_v53 = vunpack.c.h.b16 %v801_v31  ;;  %s2179_s14 = scalar_lea.hbm %s2178_s18, 128 }
 0x163   : > { %v1278_v56 = vadd.f32 %v1277_v25, %v1276_v50  ;;  %v1320_v5 = vadd.f32 %v1319_v38, %v1318_v28  ;;  %p2180_p1 = scmp.ne.s32.totalorder %s2178_s18, %s2179_s14  ;;  %p2185_p2 = scmp.lt.s32.totalorder %s2183_s10, %s2179_s14 }
 0x164   : > { %v1299_v10 = vadd.f32 %v1298_v62, %v1297_v51  ;;  %v1341_v44 = vadd.f32 %v1340_v1, %v1339_v6  ;;  %v896_v37 = vpack.c.b16 %v880_v4, %v878_v24  ;;  %v897_v33 = vpack.c.b16 %v881_v53, %v879_v59 }
 0x165   : > { %v1279_v15 = vrot.slane %v1278_v56, 2  ;;  %v1321_v40 = vrot.slane %v1320_v5, 2  ;;  %p2181_p4 = pnand %p2180_p1, %p2442_p0  ;;  %p2186_p9 = por %p2185_p2, %p2184_p7 }
 0x166   : > { %v1300_v39 = vrot.slane %v1299_v10, 2  ;;  %v1342_v20 = vrot.slane %v1341_v44, 2  ;;  %1053 = vmatmul.bf16.gmra.mxu2 %v896_v37  ;;  %1102 = vmatmul.bf16.gmra.mxu3 %v897_v33 }
 0x167   : > { %v1280_v17 = vadd.f32 %v1279_v15, %v1278_v56  ;;  %v1322_v29 = vadd.f32 %v1321_v40, %v1320_v5  ;;  %p2182_p8 = pneg %p2181_p4 }
 0x168   : > { %v1301_v46 = vadd.f32 %v1300_v39, %v1299_v10  ;;  %v1343_v61 = vadd.f32 %v1342_v20, %v1341_v44 }
 0x169   : > { %v1281_v16 = vrot.slane %v1280_v17, 1  ;;  %v1323_v7 = vrot.slane %v1322_v29, 1  ;;  %p2187_p10 = pnand %p2186_p9, %p2182_p8 }
 0x16a   : > { %v1302_v26 = vrot.slane %v1301_v46, 1  ;;  %v1344_v30 = vrot.slane %v1343_v61, 1 }
 0x16b   : > { %v1282_v11 = vadd.f32 %v1281_v16, %v1280_v17  ;;  %v1324_v21 = vadd.f32 %v1323_v7, %v1322_v29 }
 0x16c   : > { %v1303_v35 = vadd.f32 %v1302_v26, %v1301_v46  ;;  %v1345_v52 = vadd.f32 %v1344_v30, %v1343_v61 }
 0x16e   : > { %v1400_v41 = vrot.slane %v1303_v35, 7  ;;  %v1413_v63 = vrot.slane %v1345_v52, 7 }
 0x170   : > { %v1402_v45 = vsel %vm1401_vm0, %v1282_v11, %v1400_v41  ;;  %v1414_v14 = vsel %vm1401_vm0, %v1324_v21, %v1413_v63 }
 0x171   : > { %1823 = vst.msk [vmem:[%s2668_s19 + $0x2] ss:$8 sm:$0x3] %vm1406_vm1, %v1402_v45 }
 0x172   : > { %1824 = vst.msk [vmem:[%s2668_s19 + $0x3] ss:$8 sm:$0x3] %vm1406_vm1, %v1414_v14 }
 0x179   : > { %v1019_v27 = vpop.f32.mrf.mxu2  ;;  %v1068_v42 = vpop.f32.mrf.mxu3 }
 0x17a   : > { %v1020_v32 = vadd.f32 %v2992_v8, %v1019_v27 }
 0x17c   : > { %v1069_v0 = vadd.f32 %v1068_v42, %v1020_v32 }
 0x17e   : > { %v1108_v55 = vsub.f32 %v1069_v0, %v2500_v47 }
 0x180   : > { %v1124_v9 = vmul.f32 %v1108_v55, %v1108_v55 }
 0x181   : > { %v1021_v43 = vpop.f32.mrf.mxu2  ;;  %v1070_v18 = vpop.f32.mrf.mxu3 }
 0x182   : > { %v1022_v49 = vadd.f32 %v2992_v8, %v1021_v43 }
 0x184   : > { %v1071_v50 = vadd.f32 %v1070_v18, %v1022_v49 }
 0x186   : > { %v1109_v28 = vsub.f32 %v1071_v50, %v2503_v48  ;;  %v1909_v60 = vpack.c.bf16 %v1071_v50, %v1069_v0 }
 0x188   : > { %v1125_v31 = vmul.f32 %v1109_v28, %v1109_v28  ;;  %1910 = vst [vmem:[%s3006_s13] sm:$0xff] %v1909_v60  }
 0x189   : > { %v1024_v47 = vpop.f32.mrf.mxu2  ;;  %v1073_v51 = vpop.f32.mrf.mxu3 }
 0x18a   : > { %v1140_v48 = vadd.f32 %v1125_v31, %v1124_v9  ;;  %v1025_v6 = vadd.f32 %v2992_v8, %v1024_v47 }
 0x18b   : > { %2190 = shalt.err (!%p2187_p10)
}
 0x18c   : > { %s2307_s21 = smov 128   ;;  %s2308_s20 = smov 8   ;;  %v1074_v25 = vadd.f32 %v1073_v51, %v1025_v6 }
 0x18d   : > { %1975 = dma.vmem_to_hbm [thread:$0]  (%p2442_p0), %s1461_s25, 2048, %s1463_s26, %s3010_s17, %s2307_s21, %s2307_s21, %s2308_s20  }
 0x18e   : > { %v1110_v38 = vsub.f32 %v1074_v25, %v2518_v2  ;;  %s1870_s25 = sshll.u32 %s2377_s9, 6  ;;  %s1442_s2 = sshll.u32 %s3006_s13, 4  ;;  %s1443_s2 = int_to_ptr.vmem [resolvable:$true] %s1442_s2 }
 0x18f   : > { %s1441_s14 = scalar_lea.hbm %s3115_s6, %s1870_s25  ;;  %s1420_s10 = scalar_lea.sflag [#allocation4], %s2476_s0 }
 0x190   : > { %v1126_v24 = vmul.f32 %v1110_v38, %v1110_v38  ;;  %s1444_s22 = sshll.u32 %s1441_s14, 4  ;;  %s2211_s25 = scalar_lea.hbm %s3115_s6, 256  ;;  %s1445_s22 = int_to_ptr.hbm [resolvable:$true] %s1444_s22 }
 0x191   : > { %v1026_v59 = vpop.f32.mrf.mxu2  ;;  %v1075_v62 = vpop.f32.mrf.mxu3  ;;  %s2205_s11 = sshra.s32 %s1445_s22, 4  ;;  %s2206_s11 = int_to_ptr.hbm [resolvable:$true] %s2205_s11 }
 0x192   : > { %v1141_v1 = vadd.f32 %v1140_v48, %v1126_v24  ;;  %v1027_v4 = vadd.f32 %v2992_v8, %v1026_v59  ;;  %s2207_s16 = scalar_lea.hbm %s2206_s11, 64  ;;  %p2212_p3 = scmp.lt.s32.totalorder %s2206_s11, %s3115_s6 }
 0x193   : > { %p2208_p11 = scmp.ne.s32.totalorder %s2206_s11, %s2207_s16  ;;  %p2213_p5 = scmp.lt.s32.totalorder %s2211_s25, %s2207_s16 }
 0x194   : > { %v1076_v53 = vadd.f32 %v1075_v62, %v1027_v4 }
 0x195   : > { %p2209_p12 = pnand %p2208_p11, %p2442_p0  ;;  %p2214_p1 = por %p2213_p5, %p2212_p3 }
 0x196   : > { %v1111_v56 = vsub.f32 %v1076_v53, %v2521_v3  ;;  %v1914_v5 = vpack.c.bf16 %v1076_v53, %v1074_v25 }
 0x197   : > { %p2210_p13 = pneg %p2209_p12 }
 0x198   : > { %v1127_v10 = vmul.f32 %v1111_v56, %v1111_v56  ;;  %1953 = vst [vmem:[%s3006_s13 + $0x8] sm:$0xff] %v1914_v5  }
 0x199   : > { %v1029_v44 = vpop.f32.mrf.mxu2  ;;  %v1078_v37 = vpop.f32.mrf.mxu3  ;;  %p2215_p4 = pnand %p2214_p1, %p2210_p13 }
 0x19a   : > { %v1142_v33 = vadd.f32 %v1141_v1, %v1127_v10  ;;  %v1030_v15 = vadd.f32 %v2992_v8, %v1029_v44 }
 0x19c   : > { %v1079_v20 = vadd.f32 %v1078_v37, %v1030_v15 }
 0x19e   : > { %v1112_v47 = vsub.f32 %v1079_v20, %v2531_v12 }
 0x1a0   : > { %v1128_v48 = vmul.f32 %v1112_v47, %v1112_v47 }
 0x1a1   : > { %v1031_v40 = vpop.f32.mrf.mxu2  ;;  %v1080_v2 = vpop.f32.mrf.mxu3 }
 0x1a2   : > { %v1032_v39 = vadd.f32 %v2992_v8, %v1031_v40  ;;  %v1143_v4 = vadd.f32 %v1142_v33, %v1128_v48 }
 0x1a4   : > { %v1081_v17 = vadd.f32 %v1080_v2, %v1032_v39 }
 0x1a6   : > { %v1919_v29 = vpack.c.bf16 %v1081_v17, %v1079_v20  ;;  %v1113_v51 = vsub.f32 %v1081_v17, %v2534_v13 }
 0x1a8   : > { %1954 = vst [vmem:[%s3006_s13 + $0x10] sm:$0xff] %v1919_v29   ;;  %v1129_v59 = vmul.f32 %v1113_v51, %v1113_v51 }
 0x1a9   : > { %v1034_v46 = vpop.f32.mrf.mxu2  ;;  %v1083_v61 = vpop.f32.mrf.mxu3 }
 0x1aa   : > { %v1035_v3 = vadd.f32 %v2992_v8, %v1034_v46  ;;  %v1144_v13 = vadd.f32 %v1143_v4, %v1129_v59 }
 0x1ac   : > { %v1084_v26 = vadd.f32 %v1083_v61, %v1035_v3 }
 0x1ae   : > { %v1114_v6 = vsub.f32 %v1084_v26, %v2544_v22 }
 0x1b0   : > { %v1130_v53 = vmul.f32 %v1114_v6, %v1114_v6 }
 0x1b1   : > { %v1036_v54 = vpop.f32.mrf.mxu2  ;;  %v1085_v16 = vpop.f32.mrf.mxu3 }
 0x1b2   : > { %v1037_v7 = vadd.f32 %v2992_v8, %v1036_v54  ;;  %v1145_v37 = vadd.f32 %v1144_v13, %v1130_v53  ;;  %v3183_v54 = vld [vmem:[#allocation19_spill] sm:$0xff] }
 0x1b4   : > { %v1086_v30 = vadd.f32 %v1085_v16, %v1037_v7 }
 0x1b6   : > { %v1924_v35 = vpack.c.bf16 %v1086_v30, %v1084_v26  ;;  %v1115_v62 = vsub.f32 %v1086_v30, %v2547_v23 }
 0x1b8   : > { %1955 = vst [vmem:[%s3006_s13 + $0x18] sm:$0xff] %v1924_v35   ;;  %v1131_v10 = vmul.f32 %v1115_v62, %v1115_v62 }
 0x1b9   : > { %v1039_v52 = vpop.f32.mrf.mxu2  ;;  %v1088_v11 = vpop.f32.mrf.mxu3 }
 0x1ba   : > { %v1040_v21 = vadd.f32 %v2992_v8, %v1039_v52  ;;  %v1146_v39 = vadd.f32 %v1145_v37, %v1131_v10 }
 0x1bc   : > { %v1089_v14 = vadd.f32 %v1088_v11, %v1040_v21 }
 0x1be   : > { %v1116_v56 = vsub.f32 %v1089_v14, %v2561_v34 }
 0x1c0   : > { %v1132_v15 = vmul.f32 %v1116_v56, %v1116_v56 }
 0x1c1   : > { %v1041_v41 = vpop.f32.mrf.mxu2  ;;  %v1090_v63 = vpop.f32.mrf.mxu3 }
 0x1c2   : > { %v1042_v45 = vadd.f32 %v2992_v8, %v1041_v41  ;;  %v1147_v17 = vadd.f32 %v1146_v39, %v1132_v15 }
 0x1c4   : > { %v1091_v27 = vadd.f32 %v1090_v63, %v1042_v45 }
 0x1c6   : > { %v1929_v42 = vpack.c.bf16 %v1091_v27, %v1089_v14  ;;  %v1117_v22 = vsub.f32 %v1091_v27, %v2564_v36  ;;  %v3185_v14 = vld [vmem:[#allocation21_spill] sm:$0xff] }
 0x1c8   : > { %1956 = vst [vmem:[%s3006_s13 + $0x20] sm:$0xff] %v1929_v42   ;;  %v1133_v33 = vmul.f32 %v1117_v22, %v1117_v22 }
 0x1c9   : > { %v1044_v32 = vpop.f32.mrf.mxu2  ;;  %v1093_v0 = vpop.f32.mrf.mxu3 }
 0x1ca   : > { %v1045_v43 = vadd.f32 %v2992_v8, %v1044_v32  ;;  %v1148_v61 = vadd.f32 %v1147_v17, %v1133_v33 }
 0x1cc   : > { %v1094_v50 = vadd.f32 %v1093_v0, %v1045_v43 }
 0x1ce   : > { %v1118_v40 = vsub.f32 %v1094_v50, %v2582_v57 }
 0x1d0   : > { %v1134_v29 = vmul.f32 %v1118_v40, %v1118_v40 }
 0x1d1   : > { %v1046_v18 = vpop.f32.mrf.mxu2  ;;  %v1095_v49 = vpop.f32.mrf.mxu3 }
 0x1d2   : > { %v1047_v55 = vadd.f32 %v2992_v8, %v1046_v18  ;;  %v1149_v16 = vadd.f32 %v1148_v61, %v1134_v29 }
 0x1d4   : > { %v1096_v28 = vadd.f32 %v1095_v49, %v1047_v55 }
 0x1d6   : > { %v1934_v60 = vpack.c.bf16 %v1096_v28, %v1094_v50  ;;  %v1119_v20 = vsub.f32 %v1096_v28, %v2585_v58  ;;  %v3184_v58 = vld [vmem:[#allocation20_spill] sm:$0xff] }
 0x1d8   : > { %1957 = vst [vmem:[%s3006_s13 + $0x28] sm:$0xff] %v1934_v60   ;;  %v1135_v3 = vmul.f32 %v1119_v20, %v1119_v20 }
 0x1d9   : > { %v1049_v9 = vpop.f32.mrf.mxu2  ;;  %v1098_v31 = vpop.f32.mrf.mxu3 }
 0x1da   : > { %v1050_v25 = vadd.f32 %v2992_v8, %v1049_v9  ;;  %v1150_v35 = vadd.f32 %v1149_v16, %v1135_v3 }
 0x1dc   : > { %v1099_v12 = vadd.f32 %v1098_v31, %v1050_v25 }
 0x1de   : > { %v1120_v36 = vsub.f32 %v1099_v12, %v2603_v19 }
 0x1e0   : > { %v1136_v7 = vmul.f32 %v1120_v36, %v1120_v36 }
 0x1e1   : > { %v1051_v38 = vpop.f32.mrf.mxu2  ;;  %v1100_v24 = vpop.f32.mrf.mxu3 }
 0x1e2   : > { %v1052_v1 = vadd.f32 %v2992_v8, %v1051_v38  ;;  %v1151_v21 = vadd.f32 %v1150_v35, %v1136_v7 }
 0x1e4   : > { %v1101_v5 = vadd.f32 %v1100_v24, %v1052_v1 }
 0x1e6   : > { %v1939_v44 = vpack.c.bf16 %v1101_v5, %v1099_v12  ;;  %v1121_v57 = vsub.f32 %v1101_v5, %v3183_v54 }
 0x1e8   : > { %1958 = vst [vmem:[%s3006_s13 + $0x30] sm:$0xff] %v1939_v44   ;;  %v1137_v52 = vmul.f32 %v1121_v57, %v1121_v57 }
 0x1e9   : > { %v1054_v23 = vpop.f32.mrf.mxu2  ;;  %v1103_v2 = vpop.f32.mrf.mxu3 }
 0x1ea   : > { %v1055_v34 = vadd.f32 %v2992_v8, %v1054_v23  ;;  %v1152_v45 = vadd.f32 %v1151_v21, %v1137_v52 }
 0x1ec   : > { %v1104_v46 = vadd.f32 %v1103_v2, %v1055_v34 }
 0x1ee   : > { %v1122_v26 = vsub.f32 %v1104_v46, %v3184_v58 }
 0x1f0   : > { %v1138_v41 = vmul.f32 %v1122_v26, %v1122_v26 }
 0x1f1   : > { %v1056_v30 = vpop.f32.mrf.mxu2  ;;  %v1105_v11 = vpop.f32.mrf.mxu3 }
 0x1f2   : > { %v1057_v19 = vadd.f32 %v2992_v8, %v1056_v30  ;;  %v1153_v32 = vadd.f32 %v1152_v45, %v1138_v41 }
 0x1f4   : > { %v1106_v63 = vadd.f32 %v1105_v11, %v1057_v19 }
 0x1f6   : > { %v1123_v27 = vsub.f32 %v1106_v63, %v3185_v14  ;;  %v1944_v42 = vpack.c.bf16 %v1106_v63, %v1104_v46 }
 0x1f8   : > { %v1139_v0 = vmul.f32 %v1123_v27, %v1123_v27  ;;  %1959 = vst [vmem:[%s3006_s13 + $0x38] sm:$0xff] %v1944_v42  }
 0x1f9   : > { %2218 = shalt.err (!%p2215_p4)
}
 0x1fa   : > { %s2309_s0 = smov 64   ;;  %s2310_s13 = smov 4   ;;  %v1154_v8 = vadd.f32 %v1153_v32, %v1139_v0 }
 0x1fb   : > { %1974 = dma.vmem_to_hbm [thread:$0]  (%p2442_p0), %s1443_s2, 1024, %s1445_s22, %s1420_s10, %s2309_s0, %s2309_s0, %s2310_s13  }
 0x1fc   : > { %v1155_v43 = vrot.slane %v1154_v8, 4  ;;  %s1873_s14 = sshll.u32 %s2377_s9, 4  ;;  %s1478_s20 = sshll.u32 %s2668_s19, 4  ;;  %s1479_s20 = int_to_ptr.vmem [resolvable:$true] %s1478_s20 }
 0x1fd   : > { %s1476_s16 = scalar_lea.hbm %s3117_s8, %s1873_s14  ;;  %s2239_s10 = scalar_lea.hbm %s3117_s8, 64 }
 0x1fe   : > { %v1156_v18 = vadd.f32 %v1155_v43, %v1154_v8  ;;  %s1480_s25 = sshll.u32 %s1476_s16, 4  ;;  %s1481_s25 = int_to_ptr.hbm [resolvable:$true] %s1480_s25 }
 0x1ff   : > { %s2233_s26 = sshra.s32 %s1481_s25, 4  ;;  %s2234_s26 = int_to_ptr.hbm [resolvable:$true] %s2233_s26 }
 0x200   : > { %v1157_v49 = vrot.slane %v1156_v18, 2  ;;  %s2235_s2 = scalar_lea.hbm %s2234_s26, 16  ;;  %p2240_p9 = scmp.lt.s32.totalorder %s2234_s26, %s3117_s8 }
 0x201   : > { %p2236_p8 = scmp.ne.s32.totalorder %s2234_s26, %s2235_s2  ;;  %p2241_p10 = scmp.lt.s32.totalorder %s2239_s10, %s2235_s2 }
 0x202   : > { %v1158_v55 = vadd.f32 %v1157_v49, %v1156_v18 }
 0x203   : > { %p2237_p7 = pnand %p2236_p8, %p2442_p0  ;;  %p2242_p11 = por %p2241_p10, %p2240_p9 }
 0x204   : > { %v1159_v50 = vrot.slane %v1158_v55, 1 }
 0x205   : > { %p2238_p2 = pneg %p2237_p7 }
 0x206   : > { %v1160_v28 = vadd.f32 %v1159_v50, %v1158_v55 }
 0x207   : > { %p2243_p12 = pnand %p2242_p11, %p2238_p2 }
 0x208   : > { %1396 = vst [vmem:[%s2668_s19] sm:$0x1] %v1160_v28 }
 0x209   : > { %2246 = shalt.err (!%p2243_p12)
}
 0x20a   : > { %1976 = dma.vmem_to_hbm [thread:$0]  (%p2442_p0), %s1479_s20, 256, %s1481_s25, %s3010_s17  }
 0x20b PF: > { %p2011_p13 = scmp.ge.s32.totalorder %s2297_s30, 2  ;;  %s1492_s19 = sand.u32 1, %s2285_s27  }
 0x20c   : > { %s1493_s13 = scalar_lea.sflag [#allocation4], %s1492_s19 }
 0x20d   : > { %p1995_p3 = pnand %p2011_p13, %p2393_p6 }
 0x20f   : > { %p1996_p5 = pneg %p1995_p3 }
 0x211   : > { %2276 = dma.done.wait (%p1996_p5), %s1493_s13, 1024  }
 0x212   : > { %2278 = vsyncadd (%p1996_p5), %s1493_s13, 4294966272  ;;  %s3186_s14 = sadd.s32 4294967294, %s2297_s30  }
 0x213   : > { %s1502_s21 = sand.u32 1, %s3186_s14  }
 0x214   : > { %s1503_s11 = scalar_lea.sflag [#allocation12], %s1502_s21 }
 0x215   : > { %2280 = dma.done.wait (%p1996_p5), %s1503_s11, 2304  }
 0x216   : > { %2282 = vsyncadd (%p1996_p5), %s1503_s11, 4294964992  ;;  %p27_p0 = scmp.ge.s32.totalorder %s2429_s15, 6   ;;  %s3187_s27 = smov %s2289_s28 }
 0x217   : > { %s3188_s28 = smov %s2293_s29  ;;  %s3189_s29 = smov %s2438_s23 }
 0x218   : > { %s3190_s30 = smov %s2429_s15  ;;  %29 = sbr.rel (!%p27_p0) target bundleno = 12 (0xc), region = 136 }
 0x21d   :  { %1519 = vsyncpa [#allocation3], 1 }
 0x21e   :  { %1521 = vsyncpa [#allocation3 + $0x1], 1 }
 0x21f   :  { %1522 = vsyncpa [#allocation8], 1 }
 0x220   :  { %1523 = vsyncpa [#allocation4], 1 }
 0x221   :  { %1525 = vsyncpa [#allocation4 + $0x1], 1 }
 0x222   :  { %1526 = vsyncpa [#allocation12], 1 }
 0x223   :  { %1528 = vsyncpa [#allocation12 + $0x1], 1 }
 0x224   :  { %1529 = vsyncpa [#allocation5], 1 }
 0x225   :  { %1531 = vsyncpa [#allocation5 + $0x1], 1 }

// kernel: tpu_custom_call.1
= control target key start
LH: loop header
LB: loop body
LE: loop exit
PB: predicated region body
PF: predicated region fallthrough
CT: control target
= control target key end

     0   :  { %s3109_s0 = inlined_call_operand.hbm [shape: f32[2], index: 0, kind: input, shape index: {}]   ;;  %s3110_s1 = inlined_call_operand.hbm [shape: bf16[512,128], index: 1, kind: input, shape index: {}]   ;;  %s3111_s2 = inlined_call_operand.hbm [shape: bf16[128,256], index: 2, kind: input, shape index: {}]   ;;  %s3112_s3 = inlined_call_operand.hbm [shape: bf16[256,128], index: 3, kind: input, shape index: {}]   ;;  %s3113_s4 = inlined_call_operand.vmem [shape: f32[1,256], index: 4, kind: input, shape index: {}]   ;;  %s3114_s5 = inlined_call_operand.vmem [shape: f32[1,128], index: 5, kind: input, shape index: {}]   ;;  %s3115_s6 = inlined_call_operand.hbm [shape: bf16[512,128], index: 6, kind: output, shape index: {0}]   ;;  %s3116_s7 = inlined_call_operand.hbm [shape: bf16[512,256], index: 7, kind: output, shape index: {1}]   ;;  %s3117_s8 = inlined_call_operand.hbm [shape: f32[4,8,256], index: 8, kind: output, shape index: {2}]  }
   0x1   :  { %3124 = sst [smem:[#allocation22_spill]] %s3109_s0 }
   0x2   :  { %3125 = sst [smem:[#allocation23_spill]] %s3111_s2 }
   0x3   :  { %14 = vsyncpa [#allocation5], 0 }
   0x4   :  { %15 = vsyncpa [#allocation3], 0 }
   0x5   :  { %17 = vsyncpa [#allocation3 + $0x1], 0 }
   0x6   :  { %18 = vsyncpa [#allocation8], 0 }
   0x7   :  { %19 = vsyncpa [#allocation4], 0 }
   0x8   :  { %21 = vsyncpa [#allocation4 + $0x1], 0 }
   0x9   :  { %22 = vsyncpa [#allocation12], 0 }
   0xa   :  { %24 = vsyncpa [#allocation12 + $0x1], 0  ;;  %s2356_s27 = smov 0   ;;  %s2358_s28 = smov 0  }
   0xb   :  { %s2360_s29 = smov 0   ;;  %s2362_s30 = smov 0  }
   0xc LB: > { %s2377_s9 = sadd.s32 4294967295, %s2297_s30   ;;  %s3118_s10 = sadd.s32 4294967294, %s2297_s30   ;;  %s2297_s30 = sphi %s2362_s30, %s3190_s30   ;;  %s2293_s29 = sphi %s2360_s29, %s3189_s29   ;;  %s2289_s28 = sphi %s2358_s28, %s3188_s28   ;;  %s2285_s27 = sphi %s2356_s27, %s3187_s27  }
   0xd   : > { %p71_p0 = scmp.ne.s32.totalorder %s2289_s28, %s2285_s27  ;;  %p72_p1 = scmp.eq.s32.totalorder %s2377_s9, 0 }
   0xe   : > { %p179_p2 = scmp.eq.s32.totalorder %s2377_s9, 3  ;;  %p185_p3 = scmp.eq.s32.totalorder %s3118_s10, 3 }
   0xf   : > { %p2388_p4 = por %p72_p1, %p71_p0  ;;  %p1646_p5 = scmp.ge.s32.totalorder %s2297_s30, 1 }
  0x10   : > { %p2393_p6 = por %p185_p3, %p71_p0  ;;  %p244_p7 = scmp.lt.s32.totalorder %s2297_s30, 5 }
  0x11   : > { %s3128_s2 = sld [smem:[#allocation23_spill]]  ;;  %s2299_s17 = smov [#allocation7]  }
  0x12   : > { %p2401_p8 = pnand %p1646_p5, %p244_p7  ;;  %s267_s18 = sshll.u32 %s2299_s17, 4  ;;  %s268_s18 = int_to_ptr.vmem [resolvable:$true] %s267_s18 }
  0x13   : > { %s3131_s0 = sld [smem:[#allocation22_spill]]  ;;  %s2300_s23 = smov 128  }
  0x14   : > { %p1980_p9 = pneg %p2401_p8  ;;  %s2301_s24 = smov 8  }
  0x15   : > { %s2302_s25 = smov [#allocation2]   ;;  %s279_s14 = sshll.u32 %s3112_s3, 4  ;;  %s280_s14 = int_to_ptr.hbm [resolvable:$true] %s279_s14 }
  0x16   : > { %p2409_p10 = pnand %p1980_p9, %p72_p1  ;;  %s2303_s17 = smov [#allocation9]  }
  0x17   : > { %s265_s15 = sshll.u32 %s3128_s2, 4  ;;  %s281_s20 = sshll.u32 %s2303_s17, 4  ;;  %s266_s15 = int_to_ptr.hbm [resolvable:$true] %s265_s15  ;;  %s282_s20 = int_to_ptr.vmem [resolvable:$true] %s281_s20 }
  0x18   : > { %1986 = dma.hbm_to_vmem [thread:$0]  (!%p2409_p10), %s266_s15, 2048, %s268_s18, [#allocation8], %s2300_s23, %s2300_s23, %s2301_s24  }
  0x19   : > { %s256_s22 = sshll.u32 %s3131_s0, 4  ;;  %s3119_s21 = smov 64   ;;  %s257_s22 = int_to_ptr.hbm [resolvable:$true] %s256_s22 }
  0x1a   : > { %1983 = dma.hbm_to_smem (!%p2409_p10), %s257_s22, 16, %s2302_s25, [#allocation5]  }
  0x1b   : > { %s3120_s10 = smov 4   ;;  %s2429_s15 = sadd.s32 1, %s2297_s30  }
  0x1c   : > { %1989 = dma.hbm_to_vmem [thread:$0]  (!%p2409_p10), %s280_s14, 2048, %s282_s20, [#allocation8], %s3119_s21, %s3119_s21, %s3120_s10  }
  0x1d   : > { %s55_s18 = ssub.s32 %s2297_s30, %s2429_s15  ;;  %s58_s22 = sadd.s32 1, %s2293_s29 }
  0x1e   : > { %p56_p11 = scmp.eq.s32.totalorder %s55_s18, 0  ;;  %p65_p12 = scmp.ne.s32.totalorder %s2293_s29, %s2289_s28 }
  0x1f   : > { %p66_p13 = scmp.eq.s32.totalorder %s2297_s30, 0  ;;  %p2007_p3 = scmp.lt.s32.totalorder %s2297_s30, 4 }
  0x20   : > { %s2438_s23 = scalar_select %p56_p11, %s2293_s29, %s58_s22  }
  0x21   : > { %p2442_p0 = por %p179_p2, %p65_p12  ;;  %s301_s19 = sand.u32 1, %s2293_s29  }
  0x22   : > { %s1837_s25 = sshll.u32 %s2297_s30, 6  ;;  %p67_p5 = por %p66_p13, %p65_p12 }
  0x23   : > { %s1651_s26 = sshll.u32 %s301_s19, 6  ;;  %s310_s17 = scalar_lea.hbm %s3110_s1, %s1837_s25 }
  0x24   : > { %s311_s20 = sshll.u32 %s310_s17, 4  ;;  %s305_s18 = scalar_lea.vmem [#allocation6], %s1651_s26  ;;  %s312_s20 = int_to_ptr.hbm [resolvable:$true] %s311_s20 }
  0x25   : > { %s313_s21 = sshll.u32 %s305_s18, 4  ;;  %p2452_p7 = pnand %p2007_p3, %p67_p5  ;;  %s314_s21 = int_to_ptr.vmem [resolvable:$true] %s313_s21 }
  0x26   : > { %s302_s10 = scalar_lea.sflag [#allocation3], %s301_s19  ;;  %s2133_s0 = sshra.s32 %s312_s20, 4  ;;  %s2134_s0 = int_to_ptr.hbm [resolvable:$true] %s2133_s0 }
  0x27   : > { %s2135_s2 = scalar_lea.hbm %s2134_s0, 64  ;;  %p2137_p9 = pneg %p2452_p7 }
  0x28   : > { %p2136_p2 = scmp.ne.s32.totalorder %s2134_s0, %s2135_s2  ;;  %s2140_s26 = scalar_lea.hbm %s3110_s1, 256 }
  0x29   : > { %p2141_p12 = scmp.lt.s32.totalorder %s2134_s0, %s3110_s1  ;;  %p2142_p13 = scmp.lt.s32.totalorder %s2140_s26, %s2135_s2 }
  0x2a   : > { %p2138_p10 = pnand %p2137_p9, %p2136_p2 }
  0x2b   : > { %p2143_p3 = por %p2142_p13, %p2141_p12 }
  0x2c   : > { %p2139_p11 = pneg %p2138_p10 }
  0x2e   : > { %p2144_p5 = pnand %p2143_p3, %p2139_p11 }
  0x30   : > { %2147 = shalt.err (!%p2144_p5)
}
  0x31   : > { %s3134_s19 = smov 4   ;;  %s3135_s18 = smov 64  }
  0x32   : > { %1993 = dma.hbm_to_vmem [thread:$0]  (!%p2452_p7), %s312_s20, 1024, %s314_s21, %s302_s10, %s3135_s18, %s3135_s18, %s3134_s19  }
  0x33   : > { %325 = sbr.rel (%p2401_p8) target bundleno = 523 (0x20b), region = 44 }
  0x38   : > { %2264 = dma.done.wait (%p72_p1), [#allocation5], 16  }
  0x39   : > { %2266 = vsyncadd (%p72_p1), [#allocation5], 4294967280  ;;  %s2476_s0 = sand.u32 1, %s2289_s28  }
  0x3a   : > { %s1656_s2 = sshll.u32 %s2476_s0, 6  ;;  %s333_s22 = scalar_lea.sflag [#allocation3], %s2476_s0 }
  0x3b   : > { %s2482_s10 = scalar_lea.vmem [#allocation6], %s1656_s2 }
  0x3c   : > { %2268 = dma.done.wait (%p2388_p4), %s333_s22, 1024  }
  0x3d   : > { %2270 = vsyncadd (%p2388_p4), %s333_s22, 4294966272 }
  0x3e   : > { %2272 = dma.done.wait (%p72_p1), [#allocation8], 4096  }
  0x3f   : > { %2274 = vsyncadd (%p72_p1), [#allocation8], 4294963200 }
  0x40   : > { %352 = sfence }
  0x41   : > { %v1721_v0 = vld [vmem:[#allocation7 + $0x70] sm:$0xf]  ;;  %v1853_v1 = vld [vmem:[#allocation7 + $0x74] sm:$0xf0]  ;;  %v1852_v2 = vld [vmem:[#allocation7 + $0x74] sm:$0xf] }
  0x42   : > { %v1722_v3 = vor.u32 %v1853_v1, %v1721_v0  ;;  %v1723_v4 = vld [vmem:[#allocation7 + $0x78] sm:$0xf0]  ;;  %v1713_v5 = vld [vmem:[#allocation7 + $0x60] sm:$0xf]  ;;  %v1851_v6 = vld [vmem:[#allocation7 + $0x64] sm:$0xf0] }
  0x43   : > { %v1726_v7 = vor.u32 %v1852_v2, %v1723_v4  ;;  %v1850_v8 = vld [vmem:[#allocation7 + $0x64] sm:$0xf]  ;;  %v1715_v9 = vld [vmem:[#allocation7 + $0x68] sm:$0xf0]  ;;  %v1714_v10 = vor.u32 %v1851_v6, %v1713_v5  ;;  %v1705_v12 = vld [vmem:[#allocation7 + $0x50] sm:$0xf] }
  0x44   : > { %592 = vmatpush.bf16.msra.mxu0 %v1722_v3  ;;  %v1718_v11 = vor.u32 %v1850_v8, %v1715_v9  ;;  %v1849_v13 = vld [vmem:[#allocation7 + $0x54] sm:$0xf0]  ;;  %v1848_v14 = vld [vmem:[#allocation7 + $0x54] sm:$0xf]  ;;  %v1707_v15 = vld [vmem:[#allocation7 + $0x58] sm:$0xf0] }
  0x45   : > { %641 = vmatpush.bf16.msra.mxu1 %v1726_v7  ;;  %v1706_v16 = vor.u32 %v1849_v13, %v1705_v12  ;;  %v1710_v17 = vor.u32 %v1848_v14, %v1707_v15  ;;  %v1697_v18 = vld [vmem:[#allocation7 + $0x40] sm:$0xf]  ;;  %v1847_v19 = vld [vmem:[#allocation7 + $0x44] sm:$0xf0]  ;;  %v1846_v20 = vld [vmem:[#allocation7 + $0x44] sm:$0xf] }
  0x46   : > { %v1699_v21 = vld [vmem:[#allocation7 + $0x48] sm:$0xf0]  ;;  %s394_s11 = sld [smem:[#allocation2]]  ;;  %v1698_v22 = vor.u32 %v1847_v19, %v1697_v18  ;;  %v1875_v23 = vld [vmem:[%s2482_s10] sm:$0xff]   ;;  %v1689_v25 = vld [vmem:[#allocation7 + $0x30] sm:$0xf] }
  0x47   : > { %s1662_s16 = sld [smem:[#allocation2 + $0x1]]  ;;  %v1702_v24 = vor.u32 %v1846_v20, %v1699_v21  ;;  %v1845_v26 = vld [vmem:[#allocation7 + $0x34] sm:$0xf0]  ;;  %v1844_v27 = vld [vmem:[#allocation7 + $0x34] sm:$0xf]  ;;  %v1876_v29 = vunpack.c.l.bf16 %v1875_v23  ;;  %v1877_v30 = vunpack.c.h.bf16 %v1875_v23  ;;  %v1946_v59 = vld [vmem:[%s2482_s10 + $0x8] sm:$0xff]  }
  0x48   : > { %593 = vmatpush.bf16.msra.mxu0 %v1714_v10  ;;  %v1691_v28 = vld [vmem:[#allocation7 + $0x38] sm:$0xf0]  ;;  %v1690_v31 = vor.u32 %v1845_v26, %v1689_v25  ;;  %v1681_v33 = vld [vmem:[#allocation7 + $0x20] sm:$0xf]  ;;  %v1843_v34 = vld [vmem:[#allocation7 + $0x24] sm:$0xf0]  ;;  %v1880_v62 = vunpack.c.l.bf16 %v1946_v59  ;;  %v1881_v63 = vunpack.c.h.bf16 %v1946_v59 }
  0x49   : > { %642 = vmatpush.bf16.msra.mxu1 %v1718_v11  ;;  %v1694_v32 = vor.u32 %v1844_v27, %v1691_v28  ;;  %v1842_v36 = vld [vmem:[#allocation7 + $0x24] sm:$0xf]  ;;  %v1683_v37 = vld [vmem:[#allocation7 + $0x28] sm:$0xf0]  ;;  %v1682_v40 = vor.u32 %v1843_v34, %v1681_v33  ;;  %v1673_v43 = vld [vmem:[#allocation7 + $0x10] sm:$0xf] }
  0x4a   : > { %v1686_v42 = vor.u32 %v1842_v36, %v1683_v37  ;;  %v1841_v44 = vld [vmem:[#allocation7 + $0x14] sm:$0xf0]  ;;  %v1840_v45 = vld [vmem:[#allocation7 + $0x14] sm:$0xf]  ;;  %v1675_v46 = vld [vmem:[#allocation7 + $0x18] sm:$0xf0] }
  0x4b   : > { %v2508_v49 = vld [vmem:[%s3114_s5] ss:$0 sm:$0xff]  ;;  %v1674_v50 = vor.u32 %v1841_v44, %v1673_v43  ;;  %v1678_v51 = vor.u32 %v1840_v45, %v1675_v46  ;;  %v1665_v52 = vld [vmem:[#allocation7] sm:$0xf]  ;;  %v1839_v53 = vld [vmem:[#allocation7 + $0x4] sm:$0xf0] }
  0x4c   : > { %594 = vmatpush.bf16.msra.mxu0 %v1706_v16  ;;  %v2493_v35 = vstv %s394_s11  ;;  %v1838_v54 = vld [vmem:[#allocation7 + $0x4] sm:$0xf]  ;;  %v1667_v55 = vld [vmem:[#allocation7 + $0x8] sm:$0xf0]  ;;  %v1666_v58 = vor.u32 %v1839_v53, %v1665_v52  ;;  %v1947_v6 = vld [vmem:[%s2482_s10 + $0x10] sm:$0xff]   ;;  %s1660_s26 = sshll.u32 %s2476_s0, 7 }
  0x4d   : > { %643 = vmatpush.bf16.msra.mxu1 %v1710_v17  ;;  %v429_v38 = vsub.f32 %v1876_v29, %v2493_v35  ;;  %v430_v39 = vsub.f32 %v1877_v30, %v2493_v35  ;;  %v2497_v41 = vstv %s1662_s16  ;;  %v1670_v60 = vor.u32 %v1838_v54, %v1667_v55  ;;  %v1948_v16 = vld [vmem:[%s2482_s10 + $0x18] sm:$0xff]   ;;  %v1949_v26 = vld [vmem:[%s2482_s10 + $0x20] sm:$0xff]   ;;  %s2660_s14 = scalar_lea.vmem [#allocation11], %s1660_s26  ;;  %s1661_s17 = sshll.u32 %s2476_s0, 4 }
  0x4e   : > { %v431_v0 = vsub.f32 %v1880_v62, %v2493_v35  ;;  %v432_v1 = vsub.f32 %v1881_v63, %v2493_v35  ;;  %v1884_v8 = vunpack.c.l.bf16 %v1947_v6  ;;  %v1885_v9 = vunpack.c.h.bf16 %v1947_v6  ;;  %v1951_v63 = vld [vmem:[%s2482_s10 + $0x30] sm:$0xff]   ;;  %s2668_s19 = scalar_lea.vmem [#allocation13], %s1661_s17  ;;  %s1424_s20 = sand.u32 1, %s2377_s9  }
  0x4f   : > { %v2500_v47 = vmul.f32 %v2497_v41, %v429_v38  ;;  %v2503_v48 = vmul.f32 %v2497_v41, %v430_v39  ;;  %v1888_v18 = vunpack.c.l.bf16 %v1948_v16  ;;  %v1889_v19 = vunpack.c.h.bf16 %v1948_v16  ;;  %s1460_s25 = sshll.u32 %s2660_s14, 4  ;;  %s3006_s13 = scalar_lea.vmem [#allocation10], %s1656_s2  ;;  %s1461_s25 = int_to_ptr.vmem [resolvable:$true] %s1460_s25 }
  0x50   : > { %595 = vmatpush.bf16.msra.mxu0 %v1698_v22  ;;  %v2518_v2 = vmul.f32 %v2497_v41, %v431_v0  ;;  %v2521_v3 = vmul.f32 %v2497_v41, %v432_v1  ;;  %v433_v10 = vsub.f32 %v1884_v8, %v2493_v35  ;;  %v434_v11 = vsub.f32 %v1885_v9, %v2493_v35  ;;  %s3010_s17 = scalar_lea.sflag [#allocation12], %s1424_s20 }
  0x51   : > { %644 = vmatpush.bf16.msra.mxu1 %v1702_v24  ;;  %v467_v56 = vsub.f32 %v2500_v47, %v2508_v49  ;;  %v468_v57 = vsub.f32 %v2503_v48, %v2508_v49  ;;  %v435_v20 = vsub.f32 %v1888_v18, %v2493_v35  ;;  %v436_v21 = vsub.f32 %v1889_v19, %v2493_v35  ;;  %v1868_v18 = vld [vmem:[#allocation9 + $0x70] sm:$0xff] }
  0x52   : > { %v469_v4 = vsub.f32 %v2518_v2, %v2508_v49  ;;  %v470_v5 = vsub.f32 %v2521_v3, %v2508_v49  ;;  %v2531_v12 = vmul.f32 %v2497_v41, %v433_v10  ;;  %v2534_v13 = vmul.f32 %v2497_v41, %v434_v11  ;;  %v1861_v11 = vld [vmem:[#allocation9 + $0x38] sm:$0xff] }
  0x53   : > { %v483_v61 = vpack.c.bf16 %v468_v57, %v467_v56  ;;  %v2544_v22 = vmul.f32 %v2497_v41, %v435_v20  ;;  %v2547_v23 = vmul.f32 %v2497_v41, %v436_v21  ;;  %v1892_v28 = vunpack.c.l.bf16 %v1949_v26  ;;  %1010 = vmatpush.bf16.msra.mxu2 %v1861_v11 }
  0x54   : > { %596 = vmatpush.bf16.msra.mxu0 %v1690_v31  ;;  %v484_v7 = vpack.c.bf16 %v470_v5, %v469_v4  ;;  %v471_v14 = vsub.f32 %v2531_v12, %v2508_v49  ;;  %v472_v15 = vsub.f32 %v2534_v13, %v2508_v49  ;;  %v1893_v29 = vunpack.c.h.bf16 %v1949_v26  ;;  %v1867_v26 = vld [vmem:[#allocation9 + $0x68] sm:$0xff] }
  0x55   : > { %645 = vmatpush.bf16.msra.mxu1 %v1694_v32  ;;  %v473_v24 = vsub.f32 %v2544_v22, %v2508_v49  ;;  %v474_v25 = vsub.f32 %v2547_v23, %v2508_v49  ;;  %v437_v30 = vsub.f32 %v1892_v28, %v2493_v35  ;;  %v1161_v32 = vmul.f32 %v2500_v47, %v2500_v47 }
  0x56   : > { %v485_v17 = vpack.c.bf16 %v472_v15, %v471_v14  ;;  %v438_v31 = vsub.f32 %v1893_v29, %v2493_v35  ;;  %v1162_v33 = vmul.f32 %v2503_v48, %v2503_v48  ;;  %v1163_v38 = vmul.f32 %v2518_v2, %v2518_v2  ;;  %v1869_v14 = vld [vmem:[#allocation9 + $0x78] sm:$0xff] }
  0x57   : > { %v486_v27 = vpack.c.bf16 %v474_v25, %v473_v24  ;;  %v2561_v34 = vmul.f32 %v2497_v41, %v437_v30  ;;  %v1164_v43 = vmul.f32 %v2521_v3, %v2521_v3  ;;  %v1165_v52 = vmul.f32 %v2531_v12, %v2531_v12  ;;  %1059 = vmatpush.bf16.msra.mxu3 %v1869_v14  ;;  %v1859_v25 = vld [vmem:[#allocation9 + $0x28] sm:$0xff]  ;;  %v1952_v29 = vld [vmem:[%s2482_s10 + $0x38] sm:$0xff]  }
  0x58   : > { %597 = vmatpush.bf16.msra.mxu0 %v1682_v40  ;;  %v2564_v36 = vmul.f32 %v2497_v41, %v438_v31  ;;  %v1177_v37 = vadd.f32 %v1162_v33, %v1161_v32  ;;  %v1166_v55 = vmul.f32 %v2534_v13, %v2534_v13  ;;  %v1168_v0 = vmul.f32 %v2547_v23, %v2547_v23 }
  0x59   : > { %646 = vmatpush.bf16.msra.mxu1 %v1686_v42  ;;  %v475_v39 = vsub.f32 %v2561_v34, %v2508_v49  ;;  %v1950_v42 = vld [vmem:[%s2482_s10 + $0x28] sm:$0xff]   ;;  %v1900_v5 = vunpack.c.l.bf16 %v1951_v63  ;;  %v1901_v6 = vunpack.c.h.bf16 %v1951_v63  ;;  %v1169_v8 = vmul.f32 %v2561_v34, %v2561_v34  ;;  %s1872_s10 = sshll.u32 %s2377_s9, 7 }
  0x5a   : > { %v476_v40 = vsub.f32 %v2564_v36, %v2508_v49  ;;  %v1178_v44 = vadd.f32 %v1177_v37, %v1163_v38  ;;  %v1896_v46 = vunpack.c.l.bf16 %v1950_v42  ;;  %v1170_v15 = vmul.f32 %v2564_v36, %v2564_v36  ;;  %v1858_v38 = vld [vmem:[#allocation9 + $0x20] sm:$0xff]  ;;  %s1459_s21 = scalar_lea.hbm %s3116_s7, %s1872_s10  ;;  %s2183_s10 = scalar_lea.hbm %s3116_s7, 512 }
  0x5b   : > { %v441_v9 = vsub.f32 %v1900_v5, %v2493_v35  ;;  %v442_v10 = vsub.f32 %v1901_v6, %v2493_v35  ;;  %1060 = vmatpush.bf16.msra.mxu3 %v1868_v18  ;;  %v1904_v33 = vunpack.c.l.bf16 %v1952_v29  ;;  %v1905_v37 = vunpack.c.h.bf16 %v1952_v29  ;;  %v463_v6 = vld [vmem:[%s3113_s4] sm:$0x3]  ;;  %s1462_s26 = sshll.u32 %s1459_s21, 4  ;;  %s1463_s26 = int_to_ptr.hbm [resolvable:$true] %s1462_s26 }
  0x5c   : > { %598 = vmatpush.bf16.msra.mxu0 %v1674_v50  ;;  %v487_v45 = vpack.c.bf16 %v476_v40, %v475_v39  ;;  %v1897_v50 = vunpack.c.h.bf16 %v1950_v42  ;;  %v439_v53 = vsub.f32 %v1896_v46, %v2493_v35  ;;  %v1866_v39 = vld [vmem:[#allocation9 + $0x60] sm:$0xff]  ;;  %v1865_v46 = vld [vmem:[#allocation9 + $0x58] sm:$0xff]  ;;  %s2177_s18 = sshra.s32 %s1463_s26, 4  ;;  %s2178_s18 = int_to_ptr.hbm [resolvable:$true] %s2177_s18 }
  0x5d   : > { %647 = vmatpush.bf16.msra.mxu1 %v1678_v51  ;;  %v1179_v51 = vadd.f32 %v1178_v44, %v1164_v43  ;;  %v2603_v19 = vmul.f32 %v2497_v41, %v441_v9  ;;  %v2606_v20 = vmul.f32 %v2497_v41, %v442_v10  ;;  %v443_v43 = vsub.f32 %v1904_v33, %v2493_v35  ;;  %p2184_p7 = scmp.lt.s32.totalorder %s2178_s18, %s3116_s7 }
  0x5e   : > { %v440_v54 = vsub.f32 %v1897_v50, %v2493_v35  ;;  %v2582_v57 = vmul.f32 %v2497_v41, %v439_v53  ;;  %v444_v44 = vsub.f32 %v1905_v37, %v2493_v35  ;;  %v2642_v9 = vperm.slane %v463_v6, 1 }
  0x5f   : > { %v1180_v56 = vadd.f32 %v1179_v51, %v1165_v52  ;;  %3136 = vst [vmem:[#allocation19_spill] sm:$0xff] %v2606_v20  ;;  %v480_v28 = vsub.f32 %v2606_v20, %v2508_v49  ;;  %1061 = vmatpush.bf16.msra.mxu3 %v1867_v26  ;;  %v1173_v42 = vmul.f32 %v2603_v19, %v2603_v19 }
  0x60   : > { %599 = vmatpush.bf16.msra.mxu0 %v1666_v58  ;;  %v2585_v58 = vmul.f32 %v2497_v41, %v440_v54  ;;  %v1171_v24 = vmul.f32 %v2582_v57, %v2582_v57  ;;  %v1174_v50 = vmul.f32 %v2606_v20, %v2606_v20  ;;  %v2624_v52 = vmul.f32 %v2497_v41, %v443_v43  ;;  %v1856_v54 = vld [vmem:[#allocation9 + $0x10] sm:$0xff] }
  0x61   : > { %648 = vmatpush.bf16.msra.mxu1 %v1670_v60  ;;  %v1181_v59 = vadd.f32 %v1180_v56, %v1166_v55  ;;  %v1167_v60 = vmul.f32 %v2544_v22, %v2544_v22  ;;  %v2627_v53 = vmul.f32 %v2497_v41, %v444_v44  ;;  %v1864_v55 = vld [vmem:[#allocation9 + $0x50] sm:$0xff] }
  0x62   : > { %v478_v62 = vsub.f32 %v2585_v58, %v2508_v49  ;;  %v1172_v30 = vmul.f32 %v2585_v58, %v2585_v58  ;;  %3137 = vst [vmem:[#allocation20_spill] sm:$0xff] %v2624_v52  ;;  %v481_v56 = vsub.f32 %v2624_v52, %v2508_v49 }
  0x63   : > { %600 = vmatmul.bf16.vlgmr.msra.gmra.mxu0 %v483_v61  ;;  %v1182_v1 = vadd.f32 %v1181_v59, %v1167_v60  ;;  %1062 = vmatpush.bf16.msra.mxu3 %v1866_v39  ;;  %3138 = vst [vmem:[#allocation21_spill] sm:$0xff] %v2627_v53  ;;  %v482_v59 = vsub.f32 %v2627_v53, %v2508_v49 }
  0x64   : > { %649 = vmatmul.bf16.vlgmr.msra.gmra.mxu1 %v483_v61  ;;  %v477_v61 = vsub.f32 %v2582_v57, %v2508_v49  ;;  %v1175_v60 = vmul.f32 %v2624_v52, %v2624_v52  ;;  %v1176_v63 = vmul.f32 %v2627_v53, %v2627_v53 }
  0x65   : > { %v490_v41 = vpack.c.bf16 %v482_v59, %v481_v56 }
  0x66   : > { %v488_v4 = vpack.c.bf16 %v478_v62, %v477_v61  ;;  %v1855_v61 = vld [vmem:[#allocation9 + $0x8] sm:$0xff] }
  0x67   : > { %1063 = vmatpush.bf16.msra.mxu3 %v1865_v46  ;;  %v1863_v62 = vld [vmem:[#allocation9 + $0x48] sm:$0xff] }
  0x6b   : > { %1064 = vmatpush.bf16.msra.mxu3 %v1864_v55 }
  0x6f   : > { %1065 = vmatpush.bf16.msra.mxu3 %v1863_v62 }
  0x73   : > { %605 = vmatmul.bf16.gmra.mxu0 %v484_v7 }
  0x74   : > { %654 = vmatmul.bf16.gmra.mxu1 %v484_v7  ;;  %v1183_v7 = vadd.f32 %v1182_v1, %v1168_v0  ;;  %v1854_v1 = vld [vmem:[#allocation9] sm:$0xff] }
  0x76   : > { %v1184_v16 = vadd.f32 %v1183_v7, %v1169_v8  ;;  %v2640_v8 = vperm.slane %v463_v6, 0 }
  0x78   : > { %v1185_v21 = vadd.f32 %v1184_v16, %v1170_v15 }
  0x7a   : > { %v1186_v31 = vadd.f32 %v1185_v21, %v1171_v24 }
  0x7c   : > { %v1187_v40 = vadd.f32 %v1186_v31, %v1172_v30 }
  0x7e   : > { %v1188_v51 = vadd.f32 %v1187_v40, %v1173_v42  ;;  %v2306_v40 = vmov 0.0  }
  0x7f   : > { %1394 = vst [vmem:[%s2668_s19] sm:$0xff] %v2306_v40 }
  0x80   : > { %v1189_v35 = vadd.f32 %v1188_v51, %v1174_v50  ;;  %1395 = vst [vmem:[%s2668_s19 + $0x8] sm:$0xff] %v2306_v40 }
  0x82   : > { %v1190_v0 = vadd.f32 %v1189_v35, %v1175_v60 }
  0x83   : > { %610 = vmatmul.bf16.gmra.mxu0 %v485_v17 }
  0x84   : > { %659 = vmatmul.bf16.gmra.mxu1 %v485_v17  ;;  %v1860_v17 = vld [vmem:[#allocation9 + $0x30] sm:$0xff]  ;;  %v1191_v5 = vadd.f32 %v1190_v0, %v1176_v63 }
  0x85   : > { %1011 = vmatpush.bf16.msra.mxu2 %v1860_v17 }
  0x89   : > { %1012 = vmatpush.bf16.msra.mxu2 %v1859_v25 }
  0x8d   : > { %1013 = vmatpush.bf16.msra.mxu2 %v1858_v38 }
  0x93   : > { %615 = vmatmul.bf16.gmra.mxu0 %v486_v27 }
  0x94   : > { %664 = vmatmul.bf16.gmra.mxu1 %v486_v27  ;;  %v479_v27 = vsub.f32 %v2603_v19, %v2508_v49  ;;  %v1192_v49 = vrot.slane %v1191_v5, 4 }
  0x96   : > { %v489_v32 = vpack.c.bf16 %v480_v28, %v479_v27  ;;  %v1193_v7 = vadd.f32 %v1192_v49, %v1191_v5 }
  0x98   : > { %v1194_v10 = vrot.slane %v1193_v7, 2 }
  0x9a   : > { %v1195_v17 = vadd.f32 %v1194_v10, %v1193_v7 }
  0x9c   : > { %v1196_v27 = vrot.slane %v1195_v17, 1 }
  0x9e   : > { %v1197_v37 = vadd.f32 %v1196_v27, %v1195_v17 }
  0xa0   : > { %1397 = vst [vmem:[%s2668_s19 + $0x1] sm:$0x1] %v1197_v37 }
  0xa3   : > { %620 = vmatmul.bf16.gmra.mxu0 %v487_v45 }
  0xa4   : > { %669 = vmatmul.bf16.gmra.mxu1 %v487_v45  ;;  %v1857_v45 = vld [vmem:[#allocation9 + $0x18] sm:$0xff] }
  0xa5   : > { %1014 = vmatpush.bf16.msra.mxu2 %v1857_v45 }
  0xa9   : > { %1015 = vmatpush.bf16.msra.mxu2 %v1856_v54 }
  0xad   : > { %1016 = vmatpush.bf16.msra.mxu2 %v1855_v61 }
  0xb1   : > { %1017 = vmatpush.bf16.msra.mxu2 %v1854_v1 }
  0xb3   : > { %625 = vmatmul.bf16.gmra.mxu0 %v488_v4 }
  0xb4   : > { %674 = vmatmul.bf16.gmra.mxu1 %v488_v4  ;;  %v1862_v4 = vld [vmem:[#allocation9 + $0x40] sm:$0xff] }
  0xb5   : > { %1066 = vmatpush.bf16.msra.mxu3 %v1862_v4 }
  0xc3   : > { %630 = vmatmul.bf16.gmra.mxu0 %v489_v32 }
  0xc4   : > { %679 = vmatmul.bf16.gmra.mxu1 %v489_v32 }
  0xd3   : > { %635 = vmatmul.bf16.gmra.mxu0 %v490_v41 }
  0xd4   : > { %684 = vmatmul.bf16.gmra.mxu1 %v490_v41 }
  0xe0   : > { %v601_v11 = vpop.f32.mrf.mxu0 }
  0xe1   : > { %v602_v14 = vadd.f32 %v601_v11, %v2640_v8  ;;  %v650_v15 = vpop.f32.mrf.mxu1 }
  0xe2   : > { %v651_v16 = vadd.f32 %v650_v15, %v2642_v9 }
  0xe3   : > { %v690_v18 = vmax.f32 %v602_v14, 0.0 }
  0xe4   : > { %v691_v21 = vmax.f32 %v651_v16, 0.0 }
  0xe5   : > { %vm2647_vm0 = vcmp.gt.f32.partialorder %v690_v18, 0.3 }
  0xe6   : > { %v754_v25 = vsel %vm2647_vm0, %v690_v18, 0.0  ;;  %vm2653_vm1 = vcmp.gt.f32.partialorder %v691_v21, 0.3  ;;  %v1791_v42 = vsel %vm2647_vm0, 1.0, %v2306_v40 }
  0xe7   : > { %v755_v28 = vsel %vm2653_vm1, %v691_v21, 0.0  ;;  %v1792_v43 = vsel %vm2653_vm1, 1.0, %v2306_v40 }
  0xe8   : > { %v786_v29 = vpack.c.bf16 %v755_v28, %v754_v25  ;;  %v603_v30 = vpop.f32.mrf.mxu0 }
  0xe9   : > { %v604_v31 = vadd.f32 %v603_v30, %v2640_v8  ;;  %v652_v32 = vpop.f32.mrf.mxu1 }
  0xea   : > { %1378 = vst [vmem:[%s2660_s14] sm:$0xff] %v786_v29  ;;  %v653_v33 = vadd.f32 %v652_v32, %v2642_v9  ;;  %v850_v62 = vunpack.c.l.b16 %v786_v29  ;;  %v851_v0 = vunpack.c.h.b16 %v786_v29 }
  0xeb   : > { %v692_v38 = vmax.f32 %v604_v31, 0.0 }
  0xec   : > { %v693_v39 = vmax.f32 %v653_v33, 0.0 }
  0xed   : > { %vm724_vm2 = vcmp.gt.f32.partialorder %v692_v38, 0.3 }
  0xee   : > { %v756_v44 = vsel %vm724_vm2, %v692_v38, 0.0  ;;  %v1793_v45 = vsel %vm724_vm2, 1.0, %v2306_v40  ;;  %vm725_vm3 = vcmp.gt.f32.partialorder %v693_v39, 0.3 }
  0xef   : > { %v1262_v46 = vadd.f32 %v1793_v45, %v1791_v42  ;;  %v1304_v50 = vadd.f32 %v756_v44, %v754_v25  ;;  %v757_v51 = vsel %vm725_vm3, %v693_v39, 0.0  ;;  %v1794_v54 = vsel %vm725_vm3, 1.0, %v2306_v40 }
  0xf0   : > { %v787_v55 = vpack.c.bf16 %v757_v51, %v756_v44  ;;  %v1283_v35 = vadd.f32 %v1794_v54, %v1792_v43  ;;  %v1325_v56 = vadd.f32 %v757_v51, %v755_v28  ;;  %v606_v59 = vpop.f32.mrf.mxu0 }
  0xf1   : > { %v607_v60 = vadd.f32 %v606_v59, %v2640_v8  ;;  %v655_v61 = vpop.f32.mrf.mxu1 }
  0xf2   : > { %1379 = vst [vmem:[%s2660_s14 + $0x8] sm:$0xff] %v787_v55  ;;  %v656_v41 = vadd.f32 %v655_v61, %v2642_v9  ;;  %v852_v63 = vunpack.c.l.b16 %v787_v55  ;;  %v853_v1 = vunpack.c.h.b16 %v787_v55 }
  0xf3   : > { %v694_v4 = vmax.f32 %v607_v60, 0.0 }
  0xf4   : > { %v695_v5 = vmax.f32 %v656_v41, 0.0  ;;  %v882_v49 = vpack.c.b16 %v852_v63, %v850_v62  ;;  %v883_v6 = vpack.c.b16 %v853_v1, %v851_v0 }
  0xf5   : > { %vm726_vm4 = vcmp.gt.f32.partialorder %v694_v4, 0.3 }
  0xf6   : > { %v758_v7 = vsel %vm726_vm4, %v694_v4, 0.0  ;;  %v1795_v10 = vsel %vm726_vm4, 1.0, %v2306_v40  ;;  %vm727_vm5 = vcmp.gt.f32.partialorder %v695_v5, 0.3  ;;  %1018 = vmatmul.bf16.vlgmr.msra.gmra.mxu2 %v882_v49  ;;  %1067 = vmatmul.bf16.vlgmr.msra.gmra.mxu3 %v883_v6 }
  0xf7   : > { %v1263_v11 = vadd.f32 %v1795_v10, %v1262_v46  ;;  %v1305_v14 = vadd.f32 %v1304_v50, %v758_v7  ;;  %v759_v15 = vsel %vm727_vm5, %v695_v5, 0.0  ;;  %v1796_v16 = vsel %vm727_vm5, 1.0, %v2306_v40 }
  0xf8   : > { %v788_v17 = vpack.c.bf16 %v759_v15, %v758_v7  ;;  %v1284_v18 = vadd.f32 %v1796_v16, %v1283_v35  ;;  %v1326_v21 = vadd.f32 %v1325_v56, %v759_v15  ;;  %v608_v24 = vpop.f32.mrf.mxu0 }
  0xf9   : > { %v609_v25 = vadd.f32 %v608_v24, %v2640_v8  ;;  %v657_v26 = vpop.f32.mrf.mxu1 }
  0xfa   : > { %1380 = vst [vmem:[%s2660_s14 + $0x10] sm:$0xff] %v788_v17  ;;  %v658_v27 = vadd.f32 %v657_v26, %v2642_v9  ;;  %v854_v50 = vunpack.c.l.b16 %v788_v17  ;;  %v855_v55 = vunpack.c.h.b16 %v788_v17 }
  0xfb   : > { %v696_v28 = vmax.f32 %v609_v25, 0.0 }
  0xfc   : > { %v697_v29 = vmax.f32 %v658_v27, 0.0 }
  0xfd   : > { %vm728_vm6 = vcmp.gt.f32.partialorder %v696_v28, 0.3 }
  0xfe   : > { %v760_v30 = vsel %vm728_vm6, %v696_v28, 0.0  ;;  %v1797_v31 = vsel %vm728_vm6, 1.0, %v2306_v40  ;;  %vm729_vm7 = vcmp.gt.f32.partialorder %v697_v29, 0.3 }
  0xff   : > { %v1264_v32 = vadd.f32 %v1797_v31, %v1263_v11  ;;  %v1306_v33 = vadd.f32 %v1305_v14, %v760_v30  ;;  %v761_v37 = vsel %vm729_vm7, %v697_v29, 0.0  ;;  %v1798_v38 = vsel %vm729_vm7, 1.0, %v2306_v40 }
 0x100   : > { %v789_v39 = vpack.c.bf16 %v761_v37, %v760_v30  ;;  %v1285_v42 = vadd.f32 %v1798_v38, %v1284_v18  ;;  %v1327_v43 = vadd.f32 %v1326_v21, %v761_v37  ;;  %v611_v44 = vpop.f32.mrf.mxu0 }
 0x101   : > { %v612_v45 = vadd.f32 %v611_v44, %v2640_v8  ;;  %v660_v46 = vpop.f32.mrf.mxu1 }
 0x102   : > { %1381 = vst [vmem:[%s2660_s14 + $0x18] sm:$0xff] %v789_v39  ;;  %v661_v51 = vadd.f32 %v660_v46, %v2642_v9  ;;  %v856_v54 = vunpack.c.l.b16 %v789_v39  ;;  %v857_v35 = vunpack.c.h.b16 %v789_v39 }
 0x103   : > { %v698_v56 = vmax.f32 %v612_v45, 0.0 }
 0x104   : > { %v699_v59 = vmax.f32 %v661_v51, 0.0  ;;  %v884_v60 = vpack.c.b16 %v856_v54, %v854_v50  ;;  %v885_v61 = vpack.c.b16 %v857_v35, %v855_v55 }
 0x105   : > { %vm730_vm8 = vcmp.gt.f32.partialorder %v698_v56, 0.3 }
 0x106   : > { %v762_v62 = vsel %vm730_vm8, %v698_v56, 0.0  ;;  %v1799_v41 = vsel %vm730_vm8, 1.0, %v2306_v40  ;;  %vm731_vm9 = vcmp.gt.f32.partialorder %v699_v59, 0.3  ;;  %1023 = vmatmul.bf16.gmra.mxu2 %v884_v60  ;;  %1072 = vmatmul.bf16.gmra.mxu3 %v885_v61 }
 0x107   : > { %v2694_v63 = vadd.f32 %v1799_v41, %v1264_v32  ;;  %v2696_v0 = vadd.f32 %v1306_v33, %v762_v62  ;;  %v763_v1 = vsel %vm731_vm9, %v699_v59, 0.0  ;;  %v1800_v4 = vsel %vm731_vm9, 1.0, %v2306_v40 }
 0x108   : > { %v790_v5 = vpack.c.bf16 %v763_v1, %v762_v62  ;;  %v2699_v49 = vadd.f32 %v1800_v4, %v1285_v42  ;;  %v2701_v6 = vadd.f32 %v1327_v43, %v763_v1  ;;  %v613_v7 = vpop.f32.mrf.mxu0 }
 0x109   : > { %v614_v10 = vadd.f32 %v613_v7, %v2640_v8  ;;  %v662_v11 = vpop.f32.mrf.mxu1 }
 0x10a   : > { %1382 = vst [vmem:[%s2660_s14 + $0x20] sm:$0xff] %v790_v5  ;;  %v663_v14 = vadd.f32 %v662_v11, %v2642_v9  ;;  %v858_v29 = vunpack.c.l.b16 %v790_v5  ;;  %v859_v32 = vunpack.c.h.b16 %v790_v5 }
 0x10b   : > { %v700_v15 = vmax.f32 %v614_v10, 0.0 }
 0x10c   : > { %v701_v16 = vmax.f32 %v663_v14, 0.0 }
 0x10d   : > { %vm2706_vm10 = vcmp.gt.f32.partialorder %v700_v15, 0.3 }
 0x10e   : > { %v2712_v18 = vsel %vm2706_vm10, %v700_v15, 0.0  ;;  %vm2714_vm11 = vcmp.gt.f32.partialorder %v701_v16, 0.3 }
 0x10f   : > { %v2720_v24 = vsel %vm2714_vm11, %v701_v16, 0.0 }
 0x110   : > { %v791_v25 = vpack.c.bf16 %v2720_v24, %v2712_v18  ;;  %v616_v26 = vpop.f32.mrf.mxu0  ;;  %v1329_v45 = vadd.f32 %v2701_v6, %v2720_v24 }
 0x111   : > { %v617_v27 = vadd.f32 %v616_v26, %v2640_v8  ;;  %v665_v28 = vpop.f32.mrf.mxu1 }
 0x112   : > { %1383 = vst [vmem:[%s2660_s14 + $0x28] sm:$0xff] %v791_v25  ;;  %v666_v30 = vadd.f32 %v665_v28, %v2642_v9  ;;  %v860_v31 = vunpack.c.l.b16 %v791_v25  ;;  %v861_v33 = vunpack.c.h.b16 %v791_v25 }
 0x113   : > { %v702_v37 = vmax.f32 %v617_v27, 0.0 }
 0x114   : > { %v703_v38 = vmax.f32 %v666_v30, 0.0  ;;  %v886_v39 = vpack.c.b16 %v860_v31, %v858_v29  ;;  %v887_v42 = vpack.c.b16 %v861_v33, %v859_v32 }
 0x115   : > { %vm2727_vm12 = vcmp.gt.f32.partialorder %v702_v37, 0.3 }
 0x116   : > { %v2733_v44 = vsel %vm2727_vm12, %v702_v37, 0.0  ;;  %vm2735_vm13 = vcmp.gt.f32.partialorder %v703_v38, 0.3  ;;  %1028 = vmatmul.bf16.gmra.mxu2 %v886_v39  ;;  %1077 = vmatmul.bf16.gmra.mxu3 %v887_v42 }
 0x117   : > { %v2741_v46 = vsel %vm2735_vm13, %v703_v38, 0.0 }
 0x118   : > { %v792_v50 = vpack.c.bf16 %v2741_v46, %v2733_v44  ;;  %v618_v51 = vpop.f32.mrf.mxu0  ;;  %v1330_v6 = vadd.f32 %v1329_v45, %v2741_v46 }
 0x119   : > { %v619_v54 = vadd.f32 %v618_v51, %v2640_v8  ;;  %v667_v55 = vpop.f32.mrf.mxu1 }
 0x11a   : > { %1384 = vst [vmem:[%s2660_s14 + $0x30] sm:$0xff] %v792_v50  ;;  %v668_v35 = vadd.f32 %v667_v55, %v2642_v9  ;;  %v862_v10 = vunpack.c.l.b16 %v792_v50  ;;  %v863_v15 = vunpack.c.h.b16 %v792_v50 }
 0x11b   : > { %v704_v56 = vmax.f32 %v619_v54, 0.0 }
 0x11c   : > { %v705_v59 = vmax.f32 %v668_v35, 0.0 }
 0x11d   : > { %vm2748_vm14 = vcmp.gt.f32.partialorder %v704_v56, 0.3 }
 0x11e   : > { %v2754_v61 = vsel %vm2748_vm14, %v704_v56, 0.0  ;;  %vm2756_vm15 = vcmp.gt.f32.partialorder %v705_v59, 0.3 }
 0x11f   : > { %v2762_v41 = vsel %vm2756_vm15, %v705_v59, 0.0 }
 0x120   : > { %v793_v1 = vpack.c.bf16 %v2762_v41, %v2754_v61  ;;  %v621_v4 = vpop.f32.mrf.mxu0 }
 0x121   : > { %v622_v5 = vadd.f32 %v621_v4, %v2640_v8  ;;  %v670_v7 = vpop.f32.mrf.mxu1 }
 0x122   : > { %1385 = vst [vmem:[%s2660_s14 + $0x38] sm:$0xff] %v793_v1  ;;  %v671_v11 = vadd.f32 %v670_v7, %v2642_v9  ;;  %v864_v14 = vunpack.c.l.b16 %v793_v1  ;;  %v865_v16 = vunpack.c.h.b16 %v793_v1 }
 0x123   : > { %v706_v25 = vmax.f32 %v622_v5, 0.0 }
 0x124   : > { %v707_v26 = vmax.f32 %v671_v11, 0.0  ;;  %v888_v27 = vpack.c.b16 %v864_v14, %v862_v10  ;;  %v889_v28 = vpack.c.b16 %v865_v16, %v863_v15 }
 0x125   : > { %vm2769_vm0 = vcmp.gt.f32.partialorder %v706_v25, 0.3 }
 0x126   : > { %v2775_v30 = vsel %vm2769_vm0, %v706_v25, 0.0  ;;  %vm2777_vm1 = vcmp.gt.f32.partialorder %v707_v26, 0.3  ;;  %1033 = vmatmul.bf16.gmra.mxu2 %v888_v27  ;;  %1082 = vmatmul.bf16.gmra.mxu3 %v889_v28  ;;  %v1807_v60 = vsel %vm2769_vm0, 1.0, %v2306_v40  ;;  %vm1401_vm0 = vcmask 1040384  }
 0x127   : > { %v2783_v32 = vsel %vm2777_vm1, %v707_v26, 0.0 }
 0x128   : > { %v794_v33 = vpack.c.bf16 %v2783_v32, %v2775_v30  ;;  %v623_v37 = vpop.f32.mrf.mxu0 }
 0x129   : > { %v624_v38 = vadd.f32 %v623_v37, %v2640_v8  ;;  %v672_v39 = vpop.f32.mrf.mxu1 }
 0x12a   : > { %1386 = vst [vmem:[%s2660_s14 + $0x40] sm:$0xff] %v794_v33  ;;  %v673_v42 = vadd.f32 %v672_v39, %v2642_v9  ;;  %v866_v7 = vunpack.c.l.b16 %v794_v33  ;;  %v867_v14 = vunpack.c.h.b16 %v794_v33 }
 0x12b   : > { %v708_v50 = vmax.f32 %v624_v38, 0.0 }
 0x12c   : > { %v709_v51 = vmax.f32 %v673_v42, 0.0 }
 0x12d   : > { %vm2790_vm2 = vcmp.gt.f32.partialorder %v708_v50, 0.3 }
 0x12e   : > { %v2796_v55 = vsel %vm2790_vm2, %v708_v50, 0.0  ;;  %vm2798_vm3 = vcmp.gt.f32.partialorder %v709_v51, 0.3  ;;  %v1809_v29 = vsel %vm2790_vm2, 1.0, %v2306_v40 }
 0x12f   : > { %v2804_v56 = vsel %vm2798_vm3, %v709_v51, 0.0 }
 0x130   : > { %v795_v59 = vpack.c.bf16 %v2804_v56, %v2796_v55  ;;  %v626_v1 = vpop.f32.mrf.mxu0 }
 0x131   : > { %v627_v4 = vadd.f32 %v626_v1, %v2640_v8  ;;  %v675_v5 = vpop.f32.mrf.mxu1 }
 0x132   : > { %1387 = vst [vmem:[%s2660_s14 + $0x48] sm:$0xff] %v795_v59  ;;  %v676_v10 = vadd.f32 %v675_v5, %v2642_v9  ;;  %v868_v11 = vunpack.c.l.b16 %v795_v59  ;;  %v869_v15 = vunpack.c.h.b16 %v795_v59 }
 0x133   : > { %v710_v16 = vmax.f32 %v627_v4, 0.0 }
 0x134   : > { %v711_v25 = vmax.f32 %v676_v10, 0.0  ;;  %v890_v26 = vpack.c.b16 %v868_v11, %v866_v7  ;;  %v891_v27 = vpack.c.b16 %v869_v15, %v867_v14 }
 0x135   : > { %vm2811_vm4 = vcmp.gt.f32.partialorder %v710_v16, 0.3 }
 0x136   : > { %v2817_v37 = vsel %vm2811_vm4, %v710_v16, 0.0  ;;  %vm2819_vm5 = vcmp.gt.f32.partialorder %v711_v25, 0.3  ;;  %1038 = vmatmul.bf16.gmra.mxu2 %v890_v26  ;;  %1087 = vmatmul.bf16.gmra.mxu3 %v891_v27  ;;  %v1811_v35 = vsel %vm2811_vm4, 1.0, %v2306_v40 }
 0x137   : > { %v2825_v33 = vsel %vm2819_vm5, %v711_v25, 0.0 }
 0x138   : > { %v796_v39 = vpack.c.bf16 %v2825_v33, %v2817_v37  ;;  %v628_v42 = vpop.f32.mrf.mxu0 }
 0x139   : > { %v629_v50 = vadd.f32 %v628_v42, %v2640_v8  ;;  %v677_v51 = vpop.f32.mrf.mxu1 }
 0x13a   : > { %1388 = vst [vmem:[%s2660_s14 + $0x50] sm:$0xff] %v796_v39  ;;  %v678_v59 = vadd.f32 %v677_v51, %v2642_v9  ;;  %v870_v26 = vunpack.c.l.b16 %v796_v39 }
 0x13b   : > { %v712_v1 = vmax.f32 %v629_v50, 0.0  ;;  %v871_v50 = vunpack.c.h.b16 %v796_v39  ;;  %v1803_v39 = vsel %vm2727_vm12, 1.0, %v2306_v40 }
 0x13c   : > { %v713_v4 = vmax.f32 %v678_v59, 0.0 }
 0x13d   : > { %vm2832_vm6 = vcmp.gt.f32.partialorder %v712_v1, 0.3 }
 0x13e   : > { %v2838_v7 = vsel %vm2832_vm6, %v712_v1, 0.0  ;;  %vm2840_vm7 = vcmp.gt.f32.partialorder %v713_v4, 0.3  ;;  %v1801_v1 = vsel %vm2706_vm10, 1.0, %v2306_v40 }
 0x13f   : > { %v2846_v11 = vsel %vm2840_vm7, %v713_v4, 0.0  ;;  %v1266_v21 = vadd.f32 %v1801_v1, %v2694_v63  ;;  %v1814_v38 = vsel %vm2840_vm7, 1.0, %v2306_v40 }
 0x140   : > { %v797_v14 = vpack.c.bf16 %v2846_v11, %v2838_v7  ;;  %v631_v15 = vpop.f32.mrf.mxu0 }
 0x141   : > { %v632_v16 = vadd.f32 %v631_v15, %v2640_v8  ;;  %v680_v25 = vpop.f32.mrf.mxu1  ;;  %v1802_v15 = vsel %vm2714_vm11, 1.0, %v2306_v40 }
 0x142   : > { %1389 = vst [vmem:[%s2660_s14 + $0x58] sm:$0xff] %v797_v14  ;;  %v681_v27 = vadd.f32 %v680_v25, %v2642_v9  ;;  %v872_v42 = vunpack.c.l.b16 %v797_v14  ;;  %v873_v51 = vunpack.c.h.b16 %v797_v14  ;;  %v1308_v25 = vadd.f32 %v2696_v0, %v2712_v18 }
 0x143   : > { %v714_v59 = vmax.f32 %v632_v16, 0.0  ;;  %v1804_v16 = vsel %vm2735_vm13, 1.0, %v2306_v40 }
 0x144   : > { %v715_v4 = vmax.f32 %v681_v27, 0.0  ;;  %v892_v53 = vpack.c.b16 %v872_v42, %v870_v26  ;;  %v893_v52 = vpack.c.b16 %v873_v51, %v871_v50  ;;  %v1287_v26 = vadd.f32 %v1802_v15, %v2699_v49 }
 0x145   : > { %vm2859_vm8 = vcmp.gt.f32.partialorder %v714_v59, 0.3  ;;  %v1267_v27 = vadd.f32 %v1803_v39, %v1266_v21  ;;  %v1806_v42 = vsel %vm2756_vm15, 1.0, %v2306_v40  ;;  %v1309_v49 = vadd.f32 %v1308_v25, %v2733_v44 }
 0x146   : > { %v2868_v14 = vsel %vm2859_vm8, %v714_v59, 0.0  ;;  %vm2870_vm9 = vcmp.gt.f32.partialorder %v715_v4, 0.3  ;;  %1043 = vmatmul.bf16.gmra.mxu2 %v892_v53  ;;  %1092 = vmatmul.bf16.gmra.mxu3 %v893_v52  ;;  %v1805_v52 = vsel %vm2748_vm14, 1.0, %v2306_v40  ;;  %v1288_v50 = vadd.f32 %v1804_v16, %v1287_v26 }
 0x147   : > { %v2880_v43 = vsel %vm2870_vm9, %v715_v4, 0.0  ;;  %v1268_v24 = vadd.f32 %v1805_v52, %v1267_v27  ;;  %v1310_v62 = vadd.f32 %v1309_v49, %v2754_v61  ;;  %v1808_v4 = vsel %vm2777_vm1, 1.0, %v2306_v40 }
 0x148   : > { %v798_v53 = vpack.c.bf16 %v2880_v43, %v2868_v14  ;;  %v633_v63 = vpop.f32.mrf.mxu0  ;;  %v1289_v1 = vadd.f32 %v1806_v42, %v1288_v50  ;;  %v1331_v15 = vadd.f32 %v1330_v6, %v2762_v41  ;;  %v1810_v61 = vsel %vm2798_vm3, 1.0, %v2306_v40 }
 0x149   : > { %v634_v0 = vadd.f32 %v633_v63, %v2640_v8  ;;  %v682_v18 = vpop.f32.mrf.mxu1  ;;  %v1269_v39 = vadd.f32 %v1807_v60, %v1268_v24  ;;  %v1311_v46 = vadd.f32 %v1310_v62, %v2775_v30  ;;  %v1812_v27 = vsel %vm2819_vm5, 1.0, %v2306_v40 }
 0x14a   : > { %1390 = vst [vmem:[%s2660_s14 + $0x60] sm:$0xff] %v798_v53  ;;  %v683_v51 = vadd.f32 %v682_v18, %v2642_v9  ;;  %v1290_v54 = vadd.f32 %v1808_v4, %v1289_v1  ;;  %v1332_v16 = vadd.f32 %v1331_v15, %v2783_v32  ;;  %v1815_v5 = vsel %vm2859_vm8, 1.0, %v2306_v40 }
 0x14b   : > { %v716_v59 = vmax.f32 %v634_v0, 0.0  ;;  %v1270_v26 = vadd.f32 %v1809_v29, %v1269_v39  ;;  %v1312_v30 = vadd.f32 %v1311_v46, %v2796_v55  ;;  %v874_v0 = vunpack.c.l.b16 %v798_v53 }
 0x14c   : > { %v717_v44 = vmax.f32 %v683_v51, 0.0  ;;  %v1291_v45 = vadd.f32 %v1810_v61, %v1290_v54  ;;  %v875_v55 = vunpack.c.h.b16 %v798_v53  ;;  %v1333_v28 = vadd.f32 %v1332_v16, %v2804_v56 }
 0x14d   : > { %vm2911_vm10 = vcmp.gt.f32.partialorder %v716_v59, 0.3  ;;  %v1271_v60 = vadd.f32 %v1811_v35, %v1270_v26  ;;  %v1813_v51 = vsel %vm2832_vm6, 1.0, %v2306_v40  ;;  %v1313_v1 = vadd.f32 %v1312_v30, %v2817_v37 }
 0x14e   : > { %v780_v31 = vsel %vm2911_vm10, %v716_v59, 0.0  ;;  %vm2921_vm11 = vcmp.gt.f32.partialorder %v717_v44, 0.3  ;;  %v1292_v4 = vadd.f32 %v1812_v27, %v1291_v45  ;;  %v1334_v53 = vadd.f32 %v1333_v28, %v2825_v33 }
 0x14f   : > { %v781_v25 = vsel %vm2921_vm11, %v717_v44, 0.0  ;;  %v1816_v10 = vsel %vm2870_vm9, 1.0, %v2306_v40  ;;  %v1272_v33 = vadd.f32 %v1813_v51, %v1271_v60  ;;  %v1314_v15 = vadd.f32 %v1313_v1, %v2838_v7 }
 0x150   : > { %v799_v52 = vpack.c.bf16 %v781_v25, %v780_v31  ;;  %v636_v63 = vpop.f32.mrf.mxu0  ;;  %v1293_v39 = vadd.f32 %v1814_v38, %v1292_v4  ;;  %v1335_v17 = vadd.f32 %v1334_v53, %v2846_v11  ;;  %v1817_v29 = vsel %vm2911_vm10, 1.0, %v2306_v40 }
 0x151   : > { %v637_v42 = vadd.f32 %v636_v63, %v2640_v8  ;;  %v685_v32 = vpop.f32.mrf.mxu1  ;;  %v1818_v46 = vsel %vm2921_vm11, 1.0, %v2306_v40  ;;  %v1273_v16 = vadd.f32 %v1815_v5, %v1272_v33  ;;  %v1315_v7 = vadd.f32 %v1314_v15, %v2868_v14 }
 0x152   : > { %1391 = vst [vmem:[%s2660_s14 + $0x68] sm:$0xff] %v799_v52  ;;  %v686_v18 = vadd.f32 %v685_v32, %v2642_v9  ;;  %v876_v49 = vunpack.c.l.b16 %v799_v52  ;;  %v877_v50 = vunpack.c.h.b16 %v799_v52  ;;  %v1294_v26 = vadd.f32 %v1816_v10, %v1293_v39 }
 0x153   : > { %v718_v6 = vmax.f32 %v637_v42, 0.0  ;;  %v1336_v52 = vadd.f32 %v1335_v17, %v2880_v43  ;;  %v1274_v63 = vadd.f32 %v1817_v29, %v1273_v16  ;;  %v1316_v45 = vadd.f32 %v1315_v7, %v780_v31 }
 0x154   : > { %v719_v24 = vmax.f32 %v686_v18, 0.0  ;;  %v894_v59 = vpack.c.b16 %v876_v49, %v874_v0  ;;  %v895_v62 = vpack.c.b16 %v877_v50, %v875_v55  ;;  %v1295_v14 = vadd.f32 %v1818_v46, %v1294_v26 }
 0x155   : > { %vm2947_vm12 = vcmp.gt.f32.partialorder %v718_v6, 0.3  ;;  %v1337_v42 = vadd.f32 %v1336_v52, %v781_v25 }
 0x156   : > { %v782_v44 = vsel %vm2947_vm12, %v718_v6, 0.0  ;;  %vm2959_vm13 = vcmp.gt.f32.partialorder %v719_v24, 0.3  ;;  %1048 = vmatmul.bf16.gmra.mxu2 %v894_v59  ;;  %1097 = vmatmul.bf16.gmra.mxu3 %v895_v62  ;;  %v1819_v11 = vsel %vm2947_vm12, 1.0, %v2306_v40 }
 0x157   : > { %v783_v20 = vsel %vm2959_vm13, %v719_v24, 0.0  ;;  %v1820_v21 = vsel %vm2959_vm13, 1.0, %v2306_v40  ;;  %v1275_v32 = vadd.f32 %v1819_v11, %v1274_v63  ;;  %v1317_v0 = vadd.f32 %v1316_v45, %v782_v44 }
 0x158   : > { %v800_v61 = vpack.c.bf16 %v783_v20, %v782_v44  ;;  %v638_v54 = vpop.f32.mrf.mxu0  ;;  %v1296_v43 = vadd.f32 %v1820_v21, %v1295_v14  ;;  %v1338_v18 = vadd.f32 %v1337_v42, %v783_v20 }
 0x159   : > { %v639_v30 = vadd.f32 %v638_v54, %v2640_v8  ;;  %v687_v35 = vpop.f32.mrf.mxu1  ;;  %v1404_v54 = vlaneseq }
 0x15a   : > { %1392 = vst [vmem:[%s2660_s14 + $0x70] sm:$0xff] %v800_v61  ;;  %v688_v41 = vadd.f32 %v687_v35, %v2642_v9  ;;  %v878_v24 = vunpack.c.l.b16 %v800_v61  ;;  %v879_v59 = vunpack.c.h.b16 %v800_v61 }
 0x15b   : > { %v720_v27 = vmax.f32 %v639_v30, 0.0  ;;  %vm1406_vm1 = vcmp.lt.s32.totalorder %v1404_v54, 256 }
 0x15c   : > { %v721_v8 = vmax.f32 %v688_v41, 0.0 }
 0x15d   : > { %vm752_vm14 = vcmp.gt.f32.partialorder %v720_v27, 0.3 }
 0x15e   : > { %v784_v49 = vsel %vm752_vm14, %v720_v27, 0.0  ;;  %v1821_v55 = vsel %vm752_vm14, 1.0, %v2306_v40  ;;  %vm753_vm15 = vcmp.gt.f32.partialorder %v721_v8, 0.3 }
 0x15f   : > { %v1276_v50 = vadd.f32 %v1821_v55, %v1275_v32  ;;  %v1318_v28 = vadd.f32 %v1317_v0, %v784_v49  ;;  %v785_v60 = vsel %vm753_vm15, %v721_v8, 0.0  ;;  %v1822_v9 = vsel %vm753_vm15, 1.0, %v2306_v40  ;;  %v2992_v8 = vld [vmem:[%s3114_s5] ss:$0 sm:$0xff] }
 0x160   : > { %v801_v31 = vpack.c.bf16 %v785_v60, %v784_v49  ;;  %v1297_v51 = vadd.f32 %v1822_v9, %v1296_v43  ;;  %v1339_v6 = vadd.f32 %v1338_v18, %v785_v60 }
 0x161   : > { %v1277_v25 = vrot.slane %v1276_v50, 4  ;;  %v1319_v38 = vrot.slane %v1318_v28, 4 }
 0x162   : > { %v1298_v62 = vrot.slane %v1297_v51, 4  ;;  %v1340_v1 = vrot.slane %v1339_v6, 4  ;;  %1393 = vst [vmem:[%s2660_s14 + $0x78] sm:$0xff] %v801_v31  ;;  %v880_v4 = vunpack.c.l.b16 %v801_v31  ;;  %v881_v53 = vunpack.c.h.b16 %v801_v31  ;;  %s2179_s14 = scalar_lea.hbm %s2178_s18, 128 }
 0x163   : > { %v1278_v56 = vadd.f32 %v1277_v25, %v1276_v50  ;;  %v1320_v5 = vadd.f32 %v1319_v38, %v1318_v28  ;;  %p2180_p1 = scmp.ne.s32.totalorder %s2178_s18, %s2179_s14  ;;  %p2185_p2 = scmp.lt.s32.totalorder %s2183_s10, %s2179_s14 }
 0x164   : > { %v1299_v10 = vadd.f32 %v1298_v62, %v1297_v51  ;;  %v1341_v44 = vadd.f32 %v1340_v1, %v1339_v6  ;;  %v896_v37 = vpack.c.b16 %v880_v4, %v878_v24  ;;  %v897_v33 = vpack.c.b16 %v881_v53, %v879_v59 }
 0x165   : > { %v1279_v15 = vrot.slane %v1278_v56, 2  ;;  %v1321_v40 = vrot.slane %v1320_v5, 2  ;;  %p2181_p4 = pnand %p2180_p1, %p2442_p0  ;;  %p2186_p9 = por %p2185_p2, %p2184_p7 }
 0x166   : > { %v1300_v39 = vrot.slane %v1299_v10, 2  ;;  %v1342_v20 = vrot.slane %v1341_v44, 2  ;;  %1053 = vmatmul.bf16.gmra.mxu2 %v896_v37  ;;  %1102 = vmatmul.bf16.gmra.mxu3 %v897_v33 }
 0x167   : > { %v1280_v17 = vadd.f32 %v1279_v15, %v1278_v56  ;;  %v1322_v29 = vadd.f32 %v1321_v40, %v1320_v5  ;;  %p2182_p8 = pneg %p2181_p4 }
 0x168   : > { %v1301_v46 = vadd.f32 %v1300_v39, %v1299_v10  ;;  %v1343_v61 = vadd.f32 %v1342_v20, %v1341_v44 }
 0x169   : > { %v1281_v16 = vrot.slane %v1280_v17, 1  ;;  %v1323_v7 = vrot.slane %v1322_v29, 1  ;;  %p2187_p10 = pnand %p2186_p9, %p2182_p8 }
 0x16a   : > { %v1302_v26 = vrot.slane %v1301_v46, 1  ;;  %v1344_v30 = vrot.slane %v1343_v61, 1 }
 0x16b   : > { %v1282_v11 = vadd.f32 %v1281_v16, %v1280_v17  ;;  %v1324_v21 = vadd.f32 %v1323_v7, %v1322_v29 }
 0x16c   : > { %v1303_v35 = vadd.f32 %v1302_v26, %v1301_v46  ;;  %v1345_v52 = vadd.f32 %v1344_v30, %v1343_v61 }
 0x16e   : > { %v1400_v41 = vrot.slane %v1303_v35, 7  ;;  %v1413_v63 = vrot.slane %v1345_v52, 7 }
 0x170   : > { %v1402_v45 = vsel %vm1401_vm0, %v1282_v11, %v1400_v41  ;;  %v1414_v14 = vsel %vm1401_vm0, %v1324_v21, %v1413_v63 }
 0x171   : > { %1823 = vst.msk [vmem:[%s2668_s19 + $0x2] ss:$8 sm:$0x3] %vm1406_vm1, %v1402_v45 }
 0x172   : > { %1824 = vst.msk [vmem:[%s2668_s19 + $0x3] ss:$8 sm:$0x3] %vm1406_vm1, %v1414_v14 }
 0x179   : > { %v1019_v27 = vpop.f32.mrf.mxu2  ;;  %v1068_v42 = vpop.f32.mrf.mxu3 }
 0x17a   : > { %v1020_v32 = vadd.f32 %v2992_v8, %v1019_v27 }
 0x17c   : > { %v1069_v0 = vadd.f32 %v1068_v42, %v1020_v32 }
 0x17e   : > { %v1108_v55 = vsub.f32 %v1069_v0, %v2500_v47 }
 0x180   : > { %v1124_v9 = vmul.f32 %v1108_v55, %v1108_v55 }
 0x181   : > { %v1021_v43 = vpop.f32.mrf.mxu2  ;;  %v1070_v18 = vpop.f32.mrf.mxu3 }
 0x182   : > { %v1022_v49 = vadd.f32 %v2992_v8, %v1021_v43 }
 0x184   : > { %v1071_v50 = vadd.f32 %v1070_v18, %v1022_v49 }
 0x186   : > { %v1109_v28 = vsub.f32 %v1071_v50, %v2503_v48  ;;  %v1909_v60 = vpack.c.bf16 %v1071_v50, %v1069_v0 }
 0x188   : > { %v1125_v31 = vmul.f32 %v1109_v28, %v1109_v28  ;;  %1910 = vst [vmem:[%s3006_s13] sm:$0xff] %v1909_v60  }
 0x189   : > { %v1024_v47 = vpop.f32.mrf.mxu2  ;;  %v1073_v51 = vpop.f32.mrf.mxu3 }
 0x18a   : > { %v1140_v48 = vadd.f32 %v1125_v31, %v1124_v9  ;;  %v1025_v6 = vadd.f32 %v2992_v8, %v1024_v47 }
 0x18b   : > { %2190 = shalt.err (!%p2187_p10)
}
 0x18c   : > { %s2307_s21 = smov 128   ;;  %s2308_s20 = smov 8   ;;  %v1074_v25 = vadd.f32 %v1073_v51, %v1025_v6 }
 0x18d   : > { %1975 = dma.vmem_to_hbm [thread:$0]  (%p2442_p0), %s1461_s25, 2048, %s1463_s26, %s3010_s17, %s2307_s21, %s2307_s21, %s2308_s20  }
 0x18e   : > { %v1110_v38 = vsub.f32 %v1074_v25, %v2518_v2  ;;  %s1870_s25 = sshll.u32 %s2377_s9, 6  ;;  %s1442_s2 = sshll.u32 %s3006_s13, 4  ;;  %s1443_s2 = int_to_ptr.vmem [resolvable:$true] %s1442_s2 }
 0x18f   : > { %s1441_s14 = scalar_lea.hbm %s3115_s6, %s1870_s25  ;;  %s1420_s10 = scalar_lea.sflag [#allocation4], %s2476_s0 }
 0x190   : > { %v1126_v24 = vmul.f32 %v1110_v38, %v1110_v38  ;;  %s1444_s22 = sshll.u32 %s1441_s14, 4  ;;  %s2211_s25 = scalar_lea.hbm %s3115_s6, 256  ;;  %s1445_s22 = int_to_ptr.hbm [resolvable:$true] %s1444_s22 }
 0x191   : > { %v1026_v59 = vpop.f32.mrf.mxu2  ;;  %v1075_v62 = vpop.f32.mrf.mxu3  ;;  %s2205_s11 = sshra.s32 %s1445_s22, 4  ;;  %s2206_s11 = int_to_ptr.hbm [resolvable:$true] %s2205_s11 }
 0x192   : > { %v1141_v1 = vadd.f32 %v1140_v48, %v1126_v24  ;;  %v1027_v4 = vadd.f32 %v2992_v8, %v1026_v59  ;;  %s2207_s16 = scalar_lea.hbm %s2206_s11, 64  ;;  %p2212_p3 = scmp.lt.s32.totalorder %s2206_s11, %s3115_s6 }
 0x193   : > { %p2208_p11 = scmp.ne.s32.totalorder %s2206_s11, %s2207_s16  ;;  %p2213_p5 = scmp.lt.s32.totalorder %s2211_s25, %s2207_s16 }
 0x194   : > { %v1076_v53 = vadd.f32 %v1075_v62, %v1027_v4 }
 0x195   : > { %p2209_p12 = pnand %p2208_p11, %p2442_p0  ;;  %p2214_p1 = por %p2213_p5, %p2212_p3 }
 0x196   : > { %v1111_v56 = vsub.f32 %v1076_v53, %v2521_v3  ;;  %v1914_v5 = vpack.c.bf16 %v1076_v53, %v1074_v25 }
 0x197   : > { %p2210_p13 = pneg %p2209_p12 }
 0x198   : > { %v1127_v10 = vmul.f32 %v1111_v56, %v1111_v56  ;;  %1953 = vst [vmem:[%s3006_s13 + $0x8] sm:$0xff] %v1914_v5  }
 0x199   : > { %v1029_v44 = vpop.f32.mrf.mxu2  ;;  %v1078_v37 = vpop.f32.mrf.mxu3  ;;  %p2215_p4 = pnand %p2214_p1, %p2210_p13 }
 0x19a   : > { %v1142_v33 = vadd.f32 %v1141_v1, %v1127_v10  ;;  %v1030_v15 = vadd.f32 %v2992_v8, %v1029_v44 }
 0x19c   : > { %v1079_v20 = vadd.f32 %v1078_v37, %v1030_v15 }
 0x19e   : > { %v1112_v47 = vsub.f32 %v1079_v20, %v2531_v12 }
 0x1a0   : > { %v1128_v48 = vmul.f32 %v1112_v47, %v1112_v47 }
 0x1a1   : > { %v1031_v40 = vpop.f32.mrf.mxu2  ;;  %v1080_v2 = vpop.f32.mrf.mxu3 }
 0x1a2   : > { %v1032_v39 = vadd.f32 %v2992_v8, %v1031_v40  ;;  %v1143_v4 = vadd.f32 %v1142_v33, %v1128_v48 }
 0x1a4   : > { %v1081_v17 = vadd.f32 %v1080_v2, %v1032_v39 }
 0x1a6   : > { %v1919_v29 = vpack.c.bf16 %v1081_v17, %v1079_v20  ;;  %v1113_v51 = vsub.f32 %v1081_v17, %v2534_v13 }
 0x1a8   : > { %1954 = vst [vmem:[%s3006_s13 + $0x10] sm:$0xff] %v1919_v29   ;;  %v1129_v59 = vmul.f32 %v1113_v51, %v1113_v51 }
 0x1a9   : > { %v1034_v46 = vpop.f32.mrf.mxu2  ;;  %v1083_v61 = vpop.f32.mrf.mxu3 }
 0x1aa   : > { %v1035_v3 = vadd.f32 %v2992_v8, %v1034_v46  ;;  %v1144_v13 = vadd.f32 %v1143_v4, %v1129_v59 }
 0x1ac   : > { %v1084_v26 = vadd.f32 %v1083_v61, %v1035_v3 }
 0x1ae   : > { %v1114_v6 = vsub.f32 %v1084_v26, %v2544_v22 }
 0x1b0   : > { %v1130_v53 = vmul.f32 %v1114_v6, %v1114_v6 }
 0x1b1   : > { %v1036_v54 = vpop.f32.mrf.mxu2  ;;  %v1085_v16 = vpop.f32.mrf.mxu3 }
 0x1b2   : > { %v1037_v7 = vadd.f32 %v2992_v8, %v1036_v54  ;;  %v1145_v37 = vadd.f32 %v1144_v13, %v1130_v53  ;;  %v3183_v54 = vld [vmem:[#allocation19_spill] sm:$0xff] }
 0x1b4   : > { %v1086_v30 = vadd.f32 %v1085_v16, %v1037_v7 }
 0x1b6   : > { %v1924_v35 = vpack.c.bf16 %v1086_v30, %v1084_v26  ;;  %v1115_v62 = vsub.f32 %v1086_v30, %v2547_v23 }
 0x1b8   : > { %1955 = vst [vmem:[%s3006_s13 + $0x18] sm:$0xff] %v1924_v35   ;;  %v1131_v10 = vmul.f32 %v1115_v62, %v1115_v62 }
 0x1b9   : > { %v1039_v52 = vpop.f32.mrf.mxu2  ;;  %v1088_v11 = vpop.f32.mrf.mxu3 }
 0x1ba   : > { %v1040_v21 = vadd.f32 %v2992_v8, %v1039_v52  ;;  %v1146_v39 = vadd.f32 %v1145_v37, %v1131_v10 }
 0x1bc   : > { %v1089_v14 = vadd.f32 %v1088_v11, %v1040_v21 }
 0x1be   : > { %v1116_v56 = vsub.f32 %v1089_v14, %v2561_v34 }
 0x1c0   : > { %v1132_v15 = vmul.f32 %v1116_v56, %v1116_v56 }
 0x1c1   : > { %v1041_v41 = vpop.f32.mrf.mxu2  ;;  %v1090_v63 = vpop.f32.mrf.mxu3 }
 0x1c2   : > { %v1042_v45 = vadd.f32 %v2992_v8, %v1041_v41  ;;  %v1147_v17 = vadd.f32 %v1146_v39, %v1132_v15 }
 0x1c4   : > { %v1091_v27 = vadd.f32 %v1090_v63, %v1042_v45 }
 0x1c6   : > { %v1929_v42 = vpack.c.bf16 %v1091_v27, %v1089_v14  ;;  %v1117_v22 = vsub.f32 %v1091_v27, %v2564_v36  ;;  %v3185_v14 = vld [vmem:[#allocation21_spill] sm:$0xff] }
 0x1c8   : > { %1956 = vst [vmem:[%s3006_s13 + $0x20] sm:$0xff] %v1929_v42   ;;  %v1133_v33 = vmul.f32 %v1117_v22, %v1117_v22 }
 0x1c9   : > { %v1044_v32 = vpop.f32.mrf.mxu2  ;;  %v1093_v0 = vpop.f32.mrf.mxu3 }
 0x1ca   : > { %v1045_v43 = vadd.f32 %v2992_v8, %v1044_v32  ;;  %v1148_v61 = vadd.f32 %v1147_v17, %v1133_v33 }
 0x1cc   : > { %v1094_v50 = vadd.f32 %v1093_v0, %v1045_v43 }
 0x1ce   : > { %v1118_v40 = vsub.f32 %v1094_v50, %v2582_v57 }
 0x1d0   : > { %v1134_v29 = vmul.f32 %v1118_v40, %v1118_v40 }
 0x1d1   : > { %v1046_v18 = vpop.f32.mrf.mxu2  ;;  %v1095_v49 = vpop.f32.mrf.mxu3 }
 0x1d2   : > { %v1047_v55 = vadd.f32 %v2992_v8, %v1046_v18  ;;  %v1149_v16 = vadd.f32 %v1148_v61, %v1134_v29 }
 0x1d4   : > { %v1096_v28 = vadd.f32 %v1095_v49, %v1047_v55 }
 0x1d6   : > { %v1934_v60 = vpack.c.bf16 %v1096_v28, %v1094_v50  ;;  %v1119_v20 = vsub.f32 %v1096_v28, %v2585_v58  ;;  %v3184_v58 = vld [vmem:[#allocation20_spill] sm:$0xff] }
 0x1d8   : > { %1957 = vst [vmem:[%s3006_s13 + $0x28] sm:$0xff] %v1934_v60   ;;  %v1135_v3 = vmul.f32 %v1119_v20, %v1119_v20 }
 0x1d9   : > { %v1049_v9 = vpop.f32.mrf.mxu2  ;;  %v1098_v31 = vpop.f32.mrf.mxu3 }
 0x1da   : > { %v1050_v25 = vadd.f32 %v2992_v8, %v1049_v9  ;;  %v1150_v35 = vadd.f32 %v1149_v16, %v1135_v3 }
 0x1dc   : > { %v1099_v12 = vadd.f32 %v1098_v31, %v1050_v25 }
 0x1de   : > { %v1120_v36 = vsub.f32 %v1099_v12, %v2603_v19 }
 0x1e0   : > { %v1136_v7 = vmul.f32 %v1120_v36, %v1120_v36 }
 0x1e1   : > { %v1051_v38 = vpop.f32.mrf.mxu2  ;;  %v1100_v24 = vpop.f32.mrf.mxu3 }
 0x1e2   : > { %v1052_v1 = vadd.f32 %v2992_v8, %v1051_v38  ;;  %v1151_v21 = vadd.f32 %v1150_v35, %v1136_v7 }
 0x1e4   : > { %v1101_v5 = vadd.f32 %v1100_v24, %v1052_v1 }
 0x1e6   : > { %v1939_v44 = vpack.c.bf16 %v1101_v5, %v1099_v12  ;;  %v1121_v57 = vsub.f32 %v1101_v5, %v3183_v54 }
 0x1e8   : > { %1958 = vst [vmem:[%s3006_s13 + $0x30] sm:$0xff] %v1939_v44   ;;  %v1137_v52 = vmul.f32 %v1121_v57, %v1121_v57 }
 0x1e9   : > { %v1054_v23 = vpop.f32.mrf.mxu2  ;;  %v1103_v2 = vpop.f32.mrf.mxu3 }
 0x1ea   : > { %v1055_v34 = vadd.f32 %v2992_v8, %v1054_v23  ;;  %v1152_v45 = vadd.f32 %v1151_v21, %v1137_v52 }
 0x1ec   : > { %v1104_v46 = vadd.f32 %v1103_v2, %v1055_v34 }
 0x1ee   : > { %v1122_v26 = vsub.f32 %v1104_v46, %v3184_v58 }
 0x1f0   : > { %v1138_v41 = vmul.f32 %v1122_v26, %v1122_v26 }
 0x1f1   : > { %v1056_v30 = vpop.f32.mrf.mxu2  ;;  %v1105_v11 = vpop.f32.mrf.mxu3 }
 0x1f2   : > { %v1057_v19 = vadd.f32 %v2992_v8, %v1056_v30  ;;  %v1153_v32 = vadd.f32 %v1152_v45, %v1138_v41 }
 0x1f4   : > { %v1106_v63 = vadd.f32 %v1105_v11, %v1057_v19 }
 0x1f6   : > { %v1123_v27 = vsub.f32 %v1106_v63, %v3185_v14  ;;  %v1944_v42 = vpack.c.bf16 %v1106_v63, %v1104_v46 }
 0x1f8   : > { %v1139_v0 = vmul.f32 %v1123_v27, %v1123_v27  ;;  %1959 = vst [vmem:[%s3006_s13 + $0x38] sm:$0xff] %v1944_v42  }
 0x1f9   : > { %2218 = shalt.err (!%p2215_p4)
}
 0x1fa   : > { %s2309_s0 = smov 64   ;;  %s2310_s13 = smov 4   ;;  %v1154_v8 = vadd.f32 %v1153_v32, %v1139_v0 }
 0x1fb   : > { %1974 = dma.vmem_to_hbm [thread:$0]  (%p2442_p0), %s1443_s2, 1024, %s1445_s22, %s1420_s10, %s2309_s0, %s2309_s0, %s2310_s13  }
 0x1fc   : > { %v1155_v43 = vrot.slane %v1154_v8, 4  ;;  %s1873_s14 = sshll.u32 %s2377_s9, 4  ;;  %s1478_s20 = sshll.u32 %s2668_s19, 4  ;;  %s1479_s20 = int_to_ptr.vmem [resolvable:$true] %s1478_s20 }
 0x1fd   : > { %s1476_s16 = scalar_lea.hbm %s3117_s8, %s1873_s14  ;;  %s2239_s10 = scalar_lea.hbm %s3117_s8, 64 }
 0x1fe   : > { %v1156_v18 = vadd.f32 %v1155_v43, %v1154_v8  ;;  %s1480_s25 = sshll.u32 %s1476_s16, 4  ;;  %s1481_s25 = int_to_ptr.hbm [resolvable:$true] %s1480_s25 }
 0x1ff   : > { %s2233_s26 = sshra.s32 %s1481_s25, 4  ;;  %s2234_s26 = int_to_ptr.hbm [resolvable:$true] %s2233_s26 }
 0x200   : > { %v1157_v49 = vrot.slane %v1156_v18, 2  ;;  %s2235_s2 = scalar_lea.hbm %s2234_s26, 16  ;;  %p2240_p9 = scmp.lt.s32.totalorder %s2234_s26, %s3117_s8 }
 0x201   : > { %p2236_p8 = scmp.ne.s32.totalorder %s2234_s26, %s2235_s2  ;;  %p2241_p10 = scmp.lt.s32.totalorder %s2239_s10, %s2235_s2 }
 0x202   : > { %v1158_v55 = vadd.f32 %v1157_v49, %v1156_v18 }
 0x203   : > { %p2237_p7 = pnand %p2236_p8, %p2442_p0  ;;  %p2242_p11 = por %p2241_p10, %p2240_p9 }
 0x204   : > { %v1159_v50 = vrot.slane %v1158_v55, 1 }
 0x205   : > { %p2238_p2 = pneg %p2237_p7 }
 0x206   : > { %v1160_v28 = vadd.f32 %v1159_v50, %v1158_v55 }
 0x207   : > { %p2243_p12 = pnand %p2242_p11, %p2238_p2 }
 0x208   : > { %1396 = vst [vmem:[%s2668_s19] sm:$0x1] %v1160_v28 }
 0x209   : > { %2246 = shalt.err (!%p2243_p12)
}
 0x20a   : > { %1976 = dma.vmem_to_hbm [thread:$0]  (%p2442_p0), %s1479_s20, 256, %s1481_s25, %s3010_s17  }
 0x20b PF: > { %p2011_p13 = scmp.ge.s32.totalorder %s2297_s30, 2  ;;  %s1492_s19 = sand.u32 1, %s2285_s27  }
 0x20c   : > { %s1493_s13 = scalar_lea.sflag [#allocation4], %s1492_s19 }
 0x20d   : > { %p1995_p3 = pnand %p2011_p13, %p2393_p6 }
 0x20f   : > { %p1996_p5 = pneg %p1995_p3 }
 0x211   : > { %2276 = dma.done.wait (%p1996_p5), %s1493_s13, 1024  }
 0x212   : > { %2278 = vsyncadd (%p1996_p5), %s1493_s13, 4294966272  ;;  %s3186_s14 = sadd.s32 4294967294, %s2297_s30  }
 0x213   : > { %s1502_s21 = sand.u32 1, %s3186_s14  }
 0x214   : > { %s1503_s11 = scalar_lea.sflag [#allocation12], %s1502_s21 }
 0x215   : > { %2280 = dma.done.wait (%p1996_p5), %s1503_s11, 2304  }
 0x216   : > { %2282 = vsyncadd (%p1996_p5), %s1503_s11, 4294964992  ;;  %p27_p0 = scmp.ge.s32.totalorder %s2429_s15, 6   ;;  %s3187_s27 = smov %s2289_s28 }
 0x217   : > { %s3188_s28 = smov %s2293_s29  ;;  %s3189_s29 = smov %s2438_s23 }
 0x218   : > { %s3190_s30 = smov %s2429_s15  ;;  %29 = sbr.rel (!%p27_p0) target bundleno = 12 (0xc), region = 136 }
 0x21d   :  { %1519 = vsyncpa [#allocation3], 1 }
 0x21e   :  { %1521 = vsyncpa [#allocation3 + $0x1], 1 }
 0x21f   :  { %1522 = vsyncpa [#allocation8], 1 }
 0x220   :  { %1523 = vsyncpa [#allocation4], 1 }
 0x221   :  { %1525 = vsyncpa [#allocation4 + $0x1], 1 }
 0x222   :  { %1526 = vsyncpa [#allocation12], 1 }
 0x223   :  { %1528 = vsyncpa [#allocation12 + $0x1], 1 }
 0x224   :  { %1529 = vsyncpa [#allocation5], 1 }
 0x225   :  { %1531 = vsyncpa [#allocation5 + $0x1], 1 }

</bundles_post_ra>
